<compile_context>
chip_gen: v7x
topology: tpu7x:2x2x1
jax: 0.10.0
libtpu: 0.0.40
codegen_flags: <defaults>
</compile_context>

<pallas_src>
import jax
import jax.numpy as jnp
import numpy as np
from jax import lax
from jax.experimental import pallas as pl
from jax.experimental.pallas import tpu as pltpu

# ---------------- config consistent with the module ----------------
VOCAB = 50          # vocab_size
VOCAB_PAD = 64      # table rows padded to a multiple of 8
E = 16              # embedding_dim
H = 32              # hidden_dim
OUT = 3             # output_dim
PAD = 0             # pad_index
B = 2               # batch
BP = 8              # batch padded to one sublane group
T = 8               # sequence length
G = 4 * H           # per-direction gate width (i, f, g, o)
G2 = 8 * H          # both-direction gate width (gate-major, dir-interleaved)

HIGH = lax.Precision.HIGHEST


# ---------------------------- fused Pallas kernel ------------------------------
def fused_lstm_kernel(len_ref, ids_ref, table_ref, whh_ref, wfc_ref, bfc_ref, out_ref):
    f32 = jnp.float32

    # ---- embedding + input projection: one onehot @ folded-table matmul ----
    ids = ids_ref[...]                                            # (T*BP, 1) int32, time-major
    vocab_iota = lax.broadcasted_iota(jnp.int32, (T * BP, VOCAB_PAD), 1)
    onehot = (vocab_iota == ids).astype(f32)                      # (T*BP, VOCAB_PAD)
    # table row v = emb[v] @ W_ih + bias, with i/f/o columns pre-scaled by 0.5.
    xp = jnp.dot(onehot, table_ref[...], precision=HIGH,
                 preferred_element_type=f32)                      # (T*BP, 8H)

    # ---- loop invariants hoisted out of the recurrence ----
    col = lax.broadcasted_iota(jnp.int32, (BP, G2), 1)
    fwd_cols = (col % (2 * H)) < H                                # fwd-direction gate columns
    state_lane = lax.broadcasted_iota(jnp.int32, (BP, 2 * H), 1)
    is_fwd_state = state_lane < H                                 # fwd half of the state
    lens = len_ref[...]                                           # (BP, 1) int32

    xg_all = []
    valid_all = []
    for t in range(T):
        rt = T - 1 - t                                            # token index for bwd dir
        xg_all.append(jnp.where(fwd_cols,
                                xp[t * BP:(t + 1) * BP, :],
                                xp[rt * BP:(rt + 1) * BP, :]))    # (BP, 8H)
        tok = jnp.where(is_fwd_state, t, rt)                      # per-lane token index
        valid_all.append(lens > tok)                              # (BP, 2H) bool

    w_hh = whh_ref[...]                                           # (2H, 8H), block-diag, gate-scaled

    h = jnp.zeros((BP, 2 * H), f32)                               # [h_fwd | h_bwd]
    c = jnp.zeros((BP, 2 * H), f32)

    # ---- recurrence: fully unrolled (T=8), both directions per step ----
    # Constant RHS across all 8 steps -> MXU weight stays resident.
    for t in range(T):
        g = xg_all[t] + jnp.dot(h, w_hh, precision=HIGH,
                                preferred_element_type=f32)       # (BP, 8H)
        tg = jnp.tanh(g)                                          # single EUP op, 256 lanes
        # sigmoid(x) = 0.5*tanh(0.5x)+0.5 ; 0.5 pre-scale folded into table/W_hh columns
        i_g = 0.5 * tg[:, 0 * H:2 * H] + 0.5
        f_g = 0.5 * tg[:, 2 * H:4 * H] + 0.5
        g_g = tg[:, 4 * H:6 * H]
        o_g = 0.5 * tg[:, 6 * H:8 * H] + 0.5
        c_new = f_g * c + i_g * g_g
        h_new = o_g * jnp.tanh(c_new)
        # packed-sequence masking: advance state only while the token is valid.
        h = jnp.where(valid_all[t], h_new, h)
        c = jnp.where(valid_all[t], c_new, c)

    # ---- fused head: h is already cat(h_fwd, h_bwd); LayerNorm folded into FC ----
    mean = jnp.mean(h, axis=-1, keepdims=True)
    var = jnp.mean(jnp.square(h - mean), axis=-1, keepdims=True)
    normed = (h - mean) * lax.rsqrt(var + 1e-5)
    out_ref[...] = (jnp.dot(normed, wfc_ref[...], precision=HIGH,
                            preferred_element_type=f32) + bfc_ref[...])


# ------------------------------ wrapper ----------------------------------
VMEM = pltpu.MemorySpace.VMEM


@jax.jit
def model_forward(params, ids, lengths):
    # time-major token ids, batch padded to BP rows with PAD tokens: row = t*BP + b
    ids_tb = jnp.transpose(ids, (1, 0))                            # (T, B)
    ids_tb = jnp.pad(ids_tb, ((0, 0), (0, BP - B)), constant_values=PAD)
    ids_tb = ids_tb.reshape(T * BP, 1).astype(jnp.int32)
    # lengths padded with 0 so padded rows never update state
    lens = jnp.pad(lengths.astype(jnp.int32), (0, BP - B)).reshape(BP, 1)

    out = pl.pallas_call(
        fused_lstm_kernel,
        out_shape=jax.ShapeDtypeStruct((BP, OUT), jnp.float32),
        in_specs=[
            pl.BlockSpec(memory_space=VMEM),                       # lengths   (BP, 1) int32
            pl.BlockSpec(memory_space=VMEM),                       # ids       (T*BP, 1) int32
            pl.BlockSpec(memory_space=VMEM),                       # table     (VOCAB_PAD, 8H)
            pl.BlockSpec(memory_space=VMEM),                       # W_hh_bd   (2H, 8H)
            pl.BlockSpec(memory_space=VMEM),                       # W_fc_eff  (2H, OUT)
            pl.BlockSpec(memory_space=VMEM),                       # b_fc_eff  (1, OUT)
        ],
        out_specs=pl.BlockSpec(memory_space=VMEM),
    )(lens, ids_tb, params["table"], params["w_hh_bd"],
      params["w_fc_eff"], params["b_fc_eff"])
    return out[:B]                                                 # drop padded batch rows


def make_kernel_params(raw):
    """Fold PyTorch-layout weights into the kernel's layouts (done once, offline):
    - (VOCAB_PAD, 8H) table = embedding @ W_ih + bias, gate-major / dir-interleaved cols
    - block-diagonal (2H, 8H) W_hh
    - 0.5 sigmoid pre-scale folded into i/f/o columns of table and W_hh
    - LayerNorm gamma/beta folded into the FC head."""
    w_ih, w_hh = raw["w_ih"], raw["w_hh"]                          # (2, 4H, E), (2, 4H, H)

    # input weights: (dir, 4H, E) -> (E, 8H) with columns [i_f i_b f_f f_b g_f g_b o_f o_b]
    w_ih_g = w_ih.reshape(2, 4, H, E)
    w_ih_all = jnp.transpose(w_ih_g, (3, 1, 0, 2)).reshape(E, G2)
    bias = (raw["b_ih"] + raw["b_hh"]).reshape(2, 4, H)
    bias_all = jnp.transpose(bias, (1, 0, 2)).reshape(1, G2)

    # sigmoid-via-tanh pre-scale: 0.5 on i/f (cols 0:4H) and o (cols 6H:8H), 1.0 on g
    gate_scale = jnp.concatenate([
        jnp.full((4 * H,), 0.5, jnp.float32),
        jnp.ones((2 * H,), jnp.float32),
        jnp.full((2 * H,), 0.5, jnp.float32)]).reshape(1, G2)

    # folded table, padded to VOCAB_PAD rows (sublane alignment)
    table = (jnp.dot(raw["embedding"], w_ih_all, precision=HIGH) + bias_all) * gate_scale
    table = jnp.pad(table, ((0, VOCAB_PAD - VOCAB), (0, 0)))

    # recurrent weights: block-diagonal over direction -> (2H, 8H), gate-scaled
    w_hh_g = w_hh.reshape(2, 4, H, H)                              # (dir, gate, hout, hin)
    w_hh_t = jnp.transpose(w_hh_g, (0, 3, 1, 2))                   # (dir, hin, gate, hout)
    bd = jnp.zeros((2, H, 4, 2, H), jnp.float32)
    bd = bd.at[0, :, :, 0, :].set(w_hh_t[0])
    bd = bd.at[1, :, :, 1, :].set(w_hh_t[1])
    w_hh_bd = bd.reshape(2 * H, G2) * gate_scale

    # LayerNorm gamma/beta folded into the FC head
    w_fc_t = jnp.transpose(raw["w_fc"])                            # (2H, OUT)
    w_fc_eff = raw["ln_gamma"][:, None] * w_fc_t
    b_fc_eff = (jnp.dot(raw["ln_beta"][None, :], w_fc_t, precision=HIGH)
                + raw["b_fc"].reshape(1, OUT))

    return {"table": table, "w_hh_bd": w_hh_bd,
            "w_fc_eff": w_fc_eff, "b_fc_eff": b_fc_eff}


# -------------------------- pure-JAX reference ----------------------------
def reference_forward(raw, ids, lengths):
    emb = raw["embedding"][ids]                                    # (B, T, E); dropout = identity
    lengths = lengths.astype(jnp.int32)

    def run_dir(d):
        h = jnp.zeros((B, H), jnp.float32)
        c = jnp.zeros((B, H), jnp.float32)
        order = range(T) if d == 0 else range(T - 1, -1, -1)
        for tok in order:
            x_t = emb[:, tok, :]
            gates = (jnp.dot(x_t, raw["w_ih"][d].T, precision=HIGH)
                     + jnp.dot(h, raw["w_hh"][d].T, precision=HIGH)
                     + raw["b_ih"][d] + raw["b_hh"][d])
            i_g = jax.nn.sigmoid(gates[:, :H])
            f_g = jax.nn.sigmoid(gates[:, H:2 * H])
            g_g = jnp.tanh(gates[:, 2 * H:3 * H])
            o_g = jax.nn.sigmoid(gates[:, 3 * H:])
            c_new = f_g * c + i_g * g_g
            h_new = o_g * jnp.tanh(c_new)
            m = lengths[:, None] > tok
            h = jnp.where(m, h_new, h)
            c = jnp.where(m, c_new, c)
        return h

    hidden = jnp.concatenate([run_dir(0), run_dir(1)], axis=-1)    # cat(fwd, bwd)
    mean = hidden.mean(-1, keepdims=True)
    var = jnp.square(hidden - mean).mean(-1, keepdims=True)
    normed = (hidden - mean) / jnp.sqrt(var + 1e-5)
    y = normed * raw["ln_gamma"] + raw["ln_beta"]
    return jnp.dot(y, raw["w_fc"].T, precision=HIGH) + raw["b_fc"]


# --------------------------------- main ------------------------------------
if __name__ == "__main__":
    key = jax.random.PRNGKey(0)
    k = jax.random.split(key, 10)

    # deterministic parameters in PyTorch layouts (then re-laid for the kernel)
    embedding = jax.random.normal(k[0], (VOCAB, E), jnp.float32) * 0.1
    embedding = embedding.at[PAD].set(0.0)                         # padding_idx row
    raw = {
        "embedding": embedding,
        "w_ih": jax.random.normal(k[1], (2, G, E), jnp.float32) * 0.1,
        "w_hh": jax.random.normal(k[2], (2, G, H), jnp.float32) * 0.1,
        "b_ih": jax.random.normal(k[3], (2, G), jnp.float32) * 0.1,
        "b_hh": jax.random.normal(k[4], (2, G), jnp.float32) * 0.1,
        "w_fc": jax.random.normal(k[5], (OUT, 2 * H), jnp.float32) * 0.1,
        "b_fc": jax.random.normal(k[6], (OUT,), jnp.float32) * 0.1,
        "ln_gamma": 1.0 + 0.1 * jax.random.normal(k[8], (2 * H,), jnp.float32),
        "ln_beta": 0.1 * jax.random.normal(k[9], (2 * H,), jnp.float32),
    }
    params = make_kernel_params(raw)

    # deterministic example inputs: padded token ids + lengths
    lengths = jnp.array([T, 5], dtype=jnp.int32)                   # (B,)
    ids = jax.random.randint(k[7], (B, T), 1, VOCAB, dtype=jnp.int32)
    pos = jnp.arange(T, dtype=jnp.int32)[None, :]
    ids = jnp.where(pos < lengths[:, None], ids, PAD)              # (B, T)

    out = jax.block_until_ready(model_forward(params, ids, lengths))
    ref = jax.block_until_ready(reference_forward(raw, ids, lengths))

    # HIGHEST-precision dots inside the kernel -> expected error ~1e-5; tolerance kept
    # generous to be robust against EUP transcendental approximation differences.
    np.testing.assert_allclose(np.asarray(out), np.asarray(ref), rtol=2e-2, atol=1e-2)

    print("KERNEL_OK")
</pallas_src>

<mosaic_0001>
module attributes {stable_mosaic.version = 11 : i64} {
  func.func @fused_lstm_kernel(%arg0: memref<8x1xi32, #tpu.memory_space<vmem>>, %arg1: memref<64x1xi32, #tpu.memory_space<vmem>>, %arg2: memref<64x256xf32, #tpu.memory_space<vmem>>, %arg3: memref<64x256xf32, #tpu.memory_space<vmem>>, %arg4: memref<64x3xf32, #tpu.memory_space<vmem>>, %arg5: memref<1x3xf32, #tpu.memory_space<vmem>>, %arg6: memref<8x3xf32, #tpu.memory_space<vmem>>) attributes {dimension_semantics = [], scalar_prefetch = 0 : i64, scratch_operands = 0 : i64, tpu.core_type = #tpu.core_type<tc>} {
    %c0 = arith.constant 0 : index
    %c0_0 = arith.constant 0 : index
    %0 = vector.load %arg1[%c0, %c0_0] : memref<64x1xi32, #tpu.memory_space<vmem>>, vector<64x1xi32>
    %1 = tpu.iota {dimensions = array<i32: 1>} : vector<64x64xi32>
    %2 = vector.broadcast %0 : vector<64x1xi32> to vector<64x64xi32>
    %3 = arith.cmpi eq, %1, %2 : vector<64x64xi32>
    %4 = arith.extui %3 : vector<64x64xi1> to vector<64x64xi32>
    %5 = arith.sitofp %4 : vector<64x64xi32> to vector<64x64xf32>
    %c0_1 = arith.constant 0 : index
    %c0_2 = arith.constant 0 : index
    %6 = vector.load %arg2[%c0_1, %c0_2] : memref<64x256xf32, #tpu.memory_space<vmem>>, vector<64x256xf32>
    %cst = arith.constant dense<0.000000e+00> : vector<64x256xf32>
    %7 = tpu.matmul %5, %6, %cst {dimension_numbers = #tpu.dot_dimension_numbers<[1], [0], [0], [1], [0, 0, 1, 1], [], []>, precision = #tpu.contract_precision<fp32>} : vector<64x64xf32>, vector<64x256xf32>, vector<64x256xf32> -> vector<64x256xf32>
    %8 = tpu.iota {dimensions = array<i32: 1>} : vector<8x256xi32>
    %c64_i32 = arith.constant 64 : i32
    %c0_i32 = arith.constant 0 : i32
    %9 = arith.cmpi eq, %c64_i32, %c0_i32 : i32
    %c1_i32 = arith.constant 1 : i32
    %10 = arith.select %9, %c1_i32, %c64_i32 : i32
    %11 = vector.broadcast %10 : i32 to vector<8x256xi32>
    %12 = arith.remsi %8, %11 : vector<8x256xi32>
    %c0_i32_3 = arith.constant 0 : i32
    %13 = vector.broadcast %c0_i32_3 : i32 to vector<8x256xi32>
    %14 = arith.cmpi ne, %12, %13 : vector<8x256xi32>
    %c0_i32_4 = arith.constant 0 : i32
    %15 = vector.broadcast %c0_i32_4 : i32 to vector<8x256xi32>
    %16 = arith.cmpi slt, %12, %15 : vector<8x256xi32>
    %c0_i32_5 = arith.constant 0 : i32
    %17 = arith.cmpi slt, %10, %c0_i32_5 : i32
    %18 = vector.broadcast %17 : i1 to vector<8x256xi1>
    %19 = vector.broadcast %18 : vector<8x256xi1> to vector<8x256xi1>
    %20 = arith.xori %16, %19 : vector<8x256xi1>
    %21 = arith.andi %20, %14 : vector<8x256xi1>
    %22 = vector.broadcast %10 : i32 to vector<8x256xi32>
    %23 = arith.addi %12, %22 : vector<8x256xi32>
    %24 = arith.select %21, %23, %12 : vector<8x256xi1>, vector<8x256xi32>
    %c32_i32 = arith.constant 32 : i32
    %25 = vector.broadcast %c32_i32 : i32 to vector<8x256xi32>
    %26 = arith.cmpi slt, %24, %25 : vector<8x256xi32>
    %27 = tpu.iota {dimensions = array<i32: 1>} : vector<8x64xi32>
    %c32_i32_6 = arith.constant 32 : i32
    %28 = vector.broadcast %c32_i32_6 : i32 to vector<8x64xi32>
    %29 = arith.cmpi slt, %27, %28 : vector<8x64xi32>
    %c0_7 = arith.constant 0 : index
    %c0_8 = arith.constant 0 : index
    %30 = vector.load %arg0[%c0_7, %c0_8] : memref<8x1xi32, #tpu.memory_space<vmem>>, vector<8x1xi32>
    %31 = vector.extract_strided_slice %7 {offsets = [0, 0], sizes = [8, 256], strides = [1, 1]} : vector<64x256xf32> to vector<8x256xf32>
    %32 = vector.extract_strided_slice %7 {offsets = [56, 0], sizes = [8, 256], strides = [1, 1]} : vector<64x256xf32> to vector<8x256xf32>
    %33 = arith.select %26, %31, %32 : vector<8x256xi1>, vector<8x256xf32>
    %c0_i32_9 = arith.constant 0 : i32
    %c7_i32 = arith.constant 7 : i32
    %34 = vector.broadcast %c0_i32_9 : i32 to vector<8x64xi32>
    %35 = vector.broadcast %c7_i32 : i32 to vector<8x64xi32>
    %36 = arith.select %29, %34, %35 : vector<8x64xi1>, vector<8x64xi32>
    %37 = vector.broadcast %30 : vector<8x1xi32> to vector<8x64xi32>
    %38 = arith.cmpi sgt, %37, %36 : vector<8x64xi32>
    %39 = vector.extract_strided_slice %7 {offsets = [8, 0], sizes = [8, 256], strides = [1, 1]} : vector<64x256xf32> to vector<8x256xf32>
    %40 = vector.extract_strided_slice %7 {offsets = [48, 0], sizes = [8, 256], strides = [1, 1]} : vector<64x256xf32> to vector<8x256xf32>
    %41 = arith.select %26, %39, %40 : vector<8x256xi1>, vector<8x256xf32>
    %c1_i32_10 = arith.constant 1 : i32
    %c6_i32 = arith.constant 6 : i32
    %42 = vector.broadcast %c1_i32_10 : i32 to vector<8x64xi32>
    %43 = vector.broadcast %c6_i32 : i32 to vector<8x64xi32>
    %44 = arith.select %29, %42, %43 : vector<8x64xi1>, vector<8x64xi32>
    %45 = vector.broadcast %30 : vector<8x1xi32> to vector<8x64xi32>
    %46 = arith.cmpi sgt, %45, %44 : vector<8x64xi32>
    %47 = vector.extract_strided_slice %7 {offsets = [16, 0], sizes = [8, 256], strides = [1, 1]} : vector<64x256xf32> to vector<8x256xf32>
    %48 = vector.extract_strided_slice %7 {offsets = [40, 0], sizes = [8, 256], strides = [1, 1]} : vector<64x256xf32> to vector<8x256xf32>
    %49 = arith.select %26, %47, %48 : vector<8x256xi1>, vector<8x256xf32>
    %c2_i32 = arith.constant 2 : i32
    %c5_i32 = arith.constant 5 : i32
    %50 = vector.broadcast %c2_i32 : i32 to vector<8x64xi32>
    %51 = vector.broadcast %c5_i32 : i32 to vector<8x64xi32>
    %52 = arith.select %29, %50, %51 : vector<8x64xi1>, vector<8x64xi32>
    %53 = vector.broadcast %30 : vector<8x1xi32> to vector<8x64xi32>
    %54 = arith.cmpi sgt, %53, %52 : vector<8x64xi32>
    %55 = vector.extract_strided_slice %7 {offsets = [24, 0], sizes = [8, 256], strides = [1, 1]} : vector<64x256xf32> to vector<8x256xf32>
    %56 = vector.extract_strided_slice %7 {offsets = [32, 0], sizes = [8, 256], strides = [1, 1]} : vector<64x256xf32> to vector<8x256xf32>
    %57 = arith.select %26, %55, %56 : vector<8x256xi1>, vector<8x256xf32>
    %c3_i32 = arith.constant 3 : i32
    %c4_i32 = arith.constant 4 : i32
    %58 = vector.broadcast %c3_i32 : i32 to vector<8x64xi32>
    %59 = vector.broadcast %c4_i32 : i32 to vector<8x64xi32>
    %60 = arith.select %29, %58, %59 : vector<8x64xi1>, vector<8x64xi32>
    %61 = vector.broadcast %30 : vector<8x1xi32> to vector<8x64xi32>
    %62 = arith.cmpi sgt, %61, %60 : vector<8x64xi32>
    %63 = vector.extract_strided_slice %7 {offsets = [32, 0], sizes = [8, 256], strides = [1, 1]} : vector<64x256xf32> to vector<8x256xf32>
    %64 = vector.extract_strided_slice %7 {offsets = [24, 0], sizes = [8, 256], strides = [1, 1]} : vector<64x256xf32> to vector<8x256xf32>
    %65 = arith.select %26, %63, %64 : vector<8x256xi1>, vector<8x256xf32>
    %c4_i32_11 = arith.constant 4 : i32
    %c3_i32_12 = arith.constant 3 : i32
    %66 = vector.broadcast %c4_i32_11 : i32 to vector<8x64xi32>
    %67 = vector.broadcast %c3_i32_12 : i32 to vector<8x64xi32>
    %68 = arith.select %29, %66, %67 : vector<8x64xi1>, vector<8x64xi32>
    %69 = vector.broadcast %30 : vector<8x1xi32> to vector<8x64xi32>
    %70 = arith.cmpi sgt, %69, %68 : vector<8x64xi32>
    %71 = vector.extract_strided_slice %7 {offsets = [40, 0], sizes = [8, 256], strides = [1, 1]} : vector<64x256xf32> to vector<8x256xf32>
    %72 = vector.extract_strided_slice %7 {offsets = [16, 0], sizes = [8, 256], strides = [1, 1]} : vector<64x256xf32> to vector<8x256xf32>
    %73 = arith.select %26, %71, %72 : vector<8x256xi1>, vector<8x256xf32>
    %c5_i32_13 = arith.constant 5 : i32
    %c2_i32_14 = arith.constant 2 : i32
    %74 = vector.broadcast %c5_i32_13 : i32 to vector<8x64xi32>
    %75 = vector.broadcast %c2_i32_14 : i32 to vector<8x64xi32>
    %76 = arith.select %29, %74, %75 : vector<8x64xi1>, vector<8x64xi32>
    %77 = vector.broadcast %30 : vector<8x1xi32> to vector<8x64xi32>
    %78 = arith.cmpi sgt, %77, %76 : vector<8x64xi32>
    %79 = vector.extract_strided_slice %7 {offsets = [48, 0], sizes = [8, 256], strides = [1, 1]} : vector<64x256xf32> to vector<8x256xf32>
    %80 = vector.extract_strided_slice %7 {offsets = [8, 0], sizes = [8, 256], strides = [1, 1]} : vector<64x256xf32> to vector<8x256xf32>
    %81 = arith.select %26, %79, %80 : vector<8x256xi1>, vector<8x256xf32>
    %c6_i32_15 = arith.constant 6 : i32
    %c1_i32_16 = arith.constant 1 : i32
    %82 = vector.broadcast %c6_i32_15 : i32 to vector<8x64xi32>
    %83 = vector.broadcast %c1_i32_16 : i32 to vector<8x64xi32>
    %84 = arith.select %29, %82, %83 : vector<8x64xi1>, vector<8x64xi32>
    %85 = vector.broadcast %30 : vector<8x1xi32> to vector<8x64xi32>
    %86 = arith.cmpi sgt, %85, %84 : vector<8x64xi32>
    %87 = vector.extract_strided_slice %7 {offsets = [56, 0], sizes = [8, 256], strides = [1, 1]} : vector<64x256xf32> to vector<8x256xf32>
    %88 = vector.extract_strided_slice %7 {offsets = [0, 0], sizes = [8, 256], strides = [1, 1]} : vector<64x256xf32> to vector<8x256xf32>
    %89 = arith.select %26, %87, %88 : vector<8x256xi1>, vector<8x256xf32>
    %c7_i32_17 = arith.constant 7 : i32
    %c0_i32_18 = arith.constant 0 : i32
    %90 = vector.broadcast %c7_i32_17 : i32 to vector<8x64xi32>
    %91 = vector.broadcast %c0_i32_18 : i32 to vector<8x64xi32>
    %92 = arith.select %29, %90, %91 : vector<8x64xi1>, vector<8x64xi32>
    %93 = vector.broadcast %30 : vector<8x1xi32> to vector<8x64xi32>
    %94 = arith.cmpi sgt, %93, %92 : vector<8x64xi32>
    %c0_19 = arith.constant 0 : index
    %c0_20 = arith.constant 0 : index
    %95 = vector.load %arg3[%c0_19, %c0_20] : memref<64x256xf32, #tpu.memory_space<vmem>>, vector<64x256xf32>
    %cst_21 = arith.constant 0.000000e+00 : f32
    %96 = vector.broadcast %cst_21 : f32 to vector<8x64xf32>
    %cst_22 = arith.constant 0.000000e+00 : f32
    %97 = vector.broadcast %cst_22 : f32 to vector<8x64xf32>
    %cst_23 = arith.constant dense<0.000000e+00> : vector<8x256xf32>
    %98 = tpu.matmul %96, %95, %cst_23 {dimension_numbers = #tpu.dot_dimension_numbers<[1], [0], [0], [1], [0, 0, 1, 1], [], []>, precision = #tpu.contract_precision<fp32>} : vector<8x64xf32>, vector<64x256xf32>, vector<8x256xf32> -> vector<8x256xf32>
    %99 = arith.addf %33, %98 : vector<8x256xf32>
    %100 = math.tanh %99 : vector<8x256xf32>
    %101 = vector.extract_strided_slice %100 {offsets = [0, 0], sizes = [8, 64], strides = [1, 1]} : vector<8x256xf32> to vector<8x64xf32>
    %cst_24 = arith.constant 5.000000e-01 : f32
    %102 = vector.broadcast %cst_24 : f32 to vector<8x64xf32>
    %103 = arith.mulf %102, %101 : vector<8x64xf32>
    %cst_25 = arith.constant 5.000000e-01 : f32
    %104 = vector.broadcast %cst_25 : f32 to vector<8x64xf32>
    %105 = arith.addf %103, %104 : vector<8x64xf32>
    %106 = vector.extract_strided_slice %100 {offsets = [0, 64], sizes = [8, 64], strides = [1, 1]} : vector<8x256xf32> to vector<8x64xf32>
    %cst_26 = arith.constant 5.000000e-01 : f32
    %107 = vector.broadcast %cst_26 : f32 to vector<8x64xf32>
    %108 = arith.mulf %107, %106 : vector<8x64xf32>
    %cst_27 = arith.constant 5.000000e-01 : f32
    %109 = vector.broadcast %cst_27 : f32 to vector<8x64xf32>
    %110 = arith.addf %108, %109 : vector<8x64xf32>
    %111 = vector.extract_strided_slice %100 {offsets = [0, 128], sizes = [8, 64], strides = [1, 1]} : vector<8x256xf32> to vector<8x64xf32>
    %112 = vector.extract_strided_slice %100 {offsets = [0, 192], sizes = [8, 64], strides = [1, 1]} : vector<8x256xf32> to vector<8x64xf32>
    %cst_28 = arith.constant 5.000000e-01 : f32
    %113 = vector.broadcast %cst_28 : f32 to vector<8x64xf32>
    %114 = arith.mulf %113, %112 : vector<8x64xf32>
    %cst_29 = arith.constant 5.000000e-01 : f32
    %115 = vector.broadcast %cst_29 : f32 to vector<8x64xf32>
    %116 = arith.addf %114, %115 : vector<8x64xf32>
    %117 = arith.mulf %110, %97 : vector<8x64xf32>
    %118 = arith.mulf %105, %111 : vector<8x64xf32>
    %119 = arith.addf %117, %118 : vector<8x64xf32>
    %120 = math.tanh %119 : vector<8x64xf32>
    %121 = arith.mulf %116, %120 : vector<8x64xf32>
    %122 = arith.select %38, %121, %96 : vector<8x64xi1>, vector<8x64xf32>
    %123 = arith.select %38, %119, %97 : vector<8x64xi1>, vector<8x64xf32>
    %cst_30 = arith.constant dense<0.000000e+00> : vector<8x256xf32>
    %124 = tpu.matmul %122, %95, %cst_30 {dimension_numbers = #tpu.dot_dimension_numbers<[1], [0], [0], [1], [0, 0, 1, 1], [], []>, precision = #tpu.contract_precision<fp32>} : vector<8x64xf32>, vector<64x256xf32>, vector<8x256xf32> -> vector<8x256xf32>
    %125 = arith.addf %41, %124 : vector<8x256xf32>
    %126 = math.tanh %125 : vector<8x256xf32>
    %127 = vector.extract_strided_slice %126 {offsets = [0, 0], sizes = [8, 64], strides = [1, 1]} : vector<8x256xf32> to vector<8x64xf32>
    %cst_31 = arith.constant 5.000000e-01 : f32
    %128 = vector.broadcast %cst_31 : f32 to vector<8x64xf32>
    %129 = arith.mulf %128, %127 : vector<8x64xf32>
    %cst_32 = arith.constant 5.000000e-01 : f32
    %130 = vector.broadcast %cst_32 : f32 to vector<8x64xf32>
    %131 = arith.addf %129, %130 : vector<8x64xf32>
    %132 = vector.extract_strided_slice %126 {offsets = [0, 64], sizes = [8, 64], strides = [1, 1]} : vector<8x256xf32> to vector<8x64xf32>
    %cst_33 = arith.constant 5.000000e-01 : f32
    %133 = vector.broadcast %cst_33 : f32 to vector<8x64xf32>
    %134 = arith.mulf %133, %132 : vector<8x64xf32>
    %cst_34 = arith.constant 5.000000e-01 : f32
    %135 = vector.broadcast %cst_34 : f32 to vector<8x64xf32>
    %136 = arith.addf %134, %135 : vector<8x64xf32>
    %137 = vector.extract_strided_slice %126 {offsets = [0, 128], sizes = [8, 64], strides = [1, 1]} : vector<8x256xf32> to vector<8x64xf32>
    %138 = vector.extract_strided_slice %126 {offsets = [0, 192], sizes = [8, 64], strides = [1, 1]} : vector<8x256xf32> to vector<8x64xf32>
    %cst_35 = arith.constant 5.000000e-01 : f32
    %139 = vector.broadcast %cst_35 : f32 to vector<8x64xf32>
    %140 = arith.mulf %139, %138 : vector<8x64xf32>
    %cst_36 = arith.constant 5.000000e-01 : f32
    %141 = vector.broadcast %cst_36 : f32 to vector<8x64xf32>
    %142 = arith.addf %140, %141 : vector<8x64xf32>
    %143 = arith.mulf %136, %123 : vector<8x64xf32>
    %144 = arith.mulf %131, %137 : vector<8x64xf32>
    %145 = arith.addf %143, %144 : vector<8x64xf32>
    %146 = math.tanh %145 : vector<8x64xf32>
    %147 = arith.mulf %142, %146 : vector<8x64xf32>
    %148 = arith.select %46, %147, %122 : vector<8x64xi1>, vector<8x64xf32>
    %149 = arith.select %46, %145, %123 : vector<8x64xi1>, vector<8x64xf32>
    %cst_37 = arith.constant dense<0.000000e+00> : vector<8x256xf32>
    %150 = tpu.matmul %148, %95, %cst_37 {dimension_numbers = #tpu.dot_dimension_numbers<[1], [0], [0], [1], [0, 0, 1, 1], [], []>, precision = #tpu.contract_precision<fp32>} : vector<8x64xf32>, vector<64x256xf32>, vector<8x256xf32> -> vector<8x256xf32>
    %151 = arith.addf %49, %150 : vector<8x256xf32>
    %152 = math.tanh %151 : vector<8x256xf32>
    %153 = vector.extract_strided_slice %152 {offsets = [0, 0], sizes = [8, 64], strides = [1, 1]} : vector<8x256xf32> to vector<8x64xf32>
    %cst_38 = arith.constant 5.000000e-01 : f32
    %154 = vector.broadcast %cst_38 : f32 to vector<8x64xf32>
    %155 = arith.mulf %154, %153 : vector<8x64xf32>
    %cst_39 = arith.constant 5.000000e-01 : f32
    %156 = vector.broadcast %cst_39 : f32 to vector<8x64xf32>
    %157 = arith.addf %155, %156 : vector<8x64xf32>
    %158 = vector.extract_strided_slice %152 {offsets = [0, 64], sizes = [8, 64], strides = [1, 1]} : vector<8x256xf32> to vector<8x64xf32>
    %cst_40 = arith.constant 5.000000e-01 : f32
    %159 = vector.broadcast %cst_40 : f32 to vector<8x64xf32>
    %160 = arith.mulf %159, %158 : vector<8x64xf32>
    %cst_41 = arith.constant 5.000000e-01 : f32
    %161 = vector.broadcast %cst_41 : f32 to vector<8x64xf32>
    %162 = arith.addf %160, %161 : vector<8x64xf32>
    %163 = vector.extract_strided_slice %152 {offsets = [0, 128], sizes = [8, 64], strides = [1, 1]} : vector<8x256xf32> to vector<8x64xf32>
    %164 = vector.extract_strided_slice %152 {offsets = [0, 192], sizes = [8, 64], strides = [1, 1]} : vector<8x256xf32> to vector<8x64xf32>
    %cst_42 = arith.constant 5.000000e-01 : f32
    %165 = vector.broadcast %cst_42 : f32 to vector<8x64xf32>
    %166 = arith.mulf %165, %164 : vector<8x64xf32>
    %cst_43 = arith.constant 5.000000e-01 : f32
    %167 = vector.broadcast %cst_43 : f32 to vector<8x64xf32>
    %168 = arith.addf %166, %167 : vector<8x64xf32>
    %169 = arith.mulf %162, %149 : vector<8x64xf32>
    %170 = arith.mulf %157, %163 : vector<8x64xf32>
    %171 = arith.addf %169, %170 : vector<8x64xf32>
    %172 = math.tanh %171 : vector<8x64xf32>
    %173 = arith.mulf %168, %172 : vector<8x64xf32>
    %174 = arith.select %54, %173, %148 : vector<8x64xi1>, vector<8x64xf32>
    %175 = arith.select %54, %171, %149 : vector<8x64xi1>, vector<8x64xf32>
    %cst_44 = arith.constant dense<0.000000e+00> : vector<8x256xf32>
    %176 = tpu.matmul %174, %95, %cst_44 {dimension_numbers = #tpu.dot_dimension_numbers<[1], [0], [0], [1], [0, 0, 1, 1], [], []>, precision = #tpu.contract_precision<fp32>} : vector<8x64xf32>, vector<64x256xf32>, vector<8x256xf32> -> vector<8x256xf32>
    %177 = arith.addf %57, %176 : vector<8x256xf32>
    %178 = math.tanh %177 : vector<8x256xf32>
    %179 = vector.extract_strided_slice %178 {offsets = [0, 0], sizes = [8, 64], strides = [1, 1]} : vector<8x256xf32> to vector<8x64xf32>
    %cst_45 = arith.constant 5.000000e-01 : f32
    %180 = vector.broadcast %cst_45 : f32 to vector<8x64xf32>
    %181 = arith.mulf %180, %179 : vector<8x64xf32>
    %cst_46 = arith.constant 5.000000e-01 : f32
    %182 = vector.broadcast %cst_46 : f32 to vector<8x64xf32>
    %183 = arith.addf %181, %182 : vector<8x64xf32>
    %184 = vector.extract_strided_slice %178 {offsets = [0, 64], sizes = [8, 64], strides = [1, 1]} : vector<8x256xf32> to vector<8x64xf32>
    %cst_47 = arith.constant 5.000000e-01 : f32
    %185 = vector.broadcast %cst_47 : f32 to vector<8x64xf32>
    %186 = arith.mulf %185, %184 : vector<8x64xf32>
    %cst_48 = arith.constant 5.000000e-01 : f32
    %187 = vector.broadcast %cst_48 : f32 to vector<8x64xf32>
    %188 = arith.addf %186, %187 : vector<8x64xf32>
    %189 = vector.extract_strided_slice %178 {offsets = [0, 128], sizes = [8, 64], strides = [1, 1]} : vector<8x256xf32> to vector<8x64xf32>
    %190 = vector.extract_strided_slice %178 {offsets = [0, 192], sizes = [8, 64], strides = [1, 1]} : vector<8x256xf32> to vector<8x64xf32>
    %cst_49 = arith.constant 5.000000e-01 : f32
    %191 = vector.broadcast %cst_49 : f32 to vector<8x64xf32>
    %192 = arith.mulf %191, %190 : vector<8x64xf32>
    %cst_50 = arith.constant 5.000000e-01 : f32
    %193 = vector.broadcast %cst_50 : f32 to vector<8x64xf32>
    %194 = arith.addf %192, %193 : vector<8x64xf32>
    %195 = arith.mulf %188, %175 : vector<8x64xf32>
    %196 = arith.mulf %183, %189 : vector<8x64xf32>
    %197 = arith.addf %195, %196 : vector<8x64xf32>
    %198 = math.tanh %197 : vector<8x64xf32>
    %199 = arith.mulf %194, %198 : vector<8x64xf32>
    %200 = arith.select %62, %199, %174 : vector<8x64xi1>, vector<8x64xf32>
    %201 = arith.select %62, %197, %175 : vector<8x64xi1>, vector<8x64xf32>
    %cst_51 = arith.constant dense<0.000000e+00> : vector<8x256xf32>
    %202 = tpu.matmul %200, %95, %cst_51 {dimension_numbers = #tpu.dot_dimension_numbers<[1], [0], [0], [1], [0, 0, 1, 1], [], []>, precision = #tpu.contract_precision<fp32>} : vector<8x64xf32>, vector<64x256xf32>, vector<8x256xf32> -> vector<8x256xf32>
    %203 = arith.addf %65, %202 : vector<8x256xf32>
    %204 = math.tanh %203 : vector<8x256xf32>
    %205 = vector.extract_strided_slice %204 {offsets = [0, 0], sizes = [8, 64], strides = [1, 1]} : vector<8x256xf32> to vector<8x64xf32>
    %cst_52 = arith.constant 5.000000e-01 : f32
    %206 = vector.broadcast %cst_52 : f32 to vector<8x64xf32>
    %207 = arith.mulf %206, %205 : vector<8x64xf32>
    %cst_53 = arith.constant 5.000000e-01 : f32
    %208 = vector.broadcast %cst_53 : f32 to vector<8x64xf32>
    %209 = arith.addf %207, %208 : vector<8x64xf32>
    %210 = vector.extract_strided_slice %204 {offsets = [0, 64], sizes = [8, 64], strides = [1, 1]} : vector<8x256xf32> to vector<8x64xf32>
    %cst_54 = arith.constant 5.000000e-01 : f32
    %211 = vector.broadcast %cst_54 : f32 to vector<8x64xf32>
    %212 = arith.mulf %211, %210 : vector<8x64xf32>
    %cst_55 = arith.constant 5.000000e-01 : f32
    %213 = vector.broadcast %cst_55 : f32 to vector<8x64xf32>
    %214 = arith.addf %212, %213 : vector<8x64xf32>
    %215 = vector.extract_strided_slice %204 {offsets = [0, 128], sizes = [8, 64], strides = [1, 1]} : vector<8x256xf32> to vector<8x64xf32>
    %216 = vector.extract_strided_slice %204 {offsets = [0, 192], sizes = [8, 64], strides = [1, 1]} : vector<8x256xf32> to vector<8x64xf32>
    %cst_56 = arith.constant 5.000000e-01 : f32
    %217 = vector.broadcast %cst_56 : f32 to vector<8x64xf32>
    %218 = arith.mulf %217, %216 : vector<8x64xf32>
    %cst_57 = arith.constant 5.000000e-01 : f32
    %219 = vector.broadcast %cst_57 : f32 to vector<8x64xf32>
    %220 = arith.addf %218, %219 : vector<8x64xf32>
    %221 = arith.mulf %214, %201 : vector<8x64xf32>
    %222 = arith.mulf %209, %215 : vector<8x64xf32>
    %223 = arith.addf %221, %222 : vector<8x64xf32>
    %224 = math.tanh %223 : vector<8x64xf32>
    %225 = arith.mulf %220, %224 : vector<8x64xf32>
    %226 = arith.select %70, %225, %200 : vector<8x64xi1>, vector<8x64xf32>
    %227 = arith.select %70, %223, %201 : vector<8x64xi1>, vector<8x64xf32>
    %cst_58 = arith.constant dense<0.000000e+00> : vector<8x256xf32>
    %228 = tpu.matmul %226, %95, %cst_58 {dimension_numbers = #tpu.dot_dimension_numbers<[1], [0], [0], [1], [0, 0, 1, 1], [], []>, precision = #tpu.contract_precision<fp32>} : vector<8x64xf32>, vector<64x256xf32>, vector<8x256xf32> -> vector<8x256xf32>
    %229 = arith.addf %73, %228 : vector<8x256xf32>
    %230 = math.tanh %229 : vector<8x256xf32>
    %231 = vector.extract_strided_slice %230 {offsets = [0, 0], sizes = [8, 64], strides = [1, 1]} : vector<8x256xf32> to vector<8x64xf32>
    %cst_59 = arith.constant 5.000000e-01 : f32
    %232 = vector.broadcast %cst_59 : f32 to vector<8x64xf32>
    %233 = arith.mulf %232, %231 : vector<8x64xf32>
    %cst_60 = arith.constant 5.000000e-01 : f32
    %234 = vector.broadcast %cst_60 : f32 to vector<8x64xf32>
    %235 = arith.addf %233, %234 : vector<8x64xf32>
    %236 = vector.extract_strided_slice %230 {offsets = [0, 64], sizes = [8, 64], strides = [1, 1]} : vector<8x256xf32> to vector<8x64xf32>
    %cst_61 = arith.constant 5.000000e-01 : f32
    %237 = vector.broadcast %cst_61 : f32 to vector<8x64xf32>
    %238 = arith.mulf %237, %236 : vector<8x64xf32>
    %cst_62 = arith.constant 5.000000e-01 : f32
    %239 = vector.broadcast %cst_62 : f32 to vector<8x64xf32>
    %240 = arith.addf %238, %239 : vector<8x64xf32>
    %241 = vector.extract_strided_slice %230 {offsets = [0, 128], sizes = [8, 64], strides = [1, 1]} : vector<8x256xf32> to vector<8x64xf32>
    %242 = vector.extract_strided_slice %230 {offsets = [0, 192], sizes = [8, 64], strides = [1, 1]} : vector<8x256xf32> to vector<8x64xf32>
    %cst_63 = arith.constant 5.000000e-01 : f32
    %243 = vector.broadcast %cst_63 : f32 to vector<8x64xf32>
    %244 = arith.mulf %243, %242 : vector<8x64xf32>
    %cst_64 = arith.constant 5.000000e-01 : f32
    %245 = vector.broadcast %cst_64 : f32 to vector<8x64xf32>
    %246 = arith.addf %244, %245 : vector<8x64xf32>
    %247 = arith.mulf %240, %227 : vector<8x64xf32>
    %248 = arith.mulf %235, %241 : vector<8x64xf32>
    %249 = arith.addf %247, %248 : vector<8x64xf32>
    %250 = math.tanh %249 : vector<8x64xf32>
    %251 = arith.mulf %246, %250 : vector<8x64xf32>
    %252 = arith.select %78, %251, %226 : vector<8x64xi1>, vector<8x64xf32>
    %253 = arith.select %78, %249, %227 : vector<8x64xi1>, vector<8x64xf32>
    %cst_65 = arith.constant dense<0.000000e+00> : vector<8x256xf32>
    %254 = tpu.matmul %252, %95, %cst_65 {dimension_numbers = #tpu.dot_dimension_numbers<[1], [0], [0], [1], [0, 0, 1, 1], [], []>, precision = #tpu.contract_precision<fp32>} : vector<8x64xf32>, vector<64x256xf32>, vector<8x256xf32> -> vector<8x256xf32>
    %255 = arith.addf %81, %254 : vector<8x256xf32>
    %256 = math.tanh %255 : vector<8x256xf32>
    %257 = vector.extract_strided_slice %256 {offsets = [0, 0], sizes = [8, 64], strides = [1, 1]} : vector<8x256xf32> to vector<8x64xf32>
    %cst_66 = arith.constant 5.000000e-01 : f32
    %258 = vector.broadcast %cst_66 : f32 to vector<8x64xf32>
    %259 = arith.mulf %258, %257 : vector<8x64xf32>
    %cst_67 = arith.constant 5.000000e-01 : f32
    %260 = vector.broadcast %cst_67 : f32 to vector<8x64xf32>
    %261 = arith.addf %259, %260 : vector<8x64xf32>
    %262 = vector.extract_strided_slice %256 {offsets = [0, 64], sizes = [8, 64], strides = [1, 1]} : vector<8x256xf32> to vector<8x64xf32>
    %cst_68 = arith.constant 5.000000e-01 : f32
    %263 = vector.broadcast %cst_68 : f32 to vector<8x64xf32>
    %264 = arith.mulf %263, %262 : vector<8x64xf32>
    %cst_69 = arith.constant 5.000000e-01 : f32
    %265 = vector.broadcast %cst_69 : f32 to vector<8x64xf32>
    %266 = arith.addf %264, %265 : vector<8x64xf32>
    %267 = vector.extract_strided_slice %256 {offsets = [0, 128], sizes = [8, 64], strides = [1, 1]} : vector<8x256xf32> to vector<8x64xf32>
    %268 = vector.extract_strided_slice %256 {offsets = [0, 192], sizes = [8, 64], strides = [1, 1]} : vector<8x256xf32> to vector<8x64xf32>
    %cst_70 = arith.constant 5.000000e-01 : f32
    %269 = vector.broadcast %cst_70 : f32 to vector<8x64xf32>
    %270 = arith.mulf %269, %268 : vector<8x64xf32>
    %cst_71 = arith.constant 5.000000e-01 : f32
    %271 = vector.broadcast %cst_71 : f32 to vector<8x64xf32>
    %272 = arith.addf %270, %271 : vector<8x64xf32>
    %273 = arith.mulf %266, %253 : vector<8x64xf32>
    %274 = arith.mulf %261, %267 : vector<8x64xf32>
    %275 = arith.addf %273, %274 : vector<8x64xf32>
    %276 = math.tanh %275 : vector<8x64xf32>
    %277 = arith.mulf %272, %276 : vector<8x64xf32>
    %278 = arith.select %86, %277, %252 : vector<8x64xi1>, vector<8x64xf32>
    %279 = arith.select %86, %275, %253 : vector<8x64xi1>, vector<8x64xf32>
    %cst_72 = arith.constant dense<0.000000e+00> : vector<8x256xf32>
    %280 = tpu.matmul %278, %95, %cst_72 {dimension_numbers = #tpu.dot_dimension_numbers<[1], [0], [0], [1], [0, 0, 1, 1], [], []>, precision = #tpu.contract_precision<fp32>} : vector<8x64xf32>, vector<64x256xf32>, vector<8x256xf32> -> vector<8x256xf32>
    %281 = arith.addf %89, %280 : vector<8x256xf32>
    %282 = math.tanh %281 : vector<8x256xf32>
    %283 = vector.extract_strided_slice %282 {offsets = [0, 0], sizes = [8, 64], strides = [1, 1]} : vector<8x256xf32> to vector<8x64xf32>
    %cst_73 = arith.constant 5.000000e-01 : f32
    %284 = vector.broadcast %cst_73 : f32 to vector<8x64xf32>
    %285 = arith.mulf %284, %283 : vector<8x64xf32>
    %cst_74 = arith.constant 5.000000e-01 : f32
    %286 = vector.broadcast %cst_74 : f32 to vector<8x64xf32>
    %287 = arith.addf %285, %286 : vector<8x64xf32>
    %288 = vector.extract_strided_slice %282 {offsets = [0, 64], sizes = [8, 64], strides = [1, 1]} : vector<8x256xf32> to vector<8x64xf32>
    %cst_75 = arith.constant 5.000000e-01 : f32
    %289 = vector.broadcast %cst_75 : f32 to vector<8x64xf32>
    %290 = arith.mulf %289, %288 : vector<8x64xf32>
    %cst_76 = arith.constant 5.000000e-01 : f32
    %291 = vector.broadcast %cst_76 : f32 to vector<8x64xf32>
    %292 = arith.addf %290, %291 : vector<8x64xf32>
    %293 = vector.extract_strided_slice %282 {offsets = [0, 128], sizes = [8, 64], strides = [1, 1]} : vector<8x256xf32> to vector<8x64xf32>
    %294 = vector.extract_strided_slice %282 {offsets = [0, 192], sizes = [8, 64], strides = [1, 1]} : vector<8x256xf32> to vector<8x64xf32>
    %cst_77 = arith.constant 5.000000e-01 : f32
    %295 = vector.broadcast %cst_77 : f32 to vector<8x64xf32>
    %296 = arith.mulf %295, %294 : vector<8x64xf32>
    %cst_78 = arith.constant 5.000000e-01 : f32
    %297 = vector.broadcast %cst_78 : f32 to vector<8x64xf32>
    %298 = arith.addf %296, %297 : vector<8x64xf32>
    %299 = arith.mulf %292, %279 : vector<8x64xf32>
    %300 = arith.mulf %287, %293 : vector<8x64xf32>
    %301 = arith.addf %299, %300 : vector<8x64xf32>
    %302 = math.tanh %301 : vector<8x64xf32>
    %303 = arith.mulf %298, %302 : vector<8x64xf32>
    %304 = arith.select %94, %303, %278 : vector<8x64xi1>, vector<8x64xf32>
    %cst_79 = arith.constant dense<0.000000e+00> : vector<8xf32>
    %305 = vector.multi_reduction <add>, %304, %cst_79 [1] : vector<8x64xf32> to vector<8xf32>
    %306 = vector.shape_cast %305 : vector<8xf32> to vector<8x1xf32>
    %cst_80 = arith.constant 6.400000e+01 : f32
    %307 = vector.broadcast %cst_80 : f32 to vector<8x1xf32>
    %308 = arith.divf %306, %307 : vector<8x1xf32>
    %309 = vector.broadcast %308 : vector<8x1xf32> to vector<8x64xf32>
    %310 = arith.subf %304, %309 : vector<8x64xf32>
    %311 = arith.mulf %310, %310 : vector<8x64xf32>
    %cst_81 = arith.constant dense<0.000000e+00> : vector<8xf32>
    %312 = vector.multi_reduction <add>, %311, %cst_81 [1] : vector<8x64xf32> to vector<8xf32>
    %313 = vector.shape_cast %312 : vector<8xf32> to vector<8x1xf32>
    %cst_82 = arith.constant 6.400000e+01 : f32
    %314 = vector.broadcast %cst_82 : f32 to vector<8x1xf32>
    %315 = arith.divf %313, %314 : vector<8x1xf32>
    %316 = vector.broadcast %308 : vector<8x1xf32> to vector<8x64xf32>
    %317 = arith.subf %304, %316 : vector<8x64xf32>
    %cst_83 = arith.constant 9.99999974E-6 : f32
    %318 = vector.broadcast %cst_83 : f32 to vector<8x1xf32>
    %319 = arith.addf %315, %318 : vector<8x1xf32>
    %320 = math.rsqrt %319 : vector<8x1xf32>
    %321 = vector.broadcast %320 : vector<8x1xf32> to vector<8x64xf32>
    %322 = arith.mulf %317, %321 : vector<8x64xf32>
    %c0_84 = arith.constant 0 : index
    %c0_85 = arith.constant 0 : index
    %323 = vector.load %arg4[%c0_84, %c0_85] : memref<64x3xf32, #tpu.memory_space<vmem>>, vector<64x3xf32>
    %cst_86 = arith.constant dense<0.000000e+00> : vector<8x3xf32>
    %324 = tpu.matmul %322, %323, %cst_86 {dimension_numbers = #tpu.dot_dimension_numbers<[1], [0], [0], [1], [0, 0, 1, 1], [], []>, precision = #tpu.contract_precision<fp32>} : vector<8x64xf32>, vector<64x3xf32>, vector<8x3xf32> -> vector<8x3xf32>
    %c0_87 = arith.constant 0 : index
    %c0_88 = arith.constant 0 : index
    %325 = vector.load %arg5[%c0_87, %c0_88] : memref<1x3xf32, #tpu.memory_space<vmem>>, vector<1x3xf32>
    %326 = vector.broadcast %325 : vector<1x3xf32> to vector<8x3xf32>
    %327 = arith.addf %324, %326 : vector<8x3xf32>
    %c0_89 = arith.constant 0 : index
    %c0_90 = arith.constant 0 : index
    %328 = vector.load %arg6[%c0_89, %c0_90] : memref<8x3xf32, #tpu.memory_space<vmem>>, vector<8x3xf32>
    tpu.vector_store %arg6[%c0_89, %c0_90], %327 {strides = array<i32>} : memref<8x3xf32, #tpu.memory_space<vmem>>, vector<8x3xf32>,
    return
  }
}

</mosaic_0001>

<bundles_post_ra>
// kernel: model_forward.1
= control target key start
LH: loop header
LB: loop body
LE: loop exit
PB: predicated region body
PF: predicated region fallthrough
CT: control target
= control target key end

     0   :  { %11 = vsyncpa [#allocation3], 0  ;;  %s8628_s21 = smov [#allocation2]   ;;  %s10396_s0 = inlined_call_operand.vmem [shape: s32[8,1], index: 0, kind: input, shape index: {}]   ;;  %s10397_s1 = inlined_call_operand.vmem [shape: s32[64,1], index: 1, kind: input, shape index: {}]   ;;  %s10398_s2 = inlined_call_operand.vmem [shape: f32[64,256], index: 2, kind: input, shape index: {}]   ;;  %s10399_s3 = inlined_call_operand.hbm [shape: f32[64,256], index: 3, kind: input, shape index: {}]   ;;  %s10400_s4 = inlined_call_operand.vmem [shape: f32[64,3], index: 4, kind: input, shape index: {}]   ;;  %s10401_s5 = inlined_call_operand.vmem [shape: f32[1,3], index: 5, kind: input, shape index: {}]   ;;  %s10402_s6 = inlined_call_operand.vmem [shape: f32[8,3], index: 6, kind: output, shape index: {}]  }
   0x1   :  { %s23_s22 = sshll.u32 %s8628_s21, 4  ;;  %s8604_s25 = scalar_lea.hbm %s10399_s3, 2048  ;;  %s24_s22 = int_to_ptr.vmem [resolvable:$true] %s23_s22 }
   0x2   :  { %p8605_p0 = scmp.ne.s32.totalorder %s10399_s3, %s8604_s25  ;;  %p8608_p1 = scmp.lt.u32.totalorder %s8604_s25, %s10399_s3 }
   0x4   :  { %p8610_p2 = pnand %p8608_p1, %p8605_p0 }
   0x6   :  { %8613 = shalt.err (!%p8610_p2)
}
   0x7   :  { %s8614_s30 = scalar_lea.vmem %s24_s22, 2048  ;;  %p8619_p4 = scmp.lt.s32.totalorder %s24_s22, %s24_s22 }
   0x8   :  { %p8615_p3 = scmp.ne.s32.totalorder %s24_s22, %s8614_s30  ;;  %p8620_p5 = scmp.lt.s32.totalorder %s8614_s30, %s8614_s30 }
   0xa   :  { %p8621_p6 = por %p8620_p5, %p8619_p4 }
   0xc   :  { %p8622_p7 = pnand %p8621_p6, %p8615_p3 }
   0xe   :  { %8625 = shalt.err (!%p8622_p7)
}
   0xf   :  { %s8629_s7 = smov 256   ;;  %s8630_s8 = smov 16  }
  0x10   :  { %29 = dma.hbm_to_vmem [thread:$0]  %s10399_s3, 2048, %s24_s22, [#allocation3], %s8629_s7, %s8629_s7, %s8630_s8  }
  0x11   :  { %8626 = dma.done.wait [#allocation3], 2048  }
  0x12   :  { %8627 = vsyncadd [#allocation3], 4294965248  ;;  %v45_v0 = vlaneseq  ;;  %v8631_v1 = vmov 0   ;;  %v10403_v3 = vmov 0.0   ;;  %v39_v5 = vld [vmem:[%s10397_s1 + $0x10] sm:$0xff]  ;;  %v37_v6 = vld [vmem:[%s10397_s1] sm:$0xff] }
  0x13   :  { %8553 = vset.pattern.permute.xlu1 %v8631_v1  ;;  %8552 = vset.pattern.permute.xlu0 %v8631_v1  ;;  %v40_v7 = vld [vmem:[%s10397_s1 + $0x18] sm:$0xff]  ;;  %v38_v8 = vld [vmem:[%s10397_s1 + $0x8] sm:$0xff]  ;;  %v8724_v11 = vld [vmem:[%s10398_s2] sm:$0xff]  ;;  %vm111_vm1 = vcmask 523264  }
  0x14   :  { %v8690_v2 = vand.u32 127, %v45_v0  ;;  %449 = vmatprep.mubr.f32.mxu0 %v10403_v3  ;;  %216 = vmatprep.mubr.f32.mxu1 %v10403_v3  ;;  %v8714_v9 = vld [vmem:[%s10398_s2 + $0x8] sm:$0xff]  ;;  %v8719_v10 = vld [vmem:[%s10398_s2 + $0x18] sm:$0xff]  ;;  %v8731_v14 = vld [vmem:[%s10398_s2 + $0x10] sm:$0xff]  ;;  %v138_v15 = vand.u32 4294901760, %v8724_v11 }
  0x15   :  { %54 = vperm.xlu1 %8553, %v39_v5   ;;  %48 = vperm.xlu0 %8552, %v37_v6   ;;  %v136_v12 = vand.u32 4294901760, %v8714_v9  ;;  %v140_v13 = vand.u32 4294901760, %v8719_v10  ;;  %v8737_v16 = vld [vmem:[%s10398_s2 + $0x28] sm:$0xff]  ;;  %v8742_v17 = vld [vmem:[%s10398_s2 + $0x38] sm:$0xff]  ;;  %v142_v18 = vand.u32 4294901760, %v8731_v14  ;;  %v8750_v21 = vld [vmem:[%s10398_s2 + $0x20] sm:$0xff] }
  0x16   :  { %10450 = vst [vmem:[#allocation5_spill] sm:$0xff] %v8690_v2  ;;  %vm1153_vm0 = vcmp.lt.s32.totalorder %v8690_v2, 32  ;;  %v144_v19 = vand.u32 4294901760, %v8737_v16  ;;  %v148_v20 = vand.u32 4294901760, %v8742_v17  ;;  %v8755_v22 = vld [vmem:[%s10398_s2 + $0x30] sm:$0xff]  ;;  %v42_v23 = vld [vmem:[%s10397_s1 + $0x28] sm:$0xff]  ;;  %v8776_v27 = vsub.f32 %v8724_v11, %v138_v15 }
  0x17   :  { %v8697_v4 = vsel %vm1153_vm0, 7, %v8631_v1  ;;  %v41_v24 = vld [vmem:[%s10397_s1 + $0x20] sm:$0xff]  ;;  %v8766_v25 = vsub.f32 %v8714_v9, %v136_v12  ;;  %v8771_v26 = vsub.f32 %v8719_v10, %v140_v13  ;;  %v146_v28 = vand.u32 4294901760, %v8750_v21  ;;  %v44_v41 = vld [vmem:[%s10397_s1 + $0x38] sm:$0xff]  ;;  %v43_v42 = vld [vmem:[%s10397_s1 + $0x30] sm:$0xff] }
  0x18   :  { %10451 = vst [vmem:[#allocation6_spill] sm:$0xff] %v8697_v4  ;;  %v8782_v29 = vsub.f32 %v8731_v14, %v142_v18  ;;  %v8787_v30 = vsub.f32 %v8737_v16, %v144_v19  ;;  %v8792_v31 = vsub.f32 %v8742_v17, %v148_v20  ;;  %v150_v32 = vand.u32 4294901760, %v8755_v22  ;;  %v8840_v51 = vld [vmem:[%s10398_s2 + $0x48] sm:$0xff]  ;;  %v8845_v52 = vld [vmem:[%s10398_s2 + $0x58] sm:$0xff]  ;;  %v8853_v57 = vld [vmem:[%s10398_s2 + $0x40] sm:$0xff] }
  0x19   :  { %57 = vperm.xlu1 %8553, %v40_v7   ;;  %51 = vperm.xlu0 %8552, %v38_v8   ;;  %v307_v33 = vand.u32 4294901760, %v8766_v25  ;;  %v319_v34 = vand.u32 4294901760, %v8771_v26  ;;  %v313_v35 = vand.u32 4294901760, %v8776_v27  ;;  %v8801_v36 = vsub.f32 %v8750_v21, %v146_v28  ;;  %v8861_v62 = vld [vmem:[%s10398_s2 + $0x50] sm:$0xff]  ;;  %v1154_v63 = vld [vmem:[%s10396_s0] sm:$0xff]  ;;  %v8873_v7 = vld [vmem:[%s10398_s2 + $0x68] sm:$0xff] }
  0x1a   :  { %v325_v37 = vand.u32 4294901760, %v8782_v29  ;;  %v331_v38 = vand.u32 4294901760, %v8787_v30  ;;  %v10410_v39 = vand.u32 4294901760, %v8792_v31  ;;  %v8809_v40 = vsub.f32 %v8755_v22, %v150_v32 }
  0x1b   :  { %v308_v43 = vsub.f32 %v8766_v25, %v307_v33  ;;  %v320_v44 = vsub.f32 %v8771_v26, %v319_v34  ;;  %v314_v45 = vsub.f32 %v8776_v27, %v313_v35  ;;  %v10409_v46 = vand.u32 4294901760, %v8801_v36 }
  0x1c   :  { %v326_v47 = vsub.f32 %v8782_v29, %v325_v37  ;;  %v332_v48 = vsub.f32 %v8787_v30, %v331_v38  ;;  %v344_v49 = vsub.f32 %v8792_v31, %v10410_v39  ;;  %v10407_v50 = vand.u32 4294901760, %v8809_v40 }
  0x1d   :  { %63 = vperm.xlu1 %8553, %v42_v23   ;;  %60 = vperm.xlu0 %8552, %v41_v24   ;;  %v309_v53 = vand.u32 4294901760, %v308_v43  ;;  %v321_v54 = vand.u32 4294901760, %v320_v44  ;;  %v315_v55 = vand.u32 4294901760, %v314_v45  ;;  %v338_v56 = vsub.f32 %v8801_v36, %v10409_v46 }
  0x1e   :  { %v327_v58 = vand.u32 4294901760, %v326_v47  ;;  %v333_v59 = vand.u32 4294901760, %v332_v48  ;;  %v345_v60 = vand.u32 4294901760, %v344_v49  ;;  %v350_v61 = vsub.f32 %v8809_v40, %v10407_v50  ;;  %v8906_v48 = vld [vmem:[%s10398_s2 + $0x60] sm:$0xff]  ;;  %v8911_v49 = vld [vmem:[%s10398_s2 + $0x70] sm:$0xff] }
  0x1f   :  { %v8866_v0 = vpack.c.bf16 %v321_v54, %v309_v53  ;;  %v339_v1 = vand.u32 4294901760, %v338_v56  ;;  %v152_v5 = vand.u32 4294901760, %v8840_v51  ;;  %v156_v6 = vand.u32 4294901760, %v8845_v52 }
  0x20   :  { %v8875_v8 = vpack.c.bf16 %v327_v58, %v315_v55  ;;  %v8877_v23 = vpack.c.bf16 %v345_v60, %v333_v59  ;;  %v351_v24 = vand.u32 4294901760, %v350_v61  ;;  %v158_v45 = vand.u32 4294901760, %v8861_v62 }
  0x21   :  { %69 = vperm.xlu1 %8553, %v44_v41   ;;  %66 = vperm.xlu0 %8552, %v43_v42   ;;  %v154_v41 = vand.u32 4294901760, %v8853_v57  ;;  %v8883_v42 = vld [vmem:[%s10398_s2 + $0x78] sm:$0xff]  ;;  %v8889_v43 = vsub.f32 %v8840_v51, %v152_v5  ;;  %v8894_v44 = vsub.f32 %v8845_v52, %v156_v6  ;;  %v8901_v47 = vpack.c.bf16 %v140_v13, %v136_v12  ;;  %s8633_s2 = smov 64  }
  0x22   :  { %7439 = vmatprep.subr.bf16.mxu0 %v8866_v0  ;;  %v8914_v53 = vpack.c.bf16 %v351_v24, %v339_v1  ;;  %v8923_v10 = vpack.c.bf16 %v142_v18, %v138_v15  ;;  %v160_v12 = vand.u32 4294901760, %v8873_v7  ;;  %v8930_v55 = vsub.f32 %v8861_v62, %v158_v45 }
  0x23   :  { %7441 = vmatpush1.bf16.msra.mxu0 %v8875_v8  ;;  %v8917_v9 = vsub.f32 %v8853_v57, %v154_v41  ;;  %v10406_v13 = vand.u32 4294901760, %v8889_v43  ;;  %v10405_v54 = vand.u32 4294901760, %v8894_v44  ;;  %7423 = vmatprep.subr.bf16.mxu1 %v8901_v47  ;;  %v164_v56 = vand.u32 4294901760, %v8883_v42 }
  0x24   :  { %7443 = vmatprep.subr.bf16.mxu0 %v8877_v23  ;;  %7425 = vmatpush1.bf16.msra.mxu1 %v8923_v10  ;;  %v8937_v14 = vsub.f32 %v8873_v7, %v160_v12  ;;  %v162_v15 = vand.u32 4294901760, %v8906_v48  ;;  %v166_v18 = vand.u32 4294901760, %v8911_v49  ;;  %v373_v59 = vand.u32 4294901760, %v8930_v55 }
  0x25   :  { %1159 = vperm.xlu1 %8553, %v1154_v63   ;;  %v10408_v11 = vand.u32 4294901760, %v8917_v9  ;;  %v356_v57 = vsub.f32 %v8889_v43, %v10406_v13  ;;  %v368_v58 = vsub.f32 %v8894_v44, %v10405_v54  ;;  %v8949_v60 = vsub.f32 %v8883_v42, %v164_v56 }
  0x26   :  { %v379_v62 = vand.u32 4294901760, %v8937_v14  ;;  %v8957_v63 = vsub.f32 %v8906_v48, %v162_v15  ;;  %v8960_v1 = vsub.f32 %v8911_v49, %v166_v18  ;;  %v374_v3 = vsub.f32 %v8930_v55, %v373_v59 }
  0x27   :  { %7445 = vmatpush1.bf16.msra.mxu0 %v8914_v53  ;;  %v362_v61 = vsub.f32 %v8917_v9, %v10408_v11  ;;  %v357_v7 = vand.u32 4294901760, %v356_v57  ;;  %v369_v24 = vand.u32 4294901760, %v368_v58  ;;  %v391_v42 = vand.u32 4294901760, %v8949_v60 }
  0x28   :  { %v380_v13 = vsub.f32 %v8937_v14, %v379_v62  ;;  %v385_v50 = vand.u32 4294901760, %v8957_v63  ;;  %v397_v11 = vand.u32 4294901760, %v8960_v1  ;;  %v375_v48 = vand.u32 4294901760, %v374_v3 }
  0x29   :  { %v363_v54 = vand.u32 4294901760, %v362_v61  ;;  %v8967_v46 = vpack.c.bf16 %v369_v24, %v357_v7  ;;  %v392_v39 = vsub.f32 %v8949_v60, %v391_v42  ;;  %v8974_v49 = vpack.c.bf16 %v148_v20, %v144_v19 }
  0x2a   :  { %v381_v57 = vand.u32 4294901760, %v380_v13  ;;  %v386_v58 = vsub.f32 %v8957_v63, %v385_v50  ;;  %v398_v61 = vsub.f32 %v8960_v1, %v397_v11  ;;  %v8982_v7 = vpack.c.bf16 %v150_v32, %v146_v28 }
  0x2b   :  { %7447 = vmatprep.subr.bf16.mxu0 %v8967_v46  ;;  %v8985_v3 = vpack.c.bf16 %v375_v48, %v363_v54  ;;  %v393_v16 = vand.u32 4294901760, %v392_v39  ;;  %7427 = vmatprep.subr.bf16.mxu1 %v8974_v49  ;;  %v7456_v17 = vpack.c.bf16 %v8782_v29, %v8776_v27  ;;  %v8995_v21 = vpack.c.bf16 %v156_v6, %v152_v5 }
  0x2c   :  { %v387_v19 = vand.u32 4294901760, %v386_v58  ;;  %v399_v20 = vand.u32 4294901760, %v398_v61  ;;  %7429 = vmatpush1.bf16.msra.mxu1 %v8982_v7  ;;  %v8997_v22 = vpack.c.bf16 %v158_v45, %v154_v41  ;;  %v7458_v32 = vpack.c.bf16 %v8792_v31, %v8787_v30 }
  0x2d   :  { %10452 = vst [vmem:[#allocation7_spill] sm:$0xff] %v8995_v21  ;;  %7449 = vmatpush1.bf16.msra.mxu0 %v8985_v3  ;;  %v9000_v28 = vpack.c.bf16 %v393_v16, %v381_v57  ;;  %v7460_v39 = vpack.c.bf16 %v8809_v40, %v8801_v36  ;;  %v9006_v13 = vpack.c.bf16 %v164_v56, %v160_v12  ;;  %v10456_v56 = vand.u32 4294901760, %v8792_v31 }
  0x2e   :  { %10453 = vst [vmem:[#allocation8_spill] sm:$0xff] %v8997_v22  ;;  %v9008_v54 = vpack.c.bf16 %v399_v20, %v387_v19  ;;  %v7454_v51 = vpack.c.bf16 %v8771_v26, %v8766_v25  ;;  %7431 = vmatprep.subr.bf16.mxu1 %v8995_v21  ;;  %v7462_v52 = vpack.c.bf16 %v8894_v44, %v8889_v43  ;;  %v10458_v25 = vand.u32 4294901760, %v8809_v40 }
  0x2f   :  { %10454 = vst [vmem:[#allocation9_spill] sm:$0xff] %v9006_v13  ;;  %v7464_v5 = vpack.c.bf16 %v8930_v55, %v8917_v9  ;;  %7451 = vmatprep.subr.bf16.mxu0 %v9000_v28  ;;  %v7466_v6 = vpack.c.bf16 %v8949_v60, %v8937_v14  ;;  %v7468_v41 = vpack.c.bf16 %v8960_v1, %v8957_v63  ;;  %v10459_v26 = vand.u32 4294901760, %v8889_v43  ;;  %v9152_v60 = vld [vmem:[#allocation2 + $0x18] sm:$0xff] }
  0x30   :  { %7433 = vmatpush1.bf16.msra.mxu1 %v8997_v22  ;;  %v9023_v45 = vpack.c.bf16 %v166_v18, %v162_v15  ;;  %v9033_v12 = vpack.c.bf16 %v319_v34, %v307_v33  ;;  %v9039_v55 = vpack.c.bf16 %v325_v37, %v313_v35  ;;  %v9045_v15 = vpack.c.bf16 %v10456_v56, %v331_v38 }
  0x31   :  { %7453 = vmatpush1.bf16.msra.mxu0 %v9008_v54  ;;  %7435 = vmatprep.subr.bf16.mxu1 %v9006_v13  ;;  %v10460_v27 = vand.u32 4294901760, %v8894_v44  ;;  %v10461_v29 = vand.u32 4294901760, %v8917_v9  ;;  %v9063_v30 = vpack.c.bf16 %v391_v42, %v379_v62  ;;  %v9065_v31 = vpack.c.bf16 %v397_v11, %v385_v50 }
  0x32   :  { %10455 = vst [vmem:[#allocation10_spill] sm:$0xff] %v9023_v45  ;;  %7455 = vmatprep.subr.bf16.mxu0 %v7454_v51  ;;  %v10462_v37 = vmov 0.0  }
  0x33   :  { %v9057_v33 = vpack.c.bf16 %v10460_v27, %v10459_v26  ;;  %v9061_v34 = vpack.c.bf16 %v373_v59, %v10461_v29 }
  0x34   :  { %7437 = vmatpush1.bf16.msra.mxu1 %v9023_v45 }
  0x35   :  { %8358 = vmatprep.subr.bf16.mxu1 %v8866_v0  ;;  %v10457_v0 = vand.u32 4294901760, %v8801_v36 }
  0x37   :  { %v9051_v18 = vpack.c.bf16 %v10458_v25, %v10457_v0 }
  0x94   :  { %v55_v35 = vpop.permute.xlu1 %54  ;;  %v49_v36 = vpop.permute.xlu0 %48 }
  0x95   :  { %vm73_vm2 = vcmp.eq.s32.totalorder %v8690_v2, %v55_v35  ;;  %vm71_vm3 = vcmp.eq.s32.totalorder %v8690_v2, %v49_v36 }
  0x96   :  { %v9070_v38 = vsel %vm73_vm2, 1.0, %v10462_v37  ;;  %v9073_v40 = vsel %vm71_vm3, 1.0, %v10462_v37 }
  0x97   :  { %10463 = vst [vmem:[#allocation11_spill] sm:$0xff] %v9070_v38  ;;  %v119_v43 = vsel %vm111_vm1, %v9070_v38, 0  ;;  %v113_v50 = vsel %vm111_vm1, %v9073_v40, 0  ;;  %7229 = vmatmul.mubr.msk.f32.vlgmr.msra.gmra.mrb[0].mxu0 %vm111_vm1, %v9073_v40 }
  0x98   :  { %v9081_v44 = vsub.f32 %v113_v50, %v113_v50  ;;  %7457 = vmatpush1.bf16.msra.mxu0 %v7456_v17  ;;  %v58_v9 = vpop.permute.xlu1 %57  ;;  %v52_v11 = vpop.permute.xlu0 %51  ;;  %456 = vmatprep.mubr.f32.mxu0 %v10462_v37  ;;  %v9084_v59 = vsub.f32 %v119_v43, %v119_v43  ;;  %v1213_v50 = vand.u32 4294901760, %v9152_v60 }
  0x99   :  { %vm74_vm4 = vcmp.eq.s32.totalorder %v8690_v2, %v58_v9  ;;  %vm72_vm5 = vcmp.eq.s32.totalorder %v8690_v2, %v52_v11  ;;  %7459 = vmatprep.subr.bf16.mxu0 %v7458_v32 }
  0x9a   :  { %v9089_v62 = vsel %vm74_vm4, 1.0, %v10462_v37  ;;  %v9092_v24 = vsel %vm72_vm5, 1.0, %v10462_v37  ;;  %v10418_v42 = vand.u32 4294901760, %v9081_v44  ;;  %v10416_v19 = vand.u32 4294901760, %v9084_v59 }
  0x9b   :  { %10464 = vst [vmem:[#allocation12_spill] sm:$0xff] %v9089_v62  ;;  %v122_v48 = vsel %vm111_vm1, %v9089_v62, 0  ;;  %v116_v57 = vsel %vm111_vm1, %v9092_v24, 0  ;;  %7230 = vmatmul.mubr.msk.f32.gmra.mrb[2].mxu0 %vm111_vm1, %v9092_v24  ;;  %vm8642_vm5 = vmmov 0  }
  0x9c   :  { %v9101_v58 = vsub.f32 %v116_v57, %v116_v57  ;;  %7461 = vmatpush1.bf16.msra.mxu0 %v7460_v39  ;;  %v64_v61 = vpop.permute.xlu1 %63  ;;  %v61_v16 = vpop.permute.xlu0 %60  ;;  %463 = vmatprep.mubr.f32.mxu0 %v10462_v37  ;;  %v220_v17 = vsub.f32 %v9081_v44, %v10418_v42  ;;  %v9110_v20 = vsub.f32 %v122_v48, %v122_v48 }
  0x9d   :  { %vm76_vm6 = vcmp.eq.s32.totalorder %v8690_v2, %v64_v61  ;;  %vm75_vm7 = vcmp.eq.s32.totalorder %v8690_v2, %v61_v16  ;;  %7463 = vmatprep.subr.bf16.mxu0 %v7462_v52  ;;  %v242_v29 = vsub.f32 %v9084_v59, %v10416_v19 }
  0x9e   :  { %v9113_v32 = vsel %vm75_vm7, 1.0, %v10462_v37  ;;  %v221_v39 = vand.u32 4294901760, %v220_v17  ;;  %v10417_v51 = vand.u32 4294901760, %v9101_v58  ;;  %v9121_v0 = vsel %vm76_vm6, 1.0, %v10462_v37 }
  0x9f   :  { %10465 = vst [vmem:[#allocation13_spill] sm:$0xff] %v9113_v32  ;;  %v125_v56 = vsel %vm111_vm1, %v9113_v32, 0  ;;  %7231 = vmatmul.mubr.msk.f32.gmra.mrb[4].mxu0 %vm111_vm1, %v9070_v38  ;;  %10466 = vst [vmem:[#allocation14_spill] sm:$0xff] %v9121_v0  ;;  %v10415_v35 = vand.u32 4294901760, %v9110_v20  ;;  %v128_v36 = vsel %vm111_vm1, %v9121_v0, 0 }
  0xa0   :  { %7465 = vmatpush1.bf16.msra.mxu0 %v7464_v5  ;;  %222 = vmatmul.mubr.f32.vlgmr.msra.gmra.mrb[0].mxu1 %v221_v39  ;;  %v67_v52 = vpop.permute.xlu0 %66  ;;  %v231_v25 = vsub.f32 %v9101_v58, %v10417_v51  ;;  %v9131_v26 = vsub.f32 %v125_v56, %v125_v56  ;;  %v70_v27 = vpop.permute.xlu1 %69 }
  0xa1   :  { %vm77_vm8 = vcmp.eq.s32.totalorder %v8690_v2, %v67_v52  ;;  %470 = vmatprep.mubr.f32.mxu0 %v10462_v37  ;;  %7467 = vmatprep.subr.bf16.mxu0 %v7466_v6  ;;  %vm78_vm9 = vcmp.eq.s32.totalorder %v8690_v2, %v70_v27  ;;  %v9157_v6 = vsub.f32 %v128_v36, %v128_v36  ;;  %v1197_v36 = vld [vmem:[#allocation2 + $0x38] sm:$0xff] }
  0xa2   :  { %227 = vmatprep.mubr.f32.mxu1 %v10462_v37  ;;  %v232_v5 = vand.u32 4294901760, %v231_v25  ;;  %8362 = vmatpush1.bf16.msra.mxu1 %v8875_v8  ;;  %v9145_v14 = vsel %vm77_vm8, 1.0, %v10462_v37  ;;  %v9150_v8 = vld [vmem:[#allocation2 + $0x8] sm:$0xff]  ;;  %v253_v63 = vsub.f32 %v9110_v20, %v10415_v35  ;;  %v10414_v1 = vand.u32 4294901760, %v9131_v26  ;;  %v1192_v25 = vld [vmem:[#allocation2 + $0x10] sm:$0xff] }
  0xa3   :  { %7232 = vmatmul.mubr.msk.f32.gmra.mrb[6].mxu0 %vm111_vm1, %v9089_v62  ;;  %8359 = vmatprep.subr.bf16.mxu1 %v8877_v23  ;;  %v243_v23 = vand.u32 4294901760, %v242_v29  ;;  %v1209_v43 = vand.u32 4294901760, %v9150_v8  ;;  %v9172_v9 = vsel %vm78_vm9, 1.0, %v10462_v37  ;;  %v10413_v48 = vand.u32 4294901760, %v9157_v6  ;;  %v1195_v29 = vld [vmem:[#allocation2 + $0x28] sm:$0xff] }
  0xa4   :  { %7469 = vmatpush1.bf16.msra.mxu0 %v7468_v41  ;;  %233 = vmatmul.mubr.f32.gmra.mrb[2].mxu1 %v232_v5  ;;  %v131_v41 = vsel %vm111_vm1, %v9145_v14, 0  ;;  %v254_v11 = vand.u32 4294901760, %v253_v63  ;;  %v134_v57 = vsel %vm111_vm1, %v9172_v9, 0  ;;  %v1196_v63 = vld [vmem:[#allocation2 + $0x30] sm:$0xff] }
  0xa5   :  { %602 = vmatprep.mubr.f32.mxu0 %v10462_v37  ;;  %7471 = vmatprep.subr.bf16.mxu0 %v8901_v47  ;;  %v9189_v61 = vpack.c.bf16 %v1213_v50, %v1209_v43  ;;  %v9194_v16 = vsub.f32 %v134_v57, %v134_v57  ;;  %v1215_v57 = vand.u32 4294901760, %v1192_v25 }
  0xa6   :  { %238 = vmatprep.mubr.f32.mxu1 %v10462_v37  ;;  %8363 = vmatpush1.bf16.msra.mxu1 %v8914_v53  ;;  %v9177_v53 = vsub.f32 %v131_v41, %v131_v41  ;;  %v9222_v41 = vsub.f32 %v9150_v8, %v1209_v43  ;;  %v1200_v8 = vld [vmem:[#allocation2 + $0x50] sm:$0xff] }
  0xa7   :  { %605 = vmatmul.mubr.f32.vlgmr.msra.gmra.mrb[0].mxu0 %v9081_v44  ;;  %8360 = vmatprep.subr.bf16.mxu1 %v8967_v46  ;;  %v264_v46 = vsub.f32 %v9131_v26, %v10414_v1  ;;  %10467 = vst [vmem:[#allocation15_spill] sm:$0xff] %v9189_v61  ;;  %v10411_v52 = vand.u32 4294901760, %v9194_v16 }
  0xa8   :  { %7473 = vmatpush1.bf16.msra.mxu0 %v8923_v10  ;;  %244 = vmatmul.mubr.f32.gmra.mrb[4].mxu1 %v243_v23  ;;  %v1194_v23 = vld [vmem:[#allocation2 + $0x20] sm:$0xff] }
  0xa9   :  { %610 = vmatprep.mubr.f32.mxu0 %v10462_v37  ;;  %249 = vmatprep.mubr.f32.mxu1 %v10462_v37  ;;  %v265_v17 = vand.u32 4294901760, %v264_v46  ;;  %v297_v5 = vsub.f32 %v9194_v16, %v10411_v52  ;;  %v1223_v52 = vand.u32 4294901760, %v1196_v63 }
  0xaa   :  { %7475 = vmatprep.subr.bf16.mxu0 %v8974_v49  ;;  %8364 = vmatpush1.bf16.msra.mxu1 %v8985_v3  ;;  %v275_v3 = vsub.f32 %v9157_v6, %v10413_v48  ;;  %v1198_v48 = vld [vmem:[#allocation2 + $0x40] sm:$0xff] }
  0xab   :  { %613 = vmatmul.mubr.f32.gmra.mrb[2].mxu0 %v9101_v58  ;;  %8361 = vmatprep.subr.bf16.mxu1 %v9000_v28  ;;  %v10412_v28 = vand.u32 4294901760, %v9177_v53  ;;  %v1227_v42 = vand.u32 4294901760, %v1198_v48 }
  0xac   :  { %255 = vmatmul.mubr.f32.gmra.mrb[6].mxu1 %v254_v11  ;;  %618 = vmatprep.mubr.f32.mxu0 %v10462_v37  ;;  %v276_v39 = vand.u32 4294901760, %v275_v3  ;;  %v9225_v11 = vsub.f32 %v9152_v60, %v1213_v50  ;;  %v1221_v3 = vand.u32 4294901760, %v1197_v36  ;;  %v1231_v60 = vand.u32 4294901760, %v1200_v8 }
  0xad   :  { %260 = vmatprep.mubr.f32.mxu1 %v10462_v37  ;;  %7477 = vmatpush1.bf16.msra.mxu0 %v8982_v7  ;;  %v286_v56 = vsub.f32 %v9177_v53, %v10412_v28  ;;  %v1201_v28 = vld [vmem:[#allocation2 + $0x58] sm:$0xff] }
  0xae   :  { %7479 = vmatprep.subr.bf16.mxu0 %v8995_v21  ;;  %8365 = vmatpush1.bf16.msra.mxu1 %v9008_v54  ;;  %v1190_v54 = vld [vmem:[#allocation2] sm:$0xff]  ;;  %v9241_v35 = vsub.f32 %v1197_v36, %v1221_v3  ;;  %v1229_v51 = vand.u32 4294901760, %v1201_v28  ;;  %v10472_v4 = vand.u32 4294901760, %v9225_v11 }
  0xaf   :  { %621 = vmatmul.mubr.f32.gmra.mrb[4].mxu0 %v9084_v59  ;;  %7519 = vmatprep.subr.bf16.mxu1 %v9189_v61  ;;  %v287_v27 = vand.u32 4294901760, %v286_v56  ;;  %v1211_v46 = vand.u32 4294901760, %v1190_v54  ;;  %v1219_v56 = vand.u32 4294901760, %v1194_v23 }
  0xb0   :  { %266 = vmatmul.mubr.f32.gmra.mrb[8].mxu1 %v265_v17  ;;  %626 = vmatprep.mubr.f32.mxu0 %v10462_v37  ;;  %v1217_v17 = vand.u32 4294901760, %v1195_v29  ;;  %v1316_v2 = vsub.f32 %v9225_v11, %v10472_v4 }
  0xb1   :  { %271 = vmatprep.mubr.f32.mxu1 %v10462_v37  ;;  %7481 = vmatpush1.bf16.msra.mxu0 %v8997_v22  ;;  %v9232_v50 = vsub.f32 %v1190_v54, %v1211_v46  ;;  %v9237_v1 = vpack.c.bf16 %v1215_v57, %v1211_v46  ;;  %v9246_v54 = vpack.c.bf16 %v1223_v52, %v1219_v56  ;;  %v1202_v46 = vld [vmem:[#allocation2 + $0x60] sm:$0xff] }
  0xb2   :  { %7483 = vmatprep.subr.bf16.mxu0 %v9006_v13  ;;  %v9244_v43 = vpack.c.bf16 %v1221_v3, %v1217_v17  ;;  %v9262_v13 = vsub.f32 %v1194_v23, %v1219_v56  ;;  %v1235_v22 = vand.u32 4294901760, %v1202_v46  ;;  %v9275_v23 = vsub.f32 %v1201_v28, %v1229_v51 }
  0xb3   :  { %629 = vmatmul.mubr.f32.gmra.mrb[6].mxu0 %v9110_v20  ;;  %10468 = vst [vmem:[#allocation16_spill] sm:$0xff] %v9237_v1  ;;  %10470 = vst [vmem:[#allocation18_spill] sm:$0xff] %v9246_v54  ;;  %v10473_v56 = vand.u32 4294901760, %v9232_v50  ;;  %v10476_v28 = vand.u32 4294901760, %v9241_v35 }
  0xb4   :  { %277 = vmatmul.mubr.f32.gmra.mrb[10].mxu1 %v276_v39  ;;  %634 = vmatprep.mubr.f32.mxu0 %v10462_v37  ;;  %v298_v39 = vand.u32 4294901760, %v297_v5  ;;  %v9239_v5 = vsub.f32 %v1195_v29, %v1217_v17  ;;  %10469 = vst [vmem:[#allocation17_spill] sm:$0xff] %v9244_v43  ;;  %v10471_v29 = vand.u32 4294901760, %v9222_v41  ;;  %v9270_v17 = vpack.c.bf16 %v1231_v60, %v1227_v42 }
  0xb5   :  { %282 = vmatprep.mubr.f32.mxu1 %v10462_v37  ;;  %7485 = vmatpush1.bf16.msra.mxu0 %v9023_v45  ;;  %v1310_v62 = vsub.f32 %v9232_v50, %v10473_v56  ;;  %v9299_v56 = vsub.f32 %v1198_v48, %v1227_v42 }
  0xb6   :  { %7487 = vmatprep.subr.bf16.mxu0 %v9033_v12  ;;  %v1199_v12 = vld [vmem:[#allocation2 + $0x48] sm:$0xff]  ;;  %v1304_v36 = vsub.f32 %v9222_v41, %v10471_v29  ;;  %v9264_v29 = vsub.f32 %v1196_v63, %v1223_v52  ;;  %v1317_v63 = vand.u32 4294901760, %v1316_v2  ;;  %v1340_v2 = vsub.f32 %v9241_v35, %v10476_v28 }
  0xb7   :  { %637 = vmatmul.mubr.f32.gmra.mrb[8].mxu0 %v9131_v26  ;;  %v1225_v19 = vand.u32 4294901760, %v1199_v12  ;;  %v1363_v28 = vand.u32 4294901760, %v9275_v23  ;;  %v1311_v42 = vand.u32 4294901760, %v1310_v62  ;;  %v1357_v62 = vand.u32 4294901760, %v9299_v56 }
  0xb8   :  { %288 = vmatmul.mubr.f32.gmra.mrb[12].mxu1 %v287_v27  ;;  %642 = vmatprep.mubr.f32.mxu0 %v10462_v37  ;;  %v9234_v27 = vsub.f32 %v1192_v25, %v1215_v57  ;;  %v1203_v25 = vld [vmem:[#allocation2 + $0x68] sm:$0xff]  ;;  %v1204_v57 = vld [vmem:[#allocation2 + $0x70] sm:$0xff]  ;;  %v1305_v52 = vand.u32 4294901760, %v1304_v36  ;;  %v10477_v36 = vand.u32 4294901760, %v9081_v44  ;;  %v10479_v44 = vand.u32 4294901760, %v9264_v29 }
  0xb9   :  { %293 = vmatprep.mubr.f32.mxu1 %v10462_v37  ;;  %v9268_v4 = vpack.c.bf16 %v1229_v51, %v1225_v19  ;;  %v1233_v45 = vand.u32 4294901760, %v1203_v25  ;;  %v1239_v3 = vand.u32 4294901760, %v1204_v57  ;;  %v9273_v38 = vsub.f32 %v1199_v12, %v1225_v19 }
  0xba   :  { %v10475_v19 = vand.u32 4294901760, %v9239_v5  ;;  %v9314_v21 = vpack.c.bf16 %v1317_v63, %v1305_v52  ;;  %v1364_v63 = vsub.f32 %v9275_v23, %v1363_v28 }
  0xbb   :  { %645 = vmatmul.mubr.f32.gmra.mrb[10].mxu0 %v9157_v6 }
  0xbc   :  { %299 = vmatmul.mubr.f32.gmra.mrb[14].mxu1 %v298_v39  ;;  %650 = vmatprep.mubr.f32.mxu0 %v10462_v37  ;;  %v1205_v39 = vld [vmem:[#allocation2 + $0x78] sm:$0xff]  ;;  %v1328_v51 = vsub.f32 %v9239_v5, %v10475_v19  ;;  %v1351_v19 = vand.u32 4294901760, %v9273_v38 }
  0xbd   :  { %477 = vmatprep.mubr.f32.mxu1 %v10462_v37 }
  0xbe   :  { %v1352_v52 = vsub.f32 %v9273_v38, %v1351_v19 }
  0xbf   :  { %653 = vmatmul.mubr.f32.gmra.mrb[12].mxu0 %v9177_v53 }
  0xc0   :  { %7233 = vmatmul.mubr.msk.f32.vlgmr.msra.gmra.mrb[8].mxu1 %vm111_vm1, %v9113_v32  ;;  %658 = vmatprep.mubr.f32.mxu0 %v10462_v37  ;;  %v1237_v32 = vand.u32 4294901760, %v1205_v39 }
  0xc1   :  { %7521 = vmatpush1.bf16.msra.mxu1 %v9237_v1  ;;  %484 = vmatprep.mubr.f32.mxu1 %v10462_v37  ;;  %v10474_v1 = vand.u32 4294901760, %v9234_v27 }
  0xc2   :  { %7523 = vmatprep.subr.bf16.mxu1 %v9244_v43  ;;  %v9306_v43 = vsub.f32 %v1203_v25, %v1233_v45  ;;  %v9308_v12 = vsub.f32 %v1205_v39, %v1237_v32  ;;  %v1346_v25 = vsub.f32 %v9264_v29, %v10479_v44  ;;  %v9331_v39 = vsub.f32 %v1204_v57, %v1239_v3 }
  0xc3   :  { %661 = vmatmul.mubr.f32.gmra.mrb[14].mxu0 %v9194_v16  ;;  %v1322_v61 = vsub.f32 %v9234_v27, %v10474_v1  ;;  %v9297_v1 = vpack.c.bf16 %v1237_v32, %v1233_v45  ;;  %v10478_v45 = vand.u32 4294901760, %v9262_v13 }
  0xc4   :  { %7234 = vmatmul.mubr.msk.f32.gmra.mrb[10].mxu1 %vm111_vm1, %v9121_v0  ;;  %747 = vmatprep.mubr.f32.mxu0 %v10462_v37  ;;  %v9301_v0 = vsub.f32 %v1200_v8, %v1231_v60  ;;  %v1329_v8 = vand.u32 4294901760, %v1328_v51  ;;  %v1341_v60 = vand.u32 4294901760, %v1340_v2  ;;  %v1375_v51 = vand.u32 4294901760, %v9306_v43 }
  0xc5   :  { %7525 = vmatpush1.bf16.msra.mxu1 %v9246_v54  ;;  %491 = vmatprep.mubr.f32.mxu1 %v10462_v37  ;;  %v9312_v54 = vpack.c.bf16 %v1239_v3, %v1235_v22  ;;  %v1323_v48 = vand.u32 4294901760, %v1322_v61  ;;  %v1334_v32 = vsub.f32 %v9262_v13, %v10478_v45  ;;  %v9329_v61 = vsub.f32 %v1202_v46, %v1235_v22 }
  0xc6   :  { %7527 = vmatprep.subr.bf16.mxu1 %v9268_v4  ;;  %v1387_v2 = vand.u32 4294901760, %v9308_v12  ;;  %v10480_v22 = vand.u32 4294901760, %v9101_v58  ;;  %v9351_v57 = vpack.c.bf16 %v1341_v60, %v1329_v8  ;;  %v1358_v58 = vsub.f32 %v9299_v56, %v1357_v62 }
  0xc7   :  { %751 = vmatmul.mubr.f32.vlgmr.msra.gmra.mrb[0].mxu0 %v10477_v36  ;;  %v9349_v46 = vpack.c.bf16 %v1323_v48, %v1311_v42  ;;  %v1335_v3 = vand.u32 4294901760, %v1334_v32  ;;  %v1347_v36 = vand.u32 4294901760, %v1346_v25  ;;  %v1381_v45 = vand.u32 4294901760, %v9329_v61 }
  0xc8   :  { %7489 = vmatpush1.bf16.msra.mxu0 %v9039_v55  ;;  %7235 = vmatmul.mubr.msk.f32.gmra.mrb[12].mxu1 %vm111_vm1, %v9145_v14  ;;  %v1369_v55 = vand.u32 4294901760, %v9301_v0  ;;  %v1393_v42 = vand.u32 4294901760, %v9331_v39  ;;  %v1353_v48 = vand.u32 4294901760, %v1352_v52  ;;  %v1365_v8 = vand.u32 4294901760, %v1364_v63 }
  0xc9   :  { %7529 = vmatpush1.bf16.msra.mxu1 %v9270_v17  ;;  %756 = vmatprep.mubr.f32.mxu0 %v10462_v37  ;;  %v1388_v60 = vsub.f32 %v9308_v12, %v1387_v2  ;;  %v10481_v32 = vand.u32 4294901760, %v9084_v59  ;;  %v9376_v44 = vpack.c.bf16 %v1347_v36, %v1335_v3  ;;  %v1359_v25 = vand.u32 4294901760, %v1358_v58 }
  0xca   :  { %498 = vmatprep.mubr.f32.mxu1 %v10462_v37  ;;  %7531 = vmatprep.subr.bf16.mxu1 %v9297_v1  ;;  %v1382_v63 = vsub.f32 %v9329_v61, %v1381_v45  ;;  %v9387_v59 = vpack.c.bf16 %v1365_v8, %v1353_v48  ;;  %v10484_v8 = vand.u32 4294901760, %v9157_v6  ;;  %v9433_v6 = vpack.c.bf16 %v9264_v29, %v9262_v13 }
  0xcb   :  { %760 = vmatmul.mubr.f32.gmra.mrb[2].mxu0 %v10480_v22  ;;  %7491 = vmatprep.subr.bf16.mxu0 %v9045_v15  ;;  %v1370_v15 = vsub.f32 %v9301_v0, %v1369_v55  ;;  %v1389_v3 = vand.u32 4294901760, %v1388_v60  ;;  %v9439_v60 = vpack.c.bf16 %v9275_v23, %v9273_v38  ;;  %v9550_v38 = vpack.c.bf16 %v1387_v2, %v1375_v51 }
  0xcc   :  { %7236 = vmatmul.mubr.msk.f32.gmra.mrb[14].mxu1 %vm111_vm1, %v9172_v9  ;;  %765 = vmatprep.mubr.f32.mxu0 %v10462_v37  ;;  %v1383_v58 = vand.u32 4294901760, %v1382_v63  ;;  %v10489_v63 = vld [vmem:[#allocation11_spill] sm:$0xff] }
  0xcd   :  { %7533 = vmatpush1.bf16.msra.mxu1 %v9312_v54  ;;  %7493 = vmatpush1.bf16.msra.mxu0 %v9051_v18  ;;  %v1376_v18 = vsub.f32 %v9306_v43, %v1375_v51  ;;  %v1371_v52 = vand.u32 4294901760, %v1370_v15 }
  0xce   :  { %1289 = vmatprep.mubr.f32.mxu1 %v10462_v37  ;;  %7535 = vmatprep.subr.bf16.mxu1 %v9314_v21 }
  0xcf   :  { %769 = vmatmul.mubr.f32.gmra.mrb[4].mxu0 %v10481_v32  ;;  %7495 = vmatprep.subr.bf16.mxu0 %v9057_v33  ;;  %v1394_v33 = vsub.f32 %v9331_v39, %v1393_v42  ;;  %v1377_v22 = vand.u32 4294901760, %v1376_v18  ;;  %v9395_v36 = vpack.c.bf16 %v1371_v52, %v1359_v25  ;;  %v10485_v18 = vand.u32 4294901760, %v9177_v53  ;;  %v10488_v52 = vld [vmem:[#allocation15_spill] sm:$0xff] }
  0xd0   :  { %1295 = vmatmul.mubr.f32.vlgmr.msra.gmra.mrb[16].mxu1 %v10462_v37  ;;  %774 = vmatprep.mubr.f32.mxu0 %v10462_v37  ;;  %v10486_v53 = vand.u32 4294901760, %v9194_v16  ;;  %v9447_v32 = vpack.c.bf16 %v9301_v0, %v9299_v56  ;;  %v9452_v25 = vpack.c.bf16 %v9308_v12, %v9306_v43  ;;  %v9461_v16 = vpack.c.bf16 %v9331_v39, %v9329_v61 }
  0xd1   :  { %7537 = vmatpush1.bf16.msra.mxu1 %v9349_v46  ;;  %7497 = vmatpush1.bf16.msra.mxu0 %v9061_v34  ;;  %v10482_v34 = vand.u32 4294901760, %v9110_v20  ;;  %v1395_v15 = vand.u32 4294901760, %v1394_v33  ;;  %v9399_v48 = vpack.c.bf16 %v1389_v3, %v1377_v22  ;;  %v10491_v33 = vld [vmem:[#allocation8_spill] sm:$0xff]  ;;  %v10492_v22 = vld [vmem:[#allocation17_spill] sm:$0xff]  ;;  %v9561_v0 = vpack.c.bf16 %v1393_v42, %v1381_v45 }
  0xd2   :  { %7539 = vmatprep.subr.bf16.mxu1 %v9351_v57  ;;  %7499 = vmatprep.subr.bf16.mxu0 %v9063_v30  ;;  %v10483_v30 = vand.u32 4294901760, %v9131_v26  ;;  %v9424_v26 = vpack.c.bf16 %v9241_v35, %v9239_v5  ;;  %v10494_v3 = vld [vmem:[#allocation12_spill] sm:$0xff] }
  0xd3   :  { %778 = vmatmul.mubr.f32.gmra.mrb[6].mxu0 %v10482_v34  ;;  %1445 = vmatprep.mubr.f32.mxu1 %v10462_v37  ;;  %v9406_v20 = vpack.c.bf16 %v1395_v15, %v1383_v58  ;;  %v10495_v34 = vld [vmem:[#allocation18_spill] sm:$0xff]  ;;  %v10497_v15 = vld [vmem:[#allocation13_spill] sm:$0xff] }
  0xd4   :  { %783 = vmatprep.mubr.f32.mxu0 %v10462_v37  ;;  %v10496_v58 = vld [vmem:[#allocation10_spill] sm:$0xff] }
  0xd5   :  { %7541 = vmatpush1.bf16.msra.mxu1 %v9376_v44  ;;  %7501 = vmatpush1.bf16.msra.mxu0 %v9065_v31  ;;  %v9411_v31 = vpack.c.bf16 %v9225_v11, %v9222_v41 }
  0xd6   :  { %7543 = vmatprep.subr.bf16.mxu1 %v9387_v59  ;;  %7503 = vmatprep.subr.bf16.mxu0 %v8901_v47  ;;  %v9419_v47 = vpack.c.bf16 %v9234_v27, %v9232_v50 }
  0xd7   :  { %787 = vmatmul.mubr.f32.gmra.mrb[8].mxu0 %v10483_v30  ;;  %v10498_v30 = vand.u32 4294901760, %v9222_v41  ;;  %v10503_v41 = vand.u32 4294901760, %v9239_v5 }
  0xd8   :  { %792 = vmatprep.mubr.f32.mxu0 %v10462_v37 }
  0xd9   :  { %7545 = vmatpush1.bf16.msra.mxu1 %v9395_v36 }
  0xda   :  { %7547 = vmatprep.subr.bf16.mxu1 %v9399_v48 }
  0xdb   :  { %796 = vmatmul.mubr.f32.gmra.mrb[10].mxu0 %v10484_v8  ;;  %v10499_v8 = vand.u32 4294901760, %v9225_v11  ;;  %v10504_v11 = vand.u32 4294901760, %v9241_v35  ;;  %v9533_v35 = vpack.c.bf16 %v1363_v28, %v1351_v19 }
  0xdc   :  { %801 = vmatprep.mubr.f32.mxu0 %v10462_v37 }
  0xdd   :  { %7549 = vmatpush1.bf16.msra.mxu1 %v9406_v20 }
  0xde   :  { %7551 = vmatprep.subr.bf16.mxu1 %v9411_v31 }
  0xdf   :  { %805 = vmatmul.mubr.f32.gmra.mrb[12].mxu0 %v10485_v18  ;;  %v9497_v18 = vpack.c.bf16 %v10499_v8, %v10498_v30 }
  0xe0   :  { %1447 = vmatmul.mubr.f32.vlgmr.msra.gmra.mrb[16].mxu1 %v10462_v37  ;;  %810 = vmatprep.mubr.f32.mxu0 %v10462_v37 }
  0xe1   :  { %7553 = vmatpush1.bf16.msra.mxu1 %v9419_v47  ;;  %1549 = vmatprep.mubr.f32.mxu1 %v10462_v37 }
  0xe2   :  { %7555 = vmatprep.subr.bf16.mxu1 %v9424_v26 }
  0xe3   :  { %814 = vmatmul.mubr.f32.gmra.mrb[14].mxu0 %v10486_v53  ;;  %v10500_v53 = vld [vmem:[#allocation14_spill] sm:$0xff] }
  0xe4   :  { %932 = vmatprep.mubr.f32.mxu0 %v10462_v37 }
  0xe5   :  { %7557 = vmatpush1.bf16.msra.mxu1 %v9433_v6 }
  0xe6   :  { %7559 = vmatprep.subr.bf16.mxu1 %v9439_v60 }
  0xe7   :  { %7237 = vmatmul.mubr.msk.f32.vlgmr.msra.gmra.mrb[0].mxu0 %vm111_vm1, %v9073_v40 }
  0xe8   :  { %7505 = vmatpush1.bf16.msra.mxu0 %v8923_v10  ;;  %939 = vmatprep.mubr.f32.mxu0 %v10462_v37  ;;  %v10487_v10 = vld [vmem:[#allocation7_spill] sm:$0xff] }
  0xe9   :  { %7561 = vmatpush1.bf16.msra.mxu1 %v9447_v32  ;;  %7507 = vmatprep.subr.bf16.mxu0 %v8974_v49  ;;  %v10490_v49 = vld [vmem:[#allocation16_spill] sm:$0xff] }
  0xea   :  { %7563 = vmatprep.subr.bf16.mxu1 %v9452_v25 }
  0xeb   :  { %7238 = vmatmul.mubr.msk.f32.gmra.mrb[2].mxu0 %vm111_vm1, %v9092_v24 }
  0xec   :  { %946 = vmatprep.mubr.f32.mxu0 %v10462_v37  ;;  %7509 = vmatpush1.bf16.msra.mxu0 %v8982_v7  ;;  %v10493_v7 = vld [vmem:[#allocation9_spill] sm:$0xff] }
  0xed   :  { %7565 = vmatpush1.bf16.msra.mxu1 %v9461_v16  ;;  %7511 = vmatprep.subr.bf16.mxu0 %v10487_v10  ;;  %v10501_v10 = vand.u32 4294901760, %v9232_v50  ;;  %v10505_v50 = vand.u32 4294901760, %v9262_v13  ;;  %v9543_v13 = vpack.c.bf16 %v1369_v55, %v1357_v62 }
  0xee   :  { %7567 = vmatprep.subr.bf16.mxu1 %v10488_v52 }
  0xef   :  { %7239 = vmatmul.mubr.msk.f32.gmra.mrb[4].mxu0 %vm111_vm1, %v10489_v63 }
  0xf0   :  { %1552 = vmatmul.mubr.f32.vlgmr.msra.gmra.mrb[16].mxu1 %v10462_v37  ;;  %953 = vmatprep.mubr.f32.mxu0 %v10462_v37 }
  0xf1   :  { %7569 = vmatpush1.bf16.msra.mxu1 %v10490_v49  ;;  %7513 = vmatpush1.bf16.msra.mxu0 %v10491_v33  ;;  %v10502_v33 = vand.u32 4294901760, %v9234_v27  ;;  %v10506_v27 = vand.u32 4294901760, %v9264_v29 }
  0xf2   :  { %7571 = vmatprep.subr.bf16.mxu1 %v10492_v22  ;;  %7515 = vmatprep.subr.bf16.mxu0 %v10493_v7 }
  0xf3   :  { %7240 = vmatmul.mubr.msk.f32.gmra.mrb[6].mxu0 %vm111_vm1, %v10494_v3  ;;  %1638 = vmatprep.mubr.f32.mxu1 %v10462_v37  ;;  %v9507_v7 = vpack.c.bf16 %v10502_v33, %v10501_v10  ;;  %v9525_v30 = vpack.c.bf16 %v10506_v27, %v10505_v50 }
  0xf4   :  { %960 = vmatprep.mubr.f32.mxu0 %v10462_v37 }
  0xf5   :  { %7573 = vmatpush1.bf16.msra.mxu1 %v10495_v34  ;;  %7517 = vmatpush1.bf16.msra.mxu0 %v10496_v58  ;;  %v9514_v58 = vpack.c.bf16 %v10504_v11, %v10503_v41  ;;  %v10511_v41 = vld [vmem:[#allocation5_spill] sm:$0xff] }
  0xf6   :  { %7575 = vmatprep.subr.bf16.mxu1 %v9268_v4  ;;  %7711 = vmatprep.subr.bf16.mxu0 %v10488_v52  ;;  %v1126_v11 = vadd.s32 128, %v10511_v41 }
  0xf7   :  { %7241 = vmatmul.mubr.msk.f32.gmra.mrb[8].mxu0 %vm111_vm1, %v10497_v15 }
  0xf8   :  { %967 = vmatprep.mubr.f32.mxu0 %v10462_v37 }
  0xf9   :  { %7577 = vmatpush1.bf16.msra.mxu1 %v9270_v17 }
  0xfa   :  { %7579 = vmatprep.subr.bf16.mxu1 %v9297_v1 }
  0xfb   :  { %7242 = vmatmul.mubr.msk.f32.gmra.mrb[10].mxu0 %vm111_vm1, %v10500_v53 }
  0xfc   :  { %974 = vmatprep.mubr.f32.mxu0 %v10462_v37 }
  0xfd   :  { %7581 = vmatpush1.bf16.msra.mxu1 %v9312_v54 }
  0xfe   :  { %7583 = vmatprep.subr.bf16.mxu1 %v9497_v18 }
  0xff   :  { %7243 = vmatmul.mubr.msk.f32.gmra.mrb[12].mxu0 %vm111_vm1, %v9145_v14 }
 0x100   :  { %1642 = vmatmul.mubr.f32.vlgmr.msra.gmra.mrb[16].mxu1 %v10462_v37  ;;  %981 = vmatprep.mubr.f32.mxu0 %v10462_v37 }
 0x101   :  { %7585 = vmatpush1.bf16.msra.mxu1 %v9507_v7  ;;  %1760 = vmatprep.mubr.f32.mxu1 %v10462_v37 }
 0x102   :  { %7587 = vmatprep.subr.bf16.mxu1 %v9514_v58 }
 0x103   :  { %7244 = vmatmul.mubr.msk.f32.gmra.mrb[14].mxu0 %vm111_vm1, %v9172_v9 }
 0x104   :  { %1069 = vmatprep.mubr.f32.mxu0 %v10462_v37 }
 0x105   :  { %7589 = vmatpush1.bf16.msra.mxu1 %v9525_v30 }
 0x106   :  { %7591 = vmatprep.subr.bf16.mxu1 %v9533_v35 }
 0x107   :  { %7245 = vmatmul.mubr.msk.f32.vlgmr.msra.gmra.mrb[0].mxu0 %vm111_vm1, %v9073_v40 }
 0x108   :  { %1076 = vmatprep.mubr.f32.mxu0 %v10462_v37  ;;  %7713 = vmatpush1.bf16.msra.mxu0 %v10490_v49 }
 0x109   :  { %7593 = vmatpush1.bf16.msra.mxu1 %v9543_v13  ;;  %7715 = vmatprep.subr.bf16.mxu0 %v10492_v22 }
 0x10a   :  { %7595 = vmatprep.subr.bf16.mxu1 %v9550_v38 }
 0x10b   :  { %7246 = vmatmul.mubr.msk.f32.gmra.mrb[2].mxu0 %vm111_vm1, %v9092_v24 }
 0x10c   :  { %1083 = vmatprep.mubr.f32.mxu0 %v10462_v37  ;;  %7717 = vmatpush1.bf16.msra.mxu0 %v10495_v34 }
 0x10d   :  { %7597 = vmatpush1.bf16.msra.mxu1 %v9561_v0  ;;  %7719 = vmatprep.subr.bf16.mxu0 %v9268_v4 }
 0x10e   :  { %7599 = vmatprep.subr.bf16.mxu1 %v10488_v52 }
 0x10f   :  { %7247 = vmatmul.mubr.msk.f32.gmra.mrb[4].mxu0 %vm111_vm1, %v10489_v63 }
 0x110   :  { %1762 = vmatmul.mubr.f32.vlgmr.msra.gmra.mrb[16].mxu1 %v10462_v37  ;;  %1090 = vmatprep.mubr.f32.mxu0 %v10462_v37 }
 0x111   :  { %7601 = vmatpush1.bf16.msra.mxu1 %v10490_v49  ;;  %1848 = vmatprep.mubr.f32.mxu1 %v10462_v37 }
 0x112   :  { %7603 = vmatprep.subr.bf16.mxu1 %v10492_v22  ;;  %7721 = vmatpush1.bf16.msra.mxu0 %v9270_v17 }
 0x113   :  { %7248 = vmatmul.mubr.msk.f32.gmra.mrb[6].mxu0 %vm111_vm1, %v10494_v3  ;;  %7723 = vmatprep.subr.bf16.mxu0 %v9297_v1 }
 0x114   :  { %1097 = vmatprep.mubr.f32.mxu0 %v10462_v37 }
 0x115   :  { %7605 = vmatpush1.bf16.msra.mxu1 %v10495_v34 }
 0x116   :  { %7607 = vmatprep.subr.bf16.mxu1 %v9268_v4  ;;  %7725 = vmatpush1.bf16.msra.mxu0 %v9312_v54 }
 0x117   :  { %7249 = vmatmul.mubr.msk.f32.gmra.mrb[8].mxu0 %vm111_vm1, %v10497_v15  ;;  %7727 = vmatprep.subr.bf16.mxu0 %v9314_v21 }
 0x118   :  { %1104 = vmatprep.mubr.f32.mxu0 %v10462_v37 }
 0x119   :  { %7609 = vmatpush1.bf16.msra.mxu1 %v9270_v17 }
 0x11a   :  { %7611 = vmatprep.subr.bf16.mxu1 %v9297_v1 }
 0x11b   :  { %7250 = vmatmul.mubr.msk.f32.gmra.mrb[10].mxu0 %vm111_vm1, %v10500_v53 }
 0x11c   :  { %1111 = vmatprep.mubr.f32.mxu0 %v10462_v37 }
 0x11d   :  { %7613 = vmatpush1.bf16.msra.mxu1 %v9312_v54 }
 0x11e   :  { %7615 = vmatprep.subr.bf16.mxu1 %v10488_v52 }
 0x11f   :  { %7251 = vmatmul.mubr.msk.f32.gmra.mrb[12].mxu0 %vm111_vm1, %v9145_v14 }
 0x120   :  { %1850 = vmatmul.mubr.f32.vlgmr.msra.gmra.mrb[16].mxu1 %v10462_v37  ;;  %1118 = vmatprep.mubr.f32.mxu0 %v10462_v37 }
 0x121   :  { %7617 = vmatpush1.bf16.msra.mxu1 %v10490_v49  ;;  %1966 = vmatprep.mubr.f32.mxu1 %v10462_v37 }
 0x122   :  { %7619 = vmatprep.subr.bf16.mxu1 %v10492_v22 }
 0x123   :  { %7252 = vmatmul.mubr.msk.f32.gmra.mrb[14].mxu0 %vm111_vm1, %v9172_v9 }
 0x124   :  { %2647 = vmatprep.mubr.f32.mxu0 %v10462_v37 }
 0x125   :  { %7621 = vmatpush1.bf16.msra.mxu1 %v10495_v34 }
 0x126   :  { %7623 = vmatprep.subr.bf16.mxu1 %v9268_v4 }
 0x129   :  { %7625 = vmatpush1.bf16.msra.mxu1 %v9270_v17 }
 0x12a   :  { %7627 = vmatprep.subr.bf16.mxu1 %v9297_v1 }
 0x12d   :  { %7629 = vmatpush1.bf16.msra.mxu1 %v9312_v54 }
 0x12e   :  { %7631 = vmatprep.subr.bf16.mxu1 %v9314_v21 }
 0x173   :  { %v223_v40 = vpop.f32.mrb[0].mxu1 }
 0x174   :  { %v225_v24 = vpop.f32.mrb[1].mxu1 }
 0x177   :  { %v234_v14 = vpop.f32.mrb[2].mxu1 }
 0x178   :  { %v236_v43 = vpop.f32.mrb[3].mxu1 }
 0x17b   :  { %v245_v5 = vpop.f32.mrb[4].mxu1 }
 0x17c   :  { %v247_v9 = vpop.f32.mrb[5].mxu1 }
 0x17f   :  { %v256_v29 = vpop.f32.mrb[6].mxu1 }
 0x180   :  { %v258_v23 = vpop.f32.mrb[7].mxu1 }
 0x193   :  { %v480_v12 = vpop.f32.mrb[8].mxu1 }
 0x194   :  { %v482_v56 = vpop.f32.mrb[9].mxu1 }
 0x197   :  { %v487_v19 = vpop.f32.mrb[10].mxu1 }
 0x198   :  { %v489_v28 = vpop.f32.mrb[11].mxu1 }
 0x19b   :  { %v494_v62 = vpop.f32.mrb[12].mxu1 }
 0x19c   :  { %v496_v55 = vpop.f32.mrb[13].mxu1 }
 0x19f   :  { %v501_v61 = vpop.f32.mrb[14].mxu1 }
 0x1a0   :  { %v503_v39 = vpop.f32.mrb[15].mxu1 }
 0x1da   :  { %v1072_v51 = vpop.f32.mrb[0].mxu0 }
 0x1db   :  { %v9614_v2 = vadd.f32 %v1072_v51, %v223_v40  ;;  %v1074_v45 = vpop.f32.mrb[1].mxu0  ;;  %v1131_v40 = vand.u32 63, %v10511_v41 }
 0x1dc   :  { %v9616_v42 = vadd.f32 %v1074_v45, %v225_v24  ;;  %v1138_v45 = vand.u32 63, %v1126_v11 }
 0x1dd   :  { %10507 = vst [vmem:[#allocation7_spill] sm:$0xff] %v9614_v2  ;;  %vm9632_vm10 = vcmp.lt.s32.totalorder %v1131_v40, 32 }
 0x1de   :  { %10508 = vst [vmem:[#allocation15_spill] sm:$0xff] %v9616_v42  ;;  %v1079_v63 = vpop.f32.mrb[2].mxu0  ;;  %vm9638_vm11 = vcmp.lt.s32.totalorder %v1138_v45, 32 }
 0x1df   :  { %v9618_v3 = vadd.f32 %v1079_v63, %v234_v14  ;;  %v1081_v15 = vpop.f32.mrb[3].mxu0 }
 0x1e0   :  { %v9620_v8 = vadd.f32 %v1081_v15, %v236_v43 }
 0x1e1   :  { %10509 = vst [vmem:[#allocation11_spill] sm:$0xff] %v9618_v3 }
 0x1e2   :  { %10510 = vst [vmem:[#allocation16_spill] sm:$0xff] %v9620_v8  ;;  %v1086_v53 = vpop.f32.mrb[4].mxu0 }
 0x1e3   :  { %v9622_v10 = vadd.f32 %v1086_v53, %v245_v5  ;;  %v1088_v33 = vpop.f32.mrb[5].mxu0 }
 0x1e4   :  { %v9625_v50 = vadd.f32 %v1088_v33, %v247_v9  ;;  %v6659_v9 = vld [vmem:[%s10400_s4] sm:$0xff] }
 0x1e6   :  { %v1093_v27 = vpop.f32.mrb[6].mxu0 }
 0x1e7   :  { %v9628_v51 = vadd.f32 %v1093_v27, %v256_v29  ;;  %v1095_v24 = vpop.f32.mrb[7].mxu0 }
 0x1e8   :  { %v9630_v14 = vadd.f32 %v1095_v24, %v258_v23 }
 0x1ea   :  { %v1100_v63 = vpop.f32.mrb[8].mxu0 }
 0x1eb   :  { %v9636_v5 = vadd.f32 %v1100_v63, %v480_v12  ;;  %v1102_v15 = vpop.f32.mrb[9].mxu0 }
 0x1ec   :  { %v9642_v53 = vadd.f32 %v1102_v15, %v482_v56 }
 0x1ee   :  { %10516 = vst [vmem:[#allocation8_spill] sm:$0xff] %v9642_v53  ;;  %v1107_v33 = vpop.f32.mrb[10].mxu0 }
 0x1ef   :  { %v9660_v11 = vadd.f32 %v1107_v33, %v487_v19  ;;  %v1109_v27 = vpop.f32.mrb[11].mxu0 }
 0x1f0   :  { %v9662_v40 = vadd.f32 %v1109_v27, %v489_v28 }
 0x1f2   :  { %v1114_v63 = vpop.f32.mrb[12].mxu0 }
 0x1f3   :  { %v9680_v15 = vadd.f32 %v1114_v63, %v494_v62  ;;  %v1851_v33 = vpop.f32.mrb[16].mxu1  ;;  %v1116_v27 = vpop.f32.mrb[13].mxu0 }
 0x1f4   :  { %v9682_v56 = vadd.f32 %v1116_v27, %v496_v55  ;;  %v1853_v23 = vpop.f32.mrb[17].mxu1 }
 0x1f6   :  { %10517 = vst [vmem:[#allocation17_spill] sm:$0xff] %v9682_v56  ;;  %v1121_v29 = vpop.f32.mrb[14].mxu0 }
 0x1f7   :  { %v9700_v63 = vadd.f32 %v1121_v29, %v501_v61  ;;  %v1123_v27 = vpop.f32.mrb[15].mxu0 }
 0x1f8   :  { %v9702_v28 = vadd.f32 %v1123_v27, %v503_v39 }
 0x1f9   :  { %10518 = vst [vmem:[#allocation9_spill] sm:$0xff] %v9700_v63  ;;  %v1155_v12 = vsel %vm9632_vm10, %v9614_v2, %v9700_v63 }
 0x1fa   :  { %10519 = vst [vmem:[#allocation12_spill] sm:$0xff] %v9702_v28  ;;  %v1856_v24 = vadd.f32 %v1851_v33, %v1155_v12  ;;  %v1156_v61 = vsel %vm9638_vm11, %v9616_v42, %v9702_v28 }
 0x1fb   :  { %v1857_v29 = vadd.f32 %v1853_v23, %v1156_v61 }
 0x1fc   :  { %8554 = vtanh.f32 %v1856_v24  ;;  %v9723_v24 = vpop.permute.xlu1 %1159 }
 0x1fd   :  { %8556 = vtanh.f32 %v1857_v29 }
 0x206   :  { %v8555_v27 = vpop.eup %8554 }
 0x207   :  { %v1860_v55 = vmul.f32 0.5, %v8555_v27  ;;  %v8557_v45 = vpop.eup %8556 }
 0x208   :  { %v1862_v2 = vmul.f32 0.5, %v8557_v45 }
 0x209   :  { %v1861_v62 = vadd.f32 0.5, %v1860_v55  ;;  %v8634_v55 = vmov 7  }
 0x20a   :  { %v1863_v63 = vadd.f32 0.5, %v1862_v2  ;;  %v1157_v61 = vsel %vm1153_vm0, 0, %v8634_v55 }
 0x20b   :  { %v1865_v53 = vmul.f32 %v8557_v45, %v1861_v62  ;;  %v1864_v12 = vmul.f32 0.0, %v1861_v62  ;;  %vm1161_vm12 = vcmp.gt.s32.totalorder %v9723_v24, %v1157_v61 }
 0x20d   :  { %1867 = vrot.lane.b32.xlu0 %v1865_v53, %s8633_s2 }
 0x27f   :  { %v1868_v33 = vpop.permute.xlu0 %1867 }
 0x280   :  { %v1870_v19 = vadd.f32 %v1868_v33, %v1864_v12 }
 0x282   :  { %8558 = vtanh.f32 %v1870_v19  ;;  %1879 = vrot.lane.b32.xlu1 %v1870_v19, %s8633_s2 }
 0x28c   :  { %v8559_v39 = vpop.eup %8558 }
 0x28d   :  { %v1872_v23 = vmul.f32 %v8559_v39, %v1863_v63 }
 0x28f   :  { %1874 = vrot.lane.b32.xlu0 %v1872_v23, %s8633_s2  ;;  %v10520_v23 = vsel %vm9632_vm10, %v9618_v3, %v9680_v15 }
 0x2f4   :  { %v1880_v53 = vpop.permute.xlu1 %1879 }
 0x2f5   :  { %v9728_v62 = vsel %vm1161_vm12, %v1880_v53, 0.0  ;;  %v10521_v53 = vsel %vm9638_vm11, %v9620_v8, %v9682_v56 }
 0x2f6   :  { %2542 = vrot.lane.b32.xlu0 %v9728_v62, %s8633_s2 }
 0x301   :  { %v1875_v45 = vpop.permute.xlu0 %1874 }
 0x302   :  { %v9732_v2 = vsel %vm1161_vm12, %v1875_v45, 0.0 }
 0x303   :  { %v1884_v19 = vsel %vm111_vm1, %v9732_v2, 0 }
 0x304   :  { %v1967_v63 = vand.u32 4294901760, %v1884_v19 }
 0x306   :  { %v1968_v39 = vsub.f32 %v1884_v19, %v1967_v63 }
 0x308   :  { %v1969_v29 = vand.u32 4294901760, %v1968_v39 }
 0x30a   :  { %v1970_v27 = vsub.f32 %v1968_v39, %v1969_v29 }
 0x30c   :  { %v1971_v12 = vand.u32 4294901760, %v1970_v27 }
 0x30e   :  { %1972 = vmatmul.mubr.f32.vlgmr.msra.gmra.mrb[18].mxu1 %v1971_v12 }
 0x30f   :  { %7633 = vmatpush1.bf16.msra.mxu1 %v9349_v46  ;;  %2122 = vmatprep.mubr.f32.mxu1 %v10462_v37 }
 0x310   :  { %7635 = vmatprep.subr.bf16.mxu1 %v9351_v57 }
 0x313   :  { %7637 = vmatpush1.bf16.msra.mxu1 %v9376_v44 }
 0x314   :  { %7639 = vmatprep.subr.bf16.mxu1 %v9387_v59 }
 0x317   :  { %7641 = vmatpush1.bf16.msra.mxu1 %v9395_v36 }
 0x318   :  { %7643 = vmatprep.subr.bf16.mxu1 %v9399_v48 }
 0x31b   :  { %7645 = vmatpush1.bf16.msra.mxu1 %v9406_v20 }
 0x31c   :  { %7647 = vmatprep.subr.bf16.mxu1 %v9411_v31 }
 0x31e   :  { %2124 = vmatmul.mubr.f32.vlgmr.msra.gmra.mrb[18].mxu1 %v1967_v63 }
 0x31f   :  { %7649 = vmatpush1.bf16.msra.mxu1 %v9419_v47  ;;  %2226 = vmatprep.mubr.f32.mxu1 %v10462_v37 }
 0x320   :  { %7651 = vmatprep.subr.bf16.mxu1 %v9424_v26 }
 0x323   :  { %7653 = vmatpush1.bf16.msra.mxu1 %v9433_v6 }
 0x324   :  { %7655 = vmatprep.subr.bf16.mxu1 %v9439_v60 }
 0x327   :  { %7657 = vmatpush1.bf16.msra.mxu1 %v9447_v32 }
 0x328   :  { %7659 = vmatprep.subr.bf16.mxu1 %v9452_v25 }
 0x32b   :  { %7661 = vmatpush1.bf16.msra.mxu1 %v9461_v16 }
 0x32c   :  { %7663 = vmatprep.subr.bf16.mxu1 %v10488_v52 }
 0x32e   :  { %2229 = vmatmul.mubr.f32.vlgmr.msra.gmra.mrb[18].mxu1 %v1968_v39 }
 0x32f   :  { %7665 = vmatpush1.bf16.msra.mxu1 %v10490_v49  ;;  %2315 = vmatprep.mubr.f32.mxu1 %v10462_v37 }
 0x330   :  { %7667 = vmatprep.subr.bf16.mxu1 %v10492_v22 }
 0x333   :  { %7669 = vmatpush1.bf16.msra.mxu1 %v10495_v34 }
 0x334   :  { %7671 = vmatprep.subr.bf16.mxu1 %v9268_v4 }
 0x337   :  { %7673 = vmatpush1.bf16.msra.mxu1 %v9270_v17 }
 0x338   :  { %7675 = vmatprep.subr.bf16.mxu1 %v9297_v1 }
 0x33b   :  { %7677 = vmatpush1.bf16.msra.mxu1 %v9312_v54 }
 0x33c   :  { %7679 = vmatprep.subr.bf16.mxu1 %v9497_v18 }
 0x33e   :  { %2319 = vmatmul.mubr.f32.vlgmr.msra.gmra.mrb[18].mxu1 %v1969_v29 }
 0x33f   :  { %7681 = vmatpush1.bf16.msra.mxu1 %v9507_v7  ;;  %2437 = vmatprep.mubr.f32.mxu1 %v10462_v37 }
 0x340   :  { %7683 = vmatprep.subr.bf16.mxu1 %v9514_v58 }
 0x343   :  { %7685 = vmatpush1.bf16.msra.mxu1 %v9525_v30 }
 0x344   :  { %7687 = vmatprep.subr.bf16.mxu1 %v9533_v35 }
 0x347   :  { %7689 = vmatpush1.bf16.msra.mxu1 %v9543_v13 }
 0x348   :  { %7691 = vmatprep.subr.bf16.mxu1 %v9550_v38 }
 0x34b   :  { %7693 = vmatpush1.bf16.msra.mxu1 %v9561_v0 }
 0x34c   :  { %7695 = vmatprep.subr.bf16.mxu1 %v10488_v52 }
 0x34e   :  { %2439 = vmatmul.mubr.f32.vlgmr.msra.gmra.mrb[18].mxu1 %v1967_v63 }
 0x34f   :  { %7697 = vmatpush1.bf16.msra.mxu1 %v10490_v49  ;;  %2525 = vmatprep.mubr.f32.mxu1 %v10462_v37 }
 0x350   :  { %7699 = vmatprep.subr.bf16.mxu1 %v10492_v22 }
 0x353   :  { %7701 = vmatpush1.bf16.msra.mxu1 %v10495_v34 }
 0x354   :  { %7703 = vmatprep.subr.bf16.mxu1 %v9268_v4 }
 0x357   :  { %7705 = vmatpush1.bf16.msra.mxu1 %v9270_v17 }
 0x358   :  { %7707 = vmatprep.subr.bf16.mxu1 %v9297_v1 }
 0x35b   :  { %7709 = vmatpush1.bf16.msra.mxu1 %v9312_v54 }
 0x35c   :  { %7807 = vmatprep.subr.bf16.mxu1 %v10488_v52 }
 0x35e   :  { %2527 = vmatmul.mubr.f32.vlgmr.msra.gmra.mrb[18].mxu1 %v1967_v63 }
 0x35f   :  { %7809 = vmatpush1.bf16.msra.mxu1 %v10490_v49  ;;  %3328 = vmatprep.mubr.f32.mxu1 %v10462_v37 }
 0x360   :  { %7811 = vmatprep.subr.bf16.mxu1 %v10492_v22 }
 0x363   :  { %7813 = vmatpush1.bf16.msra.mxu1 %v10495_v34 }
 0x364   :  { %7815 = vmatprep.subr.bf16.mxu1 %v9268_v4 }
 0x367   :  { %7817 = vmatpush1.bf16.msra.mxu1 %v9270_v17 }
 0x368   :  { %7819 = vmatprep.subr.bf16.mxu1 %v9297_v1  ;;  %v2543_v12 = vpop.permute.xlu0 %2542 }
 0x36b   :  { %7821 = vmatpush1.bf16.msra.mxu1 %v9312_v54 }
 0x36c   :  { %7823 = vmatprep.subr.bf16.mxu1 %v9314_v21 }
 0x431   :  { %v2528_v33 = vpop.f32.mrb[18].mxu1 }
 0x432   :  { %v2533_v55 = vadd.f32 %v2528_v33, %v10520_v23  ;;  %v2530_v61 = vpop.f32.mrb[19].mxu1 }
 0x433   :  { %v2534_v45 = vadd.f32 %v2530_v61, %v10521_v53 }
 0x434   :  { %8560 = vtanh.f32 %v2533_v55  ;;  %v8635_v55 = vmov 6  }
 0x435   :  { %8562 = vtanh.f32 %v2534_v45  ;;  %v1164_v53 = vsel %vm1153_vm0, 1, %v8635_v55 }
 0x436   :  { %vm1165_vm13 = vcmp.gt.s32.totalorder %v9723_v24, %v1164_v53 }
 0x43e   :  { %v8561_v19 = vpop.eup %8560 }
 0x43f   :  { %v2537_v63 = vmul.f32 0.5, %v8561_v19  ;;  %v8563_v29 = vpop.eup %8562 }
 0x440   :  { %v2539_v23 = vmul.f32 0.5, %v8563_v29 }
 0x441   :  { %v2538_v39 = vadd.f32 0.5, %v2537_v63 }
 0x442   :  { %v2540_v3 = vadd.f32 0.5, %v2539_v23  ;;  %v10523_v23 = vsel %vm9638_vm11, %v9625_v50, %v9662_v40 }
 0x443   :  { %v2546_v27 = vmul.f32 %v8563_v29, %v2538_v39  ;;  %v2545_v42 = vmul.f32 %v2543_v12, %v2538_v39 }
 0x445   :  { %2548 = vrot.lane.b32.xlu1 %v2546_v27, %s8633_s2 }
 0x4b7   :  { %v2549_v28 = vpop.permute.xlu1 %2548 }
 0x4b8   :  { %v2551_v33 = vadd.f32 %v2549_v28, %v2545_v42 }
 0x4ba   :  { %8564 = vtanh.f32 %v2551_v33  ;;  %2560 = vrot.lane.b32.xlu1 %v2551_v33, %s8633_s2 }
 0x4c4   :  { %v8565_v8 = vpop.eup %8564 }
 0x4c5   :  { %v2553_v61 = vmul.f32 %v8565_v8, %v2540_v3 }
 0x4c7   :  { %2555 = vrot.lane.b32.xlu0 %v2553_v61, %s8633_s2 }
 0x52c   :  { %v2561_v45 = vpop.permute.xlu1 %2560 }
 0x52d   :  { %v9807_v19 = vsel %vm1165_vm13, %v2561_v45, %v9728_v62 }
 0x52e   :  { %3223 = vrot.lane.b32.xlu0 %v9807_v19, %s8633_s2 }
 0x539   :  { %v2556_v42 = vpop.permute.xlu0 %2555 }
 0x53a   :  { %v9812_v28 = vsel %vm1165_vm13, %v2556_v42, %v9732_v2  ;;  %v10522_v2 = vsel %vm9632_vm10, %v9622_v10, %v9660_v11 }
 0x53b   :  { %v2565_v3 = vsel %vm111_vm1, %v9812_v28, 0 }
 0x53c   :  { %v2648_v8 = vand.u32 4294901760, %v2565_v3 }
 0x53e   :  { %v2649_v63 = vsub.f32 %v2565_v3, %v2648_v8 }
 0x540   :  { %v2650_v39 = vand.u32 4294901760, %v2649_v63 }
 0x542   :  { %v2651_v29 = vsub.f32 %v2649_v63, %v2650_v39 }
 0x544   :  { %v2652_v27 = vand.u32 4294901760, %v2651_v29 }
 0x546   :  { %2653 = vmatmul.mubr.f32.vlgmr.msra.gmra.mrb[16].mxu0 %v2652_v27 }
 0x547   :  { %7729 = vmatpush1.bf16.msra.mxu0 %v9349_v46  ;;  %2803 = vmatprep.mubr.f32.mxu0 %v10462_v37 }
 0x548   :  { %7731 = vmatprep.subr.bf16.mxu0 %v9351_v57 }
 0x54b   :  { %7733 = vmatpush1.bf16.msra.mxu0 %v9376_v44 }
 0x54c   :  { %7735 = vmatprep.subr.bf16.mxu0 %v9387_v59 }
 0x54f   :  { %7737 = vmatpush1.bf16.msra.mxu0 %v9395_v36 }
 0x550   :  { %7739 = vmatprep.subr.bf16.mxu0 %v9399_v48 }
 0x553   :  { %7741 = vmatpush1.bf16.msra.mxu0 %v9406_v20 }
 0x554   :  { %7743 = vmatprep.subr.bf16.mxu0 %v9411_v31 }
 0x556   :  { %2805 = vmatmul.mubr.f32.vlgmr.msra.gmra.mrb[16].mxu0 %v2648_v8 }
 0x557   :  { %7745 = vmatpush1.bf16.msra.mxu0 %v9419_v47  ;;  %2907 = vmatprep.mubr.f32.mxu0 %v10462_v37 }
 0x558   :  { %7747 = vmatprep.subr.bf16.mxu0 %v9424_v26 }
 0x55b   :  { %7749 = vmatpush1.bf16.msra.mxu0 %v9433_v6 }
 0x55c   :  { %7751 = vmatprep.subr.bf16.mxu0 %v9439_v60 }
 0x55f   :  { %7753 = vmatpush1.bf16.msra.mxu0 %v9447_v32 }
 0x560   :  { %7755 = vmatprep.subr.bf16.mxu0 %v9452_v25 }
 0x563   :  { %7757 = vmatpush1.bf16.msra.mxu0 %v9461_v16 }
 0x564   :  { %7759 = vmatprep.subr.bf16.mxu0 %v10488_v52 }
 0x566   :  { %2910 = vmatmul.mubr.f32.vlgmr.msra.gmra.mrb[16].mxu0 %v2649_v63 }
 0x567   :  { %7761 = vmatpush1.bf16.msra.mxu0 %v10490_v49  ;;  %2996 = vmatprep.mubr.f32.mxu0 %v10462_v37 }
 0x568   :  { %7763 = vmatprep.subr.bf16.mxu0 %v10492_v22 }
 0x56b   :  { %7765 = vmatpush1.bf16.msra.mxu0 %v10495_v34 }
 0x56c   :  { %7767 = vmatprep.subr.bf16.mxu0 %v9268_v4 }
 0x56f   :  { %7769 = vmatpush1.bf16.msra.mxu0 %v9270_v17 }
 0x570   :  { %7771 = vmatprep.subr.bf16.mxu0 %v9297_v1 }
 0x573   :  { %7773 = vmatpush1.bf16.msra.mxu0 %v9312_v54 }
 0x574   :  { %7775 = vmatprep.subr.bf16.mxu0 %v9497_v18 }
 0x576   :  { %3000 = vmatmul.mubr.f32.vlgmr.msra.gmra.mrb[16].mxu0 %v2650_v39 }
 0x577   :  { %7777 = vmatpush1.bf16.msra.mxu0 %v9507_v7  ;;  %3118 = vmatprep.mubr.f32.mxu0 %v10462_v37 }
 0x578   :  { %7779 = vmatprep.subr.bf16.mxu0 %v9514_v58 }
 0x57b   :  { %7781 = vmatpush1.bf16.msra.mxu0 %v9525_v30 }
 0x57c   :  { %7783 = vmatprep.subr.bf16.mxu0 %v9533_v35 }
 0x57f   :  { %7785 = vmatpush1.bf16.msra.mxu0 %v9543_v13 }
 0x580   :  { %7787 = vmatprep.subr.bf16.mxu0 %v9550_v38 }
 0x583   :  { %7789 = vmatpush1.bf16.msra.mxu0 %v9561_v0 }
 0x584   :  { %7791 = vmatprep.subr.bf16.mxu0 %v10488_v52 }
 0x586   :  { %3120 = vmatmul.mubr.f32.vlgmr.msra.gmra.mrb[16].mxu0 %v2648_v8 }
 0x587   :  { %7793 = vmatpush1.bf16.msra.mxu0 %v10490_v49  ;;  %3206 = vmatprep.mubr.f32.mxu0 %v10462_v37 }
 0x588   :  { %7795 = vmatprep.subr.bf16.mxu0 %v10492_v22 }
 0x58b   :  { %7797 = vmatpush1.bf16.msra.mxu0 %v10495_v34 }
 0x58c   :  { %7799 = vmatprep.subr.bf16.mxu0 %v9268_v4 }
 0x58f   :  { %7801 = vmatpush1.bf16.msra.mxu0 %v9270_v17 }
 0x590   :  { %7803 = vmatprep.subr.bf16.mxu0 %v9297_v1 }
 0x593   :  { %7805 = vmatpush1.bf16.msra.mxu0 %v9312_v54 }
 0x594   :  { %7903 = vmatprep.subr.bf16.mxu0 %v10488_v52 }
 0x596   :  { %3208 = vmatmul.mubr.f32.vlgmr.msra.gmra.mrb[16].mxu0 %v2648_v8 }
 0x597   :  { %7905 = vmatpush1.bf16.msra.mxu0 %v10490_v49  ;;  %4009 = vmatprep.mubr.f32.mxu0 %v10462_v37 }
 0x598   :  { %7907 = vmatprep.subr.bf16.mxu0 %v10492_v22 }
 0x59b   :  { %7909 = vmatpush1.bf16.msra.mxu0 %v10495_v34 }
 0x59c   :  { %7911 = vmatprep.subr.bf16.mxu0 %v9268_v4 }
 0x59f   :  { %7913 = vmatpush1.bf16.msra.mxu0 %v9270_v17 }
 0x5a0   :  { %7915 = vmatprep.subr.bf16.mxu0 %v9297_v1  ;;  %v3224_v8 = vpop.permute.xlu0 %3223 }
 0x5a3   :  { %7917 = vmatpush1.bf16.msra.mxu0 %v9312_v54 }
 0x5a4   :  { %7919 = vmatprep.subr.bf16.mxu0 %v9314_v21 }
 0x669   :  { %v3209_v62 = vpop.f32.mrb[16].mxu0 }
 0x66a   :  { %v3214_v12 = vadd.f32 %v3209_v62, %v10522_v2  ;;  %v3211_v33 = vpop.f32.mrb[17].mxu0 }
 0x66b   :  { %v3215_v61 = vadd.f32 %v3211_v33, %v10523_v23 }
 0x66c   :  { %8566 = vtanh.f32 %v3214_v12  ;;  %v8636_v12 = vmov 5  }
 0x66d   :  { %8568 = vtanh.f32 %v3215_v61  ;;  %v1168_v23 = vsel %vm1153_vm0, 2, %v8636_v12 }
 0x66e   :  { %vm1169_vm14 = vcmp.gt.s32.totalorder %v9723_v24, %v1168_v23 }
 0x676   :  { %v8567_v55 = vpop.eup %8566 }
 0x677   :  { %v3218_v53 = vmul.f32 0.5, %v8567_v55  ;;  %v8569_v42 = vpop.eup %8568 }
 0x678   :  { %v3220_v27 = vmul.f32 0.5, %v8569_v42 }
 0x679   :  { %v3219_v45 = vadd.f32 0.5, %v3218_v53 }
 0x67a   :  { %v3221_v62 = vadd.f32 0.5, %v3220_v27 }
 0x67b   :  { %v3227_v3 = vmul.f32 %v8569_v42, %v3219_v45  ;;  %v3226_v63 = vmul.f32 %v3224_v8, %v3219_v45 }
 0x67d   :  { %3229 = vrot.lane.b32.xlu1 %v3227_v3, %s8633_s2 }
 0x6ef   :  { %v3230_v39 = vpop.permute.xlu1 %3229 }
 0x6f0   :  { %v3232_v29 = vadd.f32 %v3230_v39, %v3226_v63 }
 0x6f2   :  { %8570 = vtanh.f32 %v3232_v29  ;;  %3241 = vrot.lane.b32.xlu1 %v3232_v29, %s8633_s2 }
 0x6fc   :  { %v8571_v2 = vpop.eup %8570 }
 0x6fd   :  { %v3234_v33 = vmul.f32 %v8571_v2, %v3221_v62  ;;  %v10525_v2 = vld [vmem:[#allocation8_spill] sm:$0xff] }
 0x6ff   :  { %3236 = vrot.lane.b32.xlu0 %v3234_v33, %s8633_s2  ;;  %v10526_v33 = vsel %vm9638_vm11, %v9630_v14, %v10525_v2 }
 0x764   :  { %v3242_v61 = vpop.permute.xlu1 %3241 }
 0x765   :  { %v9887_v55 = vsel %vm1169_vm14, %v3242_v61, %v9807_v19 }
 0x766   :  { %3904 = vrot.lane.b32.xlu0 %v9887_v55, %s8633_s2 }
 0x771   :  { %v3237_v53 = vpop.permute.xlu0 %3236 }
 0x772   :  { %v9892_v45 = vsel %vm1169_vm14, %v3237_v53, %v9812_v28  ;;  %v10524_v28 = vsel %vm9632_vm10, %v9628_v51, %v9636_v5 }
 0x773   :  { %v3246_v42 = vsel %vm111_vm1, %v9892_v45, 0 }
 0x774   :  { %v3329_v3 = vand.u32 4294901760, %v3246_v42 }
 0x776   :  { %v3330_v8 = vsub.f32 %v3246_v42, %v3329_v3 }
 0x778   :  { %v3331_v63 = vand.u32 4294901760, %v3330_v8 }
 0x77a   :  { %v3332_v39 = vsub.f32 %v3330_v8, %v3331_v63 }
 0x77c   :  { %v3333_v29 = vand.u32 4294901760, %v3332_v39 }
 0x77e   :  { %3334 = vmatmul.mubr.f32.vlgmr.msra.gmra.mrb[20].mxu1 %v3333_v29 }
 0x77f   :  { %7825 = vmatpush1.bf16.msra.mxu1 %v9349_v46  ;;  %3484 = vmatprep.mubr.f32.mxu1 %v10462_v37 }
 0x780   :  { %7827 = vmatprep.subr.bf16.mxu1 %v9351_v57 }
 0x783   :  { %7829 = vmatpush1.bf16.msra.mxu1 %v9376_v44 }
 0x784   :  { %7831 = vmatprep.subr.bf16.mxu1 %v9387_v59 }
 0x787   :  { %7833 = vmatpush1.bf16.msra.mxu1 %v9395_v36 }
 0x788   :  { %7835 = vmatprep.subr.bf16.mxu1 %v9399_v48 }
 0x78b   :  { %7837 = vmatpush1.bf16.msra.mxu1 %v9406_v20 }
 0x78c   :  { %7839 = vmatprep.subr.bf16.mxu1 %v9411_v31 }
 0x78e   :  { %3486 = vmatmul.mubr.f32.vlgmr.msra.gmra.mrb[20].mxu1 %v3329_v3 }
 0x78f   :  { %7841 = vmatpush1.bf16.msra.mxu1 %v9419_v47  ;;  %3588 = vmatprep.mubr.f32.mxu1 %v10462_v37 }
 0x790   :  { %7843 = vmatprep.subr.bf16.mxu1 %v9424_v26 }
 0x793   :  { %7845 = vmatpush1.bf16.msra.mxu1 %v9433_v6 }
 0x794   :  { %7847 = vmatprep.subr.bf16.mxu1 %v9439_v60 }
 0x797   :  { %7849 = vmatpush1.bf16.msra.mxu1 %v9447_v32 }
 0x798   :  { %7851 = vmatprep.subr.bf16.mxu1 %v9452_v25 }
 0x79b   :  { %7853 = vmatpush1.bf16.msra.mxu1 %v9461_v16 }
 0x79c   :  { %7855 = vmatprep.subr.bf16.mxu1 %v10488_v52 }
 0x79e   :  { %3591 = vmatmul.mubr.f32.vlgmr.msra.gmra.mrb[20].mxu1 %v3330_v8 }
 0x79f   :  { %7857 = vmatpush1.bf16.msra.mxu1 %v10490_v49  ;;  %3677 = vmatprep.mubr.f32.mxu1 %v10462_v37 }
 0x7a0   :  { %7859 = vmatprep.subr.bf16.mxu1 %v10492_v22 }
 0x7a3   :  { %7861 = vmatpush1.bf16.msra.mxu1 %v10495_v34 }
 0x7a4   :  { %7863 = vmatprep.subr.bf16.mxu1 %v9268_v4 }
 0x7a7   :  { %7865 = vmatpush1.bf16.msra.mxu1 %v9270_v17 }
 0x7a8   :  { %7867 = vmatprep.subr.bf16.mxu1 %v9297_v1 }
 0x7ab   :  { %7869 = vmatpush1.bf16.msra.mxu1 %v9312_v54 }
 0x7ac   :  { %7871 = vmatprep.subr.bf16.mxu1 %v9497_v18 }
 0x7ae   :  { %3681 = vmatmul.mubr.f32.vlgmr.msra.gmra.mrb[20].mxu1 %v3331_v63 }
 0x7af   :  { %7873 = vmatpush1.bf16.msra.mxu1 %v9507_v7  ;;  %3799 = vmatprep.mubr.f32.mxu1 %v10462_v37 }
 0x7b0   :  { %7875 = vmatprep.subr.bf16.mxu1 %v9514_v58 }
 0x7b3   :  { %7877 = vmatpush1.bf16.msra.mxu1 %v9525_v30 }
 0x7b4   :  { %7879 = vmatprep.subr.bf16.mxu1 %v9533_v35 }
 0x7b7   :  { %7881 = vmatpush1.bf16.msra.mxu1 %v9543_v13 }
 0x7b8   :  { %7883 = vmatprep.subr.bf16.mxu1 %v9550_v38 }
 0x7bb   :  { %7885 = vmatpush1.bf16.msra.mxu1 %v9561_v0 }
 0x7bc   :  { %7887 = vmatprep.subr.bf16.mxu1 %v10488_v52 }
 0x7be   :  { %3801 = vmatmul.mubr.f32.vlgmr.msra.gmra.mrb[20].mxu1 %v3329_v3 }
 0x7bf   :  { %7889 = vmatpush1.bf16.msra.mxu1 %v10490_v49  ;;  %3887 = vmatprep.mubr.f32.mxu1 %v10462_v37 }
 0x7c0   :  { %7891 = vmatprep.subr.bf16.mxu1 %v10492_v22 }
 0x7c3   :  { %7893 = vmatpush1.bf16.msra.mxu1 %v10495_v34 }
 0x7c4   :  { %7895 = vmatprep.subr.bf16.mxu1 %v9268_v4 }
 0x7c7   :  { %7897 = vmatpush1.bf16.msra.mxu1 %v9270_v17 }
 0x7c8   :  { %7899 = vmatprep.subr.bf16.mxu1 %v9297_v1 }
 0x7cb   :  { %7901 = vmatpush1.bf16.msra.mxu1 %v9312_v54 }
 0x7cc   :  { %7999 = vmatprep.subr.bf16.mxu1 %v10488_v52 }
 0x7ce   :  { %3889 = vmatmul.mubr.f32.vlgmr.msra.gmra.mrb[20].mxu1 %v3329_v3 }
 0x7cf   :  { %8001 = vmatpush1.bf16.msra.mxu1 %v10490_v49  ;;  %4690 = vmatprep.mubr.f32.mxu1 %v10462_v37 }
 0x7d0   :  { %8003 = vmatprep.subr.bf16.mxu1 %v10492_v22 }
 0x7d3   :  { %8005 = vmatpush1.bf16.msra.mxu1 %v10495_v34 }
 0x7d4   :  { %8007 = vmatprep.subr.bf16.mxu1 %v9268_v4 }
 0x7d7   :  { %8009 = vmatpush1.bf16.msra.mxu1 %v9270_v17 }
 0x7d8   :  { %8011 = vmatprep.subr.bf16.mxu1 %v9297_v1  ;;  %v3905_v8 = vpop.permute.xlu0 %3904 }
 0x7db   :  { %8013 = vmatpush1.bf16.msra.mxu1 %v9312_v54 }
 0x7dc   :  { %8015 = vmatprep.subr.bf16.mxu1 %v9314_v21 }
 0x8a1   :  { %v3890_v19 = vpop.f32.mrb[20].mxu1 }
 0x8a2   :  { %v3895_v27 = vadd.f32 %v3890_v19, %v10524_v28  ;;  %v3892_v62 = vpop.f32.mrb[21].mxu1 }
 0x8a3   :  { %v3896_v12 = vadd.f32 %v3892_v62, %v10526_v33 }
 0x8a4   :  { %8572 = vtanh.f32 %v3895_v27  ;;  %v8637_v27 = vmov 4  }
 0x8a5   :  { %8574 = vtanh.f32 %v3896_v12  ;;  %v1172_v33 = vsel %vm1153_vm0, 3, %v8637_v27 }
 0x8a6   :  { %vm1173_vm15 = vcmp.gt.s32.totalorder %v9723_v24, %v1172_v33 }
 0x8ae   :  { %v8573_v23 = vpop.eup %8572 }
 0x8af   :  { %v3899_v61 = vmul.f32 0.5, %v8573_v23  ;;  %v8575_v42 = vpop.eup %8574 }
 0x8b0   :  { %v3901_v19 = vmul.f32 0.5, %v8575_v42 }
 0x8b1   :  { %v3900_v53 = vadd.f32 0.5, %v3899_v61 }
 0x8b2   :  { %v3902_v28 = vadd.f32 0.5, %v3901_v19 }
 0x8b3   :  { %v3908_v3 = vmul.f32 %v8575_v42, %v3900_v53  ;;  %v3907_v63 = vmul.f32 %v3905_v8, %v3900_v53 }
 0x8b5   :  { %3910 = vrot.lane.b32.xlu1 %v3908_v3, %s8633_s2 }
 0x927   :  { %v3911_v39 = vpop.permute.xlu1 %3910 }
 0x928   :  { %v3913_v29 = vadd.f32 %v3911_v39, %v3907_v63 }
 0x92a   :  { %8576 = vtanh.f32 %v3913_v29  ;;  %3922 = vrot.lane.b32.xlu1 %v3913_v29, %s8633_s2 }
 0x934   :  { %v8577_v56 = vpop.eup %8576 }
 0x935   :  { %v3915_v62 = vmul.f32 %v8577_v56, %v3902_v28  ;;  %v10528_v28 = vsel %vm9638_vm11, %v10525_v2, %v9630_v14 }
 0x937   :  { %3917 = vrot.lane.b32.xlu0 %v3915_v62, %s8633_s2 }
 0x99c   :  { %v3923_v12 = vpop.permute.xlu1 %3922 }
 0x99d   :  { %v9967_v23 = vsel %vm1173_vm15, %v3923_v12, %v9887_v55 }
 0x99e   :  { %4585 = vrot.lane.b32.xlu0 %v9967_v23, %s8633_s2 }
 0x9a9   :  { %v3918_v61 = vpop.permute.xlu0 %3917 }
 0x9aa   :  { %v9972_v53 = vsel %vm1173_vm15, %v3918_v61, %v9892_v45  ;;  %v10527_v45 = vsel %vm9632_vm10, %v9636_v5, %v9628_v51 }
 0x9ab   :  { %v3927_v56 = vsel %vm111_vm1, %v9972_v53, 0 }
 0x9ac   :  { %v4010_v42 = vand.u32 4294901760, %v3927_v56 }
 0x9ae   :  { %v4011_v3 = vsub.f32 %v3927_v56, %v4010_v42 }
 0x9b0   :  { %v4012_v8 = vand.u32 4294901760, %v4011_v3 }
 0x9b2   :  { %v4013_v63 = vsub.f32 %v4011_v3, %v4012_v8 }
 0x9b4   :  { %v4014_v39 = vand.u32 4294901760, %v4013_v63 }
 0x9b6   :  { %4015 = vmatmul.mubr.f32.vlgmr.msra.gmra.mrb[18].mxu0 %v4014_v39  ;;  %v8638_v39 = vmov 3  }
 0x9b7   :  { %7921 = vmatpush1.bf16.msra.mxu0 %v9349_v46  ;;  %4165 = vmatprep.mubr.f32.mxu0 %v10462_v37 }
 0x9b8   :  { %7923 = vmatprep.subr.bf16.mxu0 %v9351_v57 }
 0x9bb   :  { %7925 = vmatpush1.bf16.msra.mxu0 %v9376_v44 }
 0x9bc   :  { %7927 = vmatprep.subr.bf16.mxu0 %v9387_v59 }
 0x9bf   :  { %7929 = vmatpush1.bf16.msra.mxu0 %v9395_v36 }
 0x9c0   :  { %7931 = vmatprep.subr.bf16.mxu0 %v9399_v48 }
 0x9c3   :  { %7933 = vmatpush1.bf16.msra.mxu0 %v9406_v20 }
 0x9c4   :  { %7935 = vmatprep.subr.bf16.mxu0 %v9411_v31 }
 0x9c6   :  { %4167 = vmatmul.mubr.f32.vlgmr.msra.gmra.mrb[18].mxu0 %v4010_v42 }
 0x9c7   :  { %7937 = vmatpush1.bf16.msra.mxu0 %v9419_v47  ;;  %4269 = vmatprep.mubr.f32.mxu0 %v10462_v37 }
 0x9c8   :  { %7939 = vmatprep.subr.bf16.mxu0 %v9424_v26 }
 0x9cb   :  { %7941 = vmatpush1.bf16.msra.mxu0 %v9433_v6 }
 0x9cc   :  { %7943 = vmatprep.subr.bf16.mxu0 %v9439_v60 }
 0x9cf   :  { %7945 = vmatpush1.bf16.msra.mxu0 %v9447_v32 }
 0x9d0   :  { %7947 = vmatprep.subr.bf16.mxu0 %v9452_v25 }
 0x9d3   :  { %7949 = vmatpush1.bf16.msra.mxu0 %v9461_v16 }
 0x9d4   :  { %7951 = vmatprep.subr.bf16.mxu0 %v10488_v52 }
 0x9d6   :  { %4272 = vmatmul.mubr.f32.vlgmr.msra.gmra.mrb[18].mxu0 %v4011_v3 }
 0x9d7   :  { %7953 = vmatpush1.bf16.msra.mxu0 %v10490_v49  ;;  %4358 = vmatprep.mubr.f32.mxu0 %v10462_v37 }
 0x9d8   :  { %7955 = vmatprep.subr.bf16.mxu0 %v10492_v22 }
 0x9db   :  { %7957 = vmatpush1.bf16.msra.mxu0 %v10495_v34 }
 0x9dc   :  { %7959 = vmatprep.subr.bf16.mxu0 %v9268_v4 }
 0x9df   :  { %7961 = vmatpush1.bf16.msra.mxu0 %v9270_v17 }
 0x9e0   :  { %7963 = vmatprep.subr.bf16.mxu0 %v9297_v1 }
 0x9e3   :  { %7965 = vmatpush1.bf16.msra.mxu0 %v9312_v54 }
 0x9e4   :  { %7967 = vmatprep.subr.bf16.mxu0 %v9497_v18 }
 0x9e6   :  { %4362 = vmatmul.mubr.f32.vlgmr.msra.gmra.mrb[18].mxu0 %v4012_v8 }
 0x9e7   :  { %7969 = vmatpush1.bf16.msra.mxu0 %v9507_v7  ;;  %4480 = vmatprep.mubr.f32.mxu0 %v10462_v37 }
 0x9e8   :  { %7971 = vmatprep.subr.bf16.mxu0 %v9514_v58 }
 0x9eb   :  { %7973 = vmatpush1.bf16.msra.mxu0 %v9525_v30 }
 0x9ec   :  { %7975 = vmatprep.subr.bf16.mxu0 %v9533_v35 }
 0x9ef   :  { %7977 = vmatpush1.bf16.msra.mxu0 %v9543_v13 }
 0x9f0   :  { %7979 = vmatprep.subr.bf16.mxu0 %v9550_v38 }
 0x9f3   :  { %7981 = vmatpush1.bf16.msra.mxu0 %v9561_v0 }
 0x9f4   :  { %7983 = vmatprep.subr.bf16.mxu0 %v10488_v52 }
 0x9f6   :  { %4482 = vmatmul.mubr.f32.vlgmr.msra.gmra.mrb[18].mxu0 %v4010_v42 }
 0x9f7   :  { %7985 = vmatpush1.bf16.msra.mxu0 %v10490_v49  ;;  %4568 = vmatprep.mubr.f32.mxu0 %v10462_v37 }
 0x9f8   :  { %7987 = vmatprep.subr.bf16.mxu0 %v10492_v22 }
 0x9fb   :  { %7989 = vmatpush1.bf16.msra.mxu0 %v10495_v34 }
 0x9fc   :  { %7991 = vmatprep.subr.bf16.mxu0 %v9268_v4 }
 0x9ff   :  { %7993 = vmatpush1.bf16.msra.mxu0 %v9270_v17 }
 0xa00   :  { %7995 = vmatprep.subr.bf16.mxu0 %v9297_v1 }
 0xa03   :  { %7997 = vmatpush1.bf16.msra.mxu0 %v9312_v54 }
 0xa04   :  { %8095 = vmatprep.subr.bf16.mxu0 %v10488_v52 }
 0xa06   :  { %4570 = vmatmul.mubr.f32.vlgmr.msra.gmra.mrb[18].mxu0 %v4010_v42 }
 0xa07   :  { %8097 = vmatpush1.bf16.msra.mxu0 %v10490_v49  ;;  %5371 = vmatprep.mubr.f32.mxu0 %v10462_v37 }
 0xa08   :  { %8099 = vmatprep.subr.bf16.mxu0 %v10492_v22 }
 0xa0b   :  { %8101 = vmatpush1.bf16.msra.mxu0 %v10495_v34 }
 0xa0c   :  { %8103 = vmatprep.subr.bf16.mxu0 %v9268_v4 }
 0xa0f   :  { %8105 = vmatpush1.bf16.msra.mxu0 %v9270_v17 }
 0xa10   :  { %8107 = vmatprep.subr.bf16.mxu0 %v9297_v1  ;;  %v4586_v42 = vpop.permute.xlu0 %4585 }
 0xa13   :  { %8109 = vmatpush1.bf16.msra.mxu0 %v9312_v54 }
 0xa14   :  { %8111 = vmatprep.subr.bf16.mxu0 %v9314_v21 }
 0xad9   :  { %v4571_v55 = vpop.f32.mrb[18].mxu0 }
 0xada   :  { %v4576_v29 = vadd.f32 %v4571_v55, %v10527_v45  ;;  %v4573_v19 = vpop.f32.mrb[19].mxu0  ;;  %v1176_v55 = vsel %vm1153_vm0, 4, %v8638_v39 }
 0xadb   :  { %v4577_v62 = vadd.f32 %v4573_v19, %v10528_v28  ;;  %vm1177_vm2 = vcmp.gt.s32.totalorder %v9723_v24, %v1176_v55 }
 0xadc   :  { %8578 = vtanh.f32 %v4576_v29 }
 0xadd   :  { %8580 = vtanh.f32 %v4577_v62 }
 0xae6   :  { %v8579_v27 = vpop.eup %8578 }
 0xae7   :  { %v4580_v33 = vmul.f32 0.5, %v8579_v27  ;;  %v8581_v61 = vpop.eup %8580 }
 0xae8   :  { %v4582_v8 = vmul.f32 0.5, %v8581_v61 }
 0xae9   :  { %v4581_v12 = vadd.f32 0.5, %v4580_v33 }
 0xaea   :  { %v4583_v63 = vadd.f32 0.5, %v4582_v8 }
 0xaeb   :  { %v4589_v56 = vmul.f32 %v8581_v61, %v4581_v12  ;;  %v4588_v3 = vmul.f32 %v4586_v42, %v4581_v12 }
 0xaed   :  { %4591 = vrot.lane.b32.xlu1 %v4589_v56, %s8633_s2 }
 0xb5f   :  { %v4592_v51 = vpop.permute.xlu1 %4591 }
 0xb60   :  { %v4594_v5 = vadd.f32 %v4592_v51, %v4588_v3  ;;  %v10530_v51 = vsel %vm9638_vm11, %v9662_v40, %v9625_v50 }
 0xb62   :  { %8582 = vtanh.f32 %v4594_v5  ;;  %4603 = vrot.lane.b32.xlu1 %v4594_v5, %s8633_s2 }
 0xb6c   :  { %v8583_v14 = vpop.eup %8582 }
 0xb6d   :  { %v4596_v2 = vmul.f32 %v8583_v14, %v4583_v63 }
 0xb6f   :  { %4598 = vrot.lane.b32.xlu0 %v4596_v2, %s8633_s2 }
 0xbd4   :  { %v4604_v45 = vpop.permute.xlu1 %4603 }
 0xbd5   :  { %v10047_v29 = vsel %vm1177_vm2, %v4604_v45, %v9967_v23 }
 0xbd6   :  { %5266 = vrot.lane.b32.xlu0 %v10047_v29, %s8633_s2 }
 0xbe1   :  { %v4599_v19 = vpop.permute.xlu0 %4598 }
 0xbe2   :  { %v10052_v28 = vsel %vm1177_vm2, %v4599_v19, %v9972_v53  ;;  %v10529_v53 = vsel %vm9632_vm10, %v9660_v11, %v9622_v10 }
 0xbe3   :  { %v4608_v62 = vsel %vm111_vm1, %v10052_v28, 0 }
 0xbe4   :  { %v4691_v27 = vand.u32 4294901760, %v4608_v62 }
 0xbe6   :  { %v4692_v33 = vsub.f32 %v4608_v62, %v4691_v27  ;;  %v8639_v62 = vmov 2  }
 0xbe8   :  { %v4693_v12 = vand.u32 4294901760, %v4692_v33 }
 0xbea   :  { %v4694_v61 = vsub.f32 %v4692_v33, %v4693_v12 }
 0xbec   :  { %v4695_v56 = vand.u32 4294901760, %v4694_v61 }
 0xbee   :  { %4696 = vmatmul.mubr.f32.vlgmr.msra.gmra.mrb[22].mxu1 %v4695_v56 }
 0xbef   :  { %8017 = vmatpush1.bf16.msra.mxu1 %v9349_v46  ;;  %4846 = vmatprep.mubr.f32.mxu1 %v10462_v37 }
 0xbf0   :  { %8019 = vmatprep.subr.bf16.mxu1 %v9351_v57 }
 0xbf3   :  { %8021 = vmatpush1.bf16.msra.mxu1 %v9376_v44 }
 0xbf4   :  { %8023 = vmatprep.subr.bf16.mxu1 %v9387_v59 }
 0xbf7   :  { %8025 = vmatpush1.bf16.msra.mxu1 %v9395_v36 }
 0xbf8   :  { %8027 = vmatprep.subr.bf16.mxu1 %v9399_v48 }
 0xbfb   :  { %8029 = vmatpush1.bf16.msra.mxu1 %v9406_v20 }
 0xbfc   :  { %8031 = vmatprep.subr.bf16.mxu1 %v9411_v31 }
 0xbfe   :  { %4848 = vmatmul.mubr.f32.vlgmr.msra.gmra.mrb[22].mxu1 %v4691_v27 }
 0xbff   :  { %8033 = vmatpush1.bf16.msra.mxu1 %v9419_v47  ;;  %4950 = vmatprep.mubr.f32.mxu1 %v10462_v37 }
 0xc00   :  { %8035 = vmatprep.subr.bf16.mxu1 %v9424_v26 }
 0xc03   :  { %8037 = vmatpush1.bf16.msra.mxu1 %v9433_v6 }
 0xc04   :  { %8039 = vmatprep.subr.bf16.mxu1 %v9439_v60 }
 0xc07   :  { %8041 = vmatpush1.bf16.msra.mxu1 %v9447_v32 }
 0xc08   :  { %8043 = vmatprep.subr.bf16.mxu1 %v9452_v25 }
 0xc0b   :  { %8045 = vmatpush1.bf16.msra.mxu1 %v9461_v16 }
 0xc0c   :  { %8047 = vmatprep.subr.bf16.mxu1 %v10488_v52 }
 0xc0e   :  { %4953 = vmatmul.mubr.f32.vlgmr.msra.gmra.mrb[22].mxu1 %v4692_v33 }
 0xc0f   :  { %8049 = vmatpush1.bf16.msra.mxu1 %v10490_v49  ;;  %5039 = vmatprep.mubr.f32.mxu1 %v10462_v37 }
 0xc10   :  { %8051 = vmatprep.subr.bf16.mxu1 %v10492_v22 }
 0xc13   :  { %8053 = vmatpush1.bf16.msra.mxu1 %v10495_v34 }
 0xc14   :  { %8055 = vmatprep.subr.bf16.mxu1 %v9268_v4 }
 0xc17   :  { %8057 = vmatpush1.bf16.msra.mxu1 %v9270_v17 }
 0xc18   :  { %8059 = vmatprep.subr.bf16.mxu1 %v9297_v1 }
 0xc1b   :  { %8061 = vmatpush1.bf16.msra.mxu1 %v9312_v54 }
 0xc1c   :  { %8063 = vmatprep.subr.bf16.mxu1 %v9497_v18 }
 0xc1e   :  { %5043 = vmatmul.mubr.f32.vlgmr.msra.gmra.mrb[22].mxu1 %v4693_v12 }
 0xc1f   :  { %8065 = vmatpush1.bf16.msra.mxu1 %v9507_v7  ;;  %5161 = vmatprep.mubr.f32.mxu1 %v10462_v37 }
 0xc20   :  { %8067 = vmatprep.subr.bf16.mxu1 %v9514_v58 }
 0xc23   :  { %8069 = vmatpush1.bf16.msra.mxu1 %v9525_v30 }
 0xc24   :  { %8071 = vmatprep.subr.bf16.mxu1 %v9533_v35 }
 0xc27   :  { %8073 = vmatpush1.bf16.msra.mxu1 %v9543_v13 }
 0xc28   :  { %8075 = vmatprep.subr.bf16.mxu1 %v9550_v38 }
 0xc2b   :  { %8077 = vmatpush1.bf16.msra.mxu1 %v9561_v0 }
 0xc2c   :  { %8079 = vmatprep.subr.bf16.mxu1 %v10488_v52 }
 0xc2e   :  { %5163 = vmatmul.mubr.f32.vlgmr.msra.gmra.mrb[22].mxu1 %v4691_v27 }
 0xc2f   :  { %8081 = vmatpush1.bf16.msra.mxu1 %v10490_v49  ;;  %5249 = vmatprep.mubr.f32.mxu1 %v10462_v37 }
 0xc30   :  { %8083 = vmatprep.subr.bf16.mxu1 %v10492_v22 }
 0xc33   :  { %8085 = vmatpush1.bf16.msra.mxu1 %v10495_v34 }
 0xc34   :  { %8087 = vmatprep.subr.bf16.mxu1 %v9268_v4 }
 0xc37   :  { %8089 = vmatpush1.bf16.msra.mxu1 %v9270_v17 }
 0xc38   :  { %8091 = vmatprep.subr.bf16.mxu1 %v9297_v1 }
 0xc3b   :  { %8093 = vmatpush1.bf16.msra.mxu1 %v9312_v54 }
 0xc3c   :  { %8191 = vmatprep.subr.bf16.mxu1 %v10488_v52 }
 0xc3e   :  { %5251 = vmatmul.mubr.f32.vlgmr.msra.gmra.mrb[22].mxu1 %v4691_v27  ;;  %v1180_v27 = vsel %vm1153_vm0, 5, %v8639_v62 }
 0xc3f   :  { %8193 = vmatpush1.bf16.msra.mxu1 %v10490_v49  ;;  %6052 = vmatprep.mubr.f32.mxu1 %v10462_v37  ;;  %vm1181_vm3 = vcmp.gt.s32.totalorder %v9723_v24, %v1180_v27 }
 0xc40   :  { %8195 = vmatprep.subr.bf16.mxu1 %v10492_v22 }
 0xc43   :  { %8197 = vmatpush1.bf16.msra.mxu1 %v10495_v34 }
 0xc44   :  { %8199 = vmatprep.subr.bf16.mxu1 %v9268_v4 }
 0xc47   :  { %8201 = vmatpush1.bf16.msra.mxu1 %v9270_v17 }
 0xc48   :  { %8203 = vmatprep.subr.bf16.mxu1 %v9297_v1  ;;  %v5267_v39 = vpop.permute.xlu0 %5266 }
 0xc4b   :  { %8205 = vmatpush1.bf16.msra.mxu1 %v9312_v54 }
 0xc4c   :  { %8207 = vmatprep.subr.bf16.mxu1 %v9314_v21 }
 0xd11   :  { %v5252_v23 = vpop.f32.mrb[22].mxu1 }
 0xd12   :  { %v5257_v42 = vadd.f32 %v5252_v23, %v10529_v53  ;;  %v5254_v3 = vpop.f32.mrb[23].mxu1 }
 0xd13   :  { %v5258_v5 = vadd.f32 %v5254_v3, %v10530_v51 }
 0xd14   :  { %8584 = vtanh.f32 %v5257_v42 }
 0xd15   :  { %8586 = vtanh.f32 %v5258_v5 }
 0xd1e   :  { %v8585_v8 = vpop.eup %8584 }
 0xd1f   :  { %v5261_v63 = vmul.f32 0.5, %v8585_v8  ;;  %v8587_v21 = vpop.eup %8586 }
 0xd20   :  { %v5263_v45 = vmul.f32 0.5, %v8587_v21 }
 0xd21   :  { %v5262_v14 = vadd.f32 0.5, %v5261_v63 }
 0xd22   :  { %v5264_v19 = vadd.f32 0.5, %v5263_v45 }
 0xd23   :  { %v5270_v2 = vmul.f32 %v8587_v21, %v5262_v14  ;;  %v5269_v55 = vmul.f32 %v5267_v39, %v5262_v14  ;;  %v10533_v21 = vld [vmem:[#allocation17_spill] sm:$0xff] }
 0xd25   :  { %5272 = vrot.lane.b32.xlu1 %v5270_v2, %s8633_s2  ;;  %v10534_v2 = vld [vmem:[#allocation16_spill] sm:$0xff] }
 0xd26   :  { %v10535_v39 = vsel %vm9638_vm11, %v10533_v21, %v10534_v2 }
 0xd97   :  { %v5273_v10 = vpop.permute.xlu1 %5272 }
 0xd98   :  { %v5275_v11 = vadd.f32 %v5273_v10, %v5269_v55 }
 0xd9a   :  { %8588 = vtanh.f32 %v5275_v11  ;;  %5284 = vrot.lane.b32.xlu1 %v5275_v11, %s8633_s2 }
 0xda4   :  { %v8589_v50 = vpop.eup %8588 }
 0xda5   :  { %v5277_v40 = vmul.f32 %v8589_v50, %v5264_v19 }
 0xda7   :  { %5279 = vrot.lane.b32.xlu0 %v5277_v40, %s8633_s2 }
 0xe0c   :  { %v5285_v33 = vpop.permute.xlu1 %5284 }
 0xe0d   :  { %v10127_v12 = vsel %vm1181_vm3, %v5285_v33, %v10047_v29 }
 0xe0e   :  { %5947 = vrot.lane.b32.xlu0 %v10127_v12, %s8633_s2 }
 0xe19   :  { %v5280_v61 = vpop.permute.xlu0 %5279 }
 0xe1a   :  { %v10132_v56 = vsel %vm1181_vm3, %v5280_v61, %v10052_v28  ;;  %v10531_v28 = vld [vmem:[#allocation11_spill] sm:$0xff] }
 0xe1b   :  { %v5289_v23 = vsel %vm111_vm1, %v10132_v56, 0  ;;  %v10532_v8 = vsel %vm9632_vm10, %v9680_v15, %v10531_v28 }
 0xe1c   :  { %v5372_v53 = vand.u32 4294901760, %v5289_v23 }
 0xe1e   :  { %v5373_v42 = vsub.f32 %v5289_v23, %v5372_v53 }
 0xe20   :  { %v5374_v3 = vand.u32 4294901760, %v5373_v42 }
 0xe22   :  { %v5375_v51 = vsub.f32 %v5373_v42, %v5374_v3 }
 0xe24   :  { %v5376_v5 = vand.u32 4294901760, %v5375_v51 }
 0xe26   :  { %5377 = vmatmul.mubr.f32.vlgmr.msra.gmra.mrb[20].mxu0 %v5376_v5 }
 0xe27   :  { %8113 = vmatpush1.bf16.msra.mxu0 %v9349_v46  ;;  %5527 = vmatprep.mubr.f32.mxu0 %v10462_v37 }
 0xe28   :  { %8115 = vmatprep.subr.bf16.mxu0 %v9351_v57 }
 0xe2b   :  { %8117 = vmatpush1.bf16.msra.mxu0 %v9376_v44 }
 0xe2c   :  { %8119 = vmatprep.subr.bf16.mxu0 %v9387_v59 }
 0xe2f   :  { %8121 = vmatpush1.bf16.msra.mxu0 %v9395_v36 }
 0xe30   :  { %8123 = vmatprep.subr.bf16.mxu0 %v9399_v48 }
 0xe33   :  { %8125 = vmatpush1.bf16.msra.mxu0 %v9406_v20 }
 0xe34   :  { %8127 = vmatprep.subr.bf16.mxu0 %v9411_v31 }
 0xe36   :  { %5529 = vmatmul.mubr.f32.vlgmr.msra.gmra.mrb[20].mxu0 %v5372_v53 }
 0xe37   :  { %8129 = vmatpush1.bf16.msra.mxu0 %v9419_v47  ;;  %5631 = vmatprep.mubr.f32.mxu0 %v10462_v37 }
 0xe38   :  { %8131 = vmatprep.subr.bf16.mxu0 %v9424_v26 }
 0xe3b   :  { %8133 = vmatpush1.bf16.msra.mxu0 %v9433_v6 }
 0xe3c   :  { %8135 = vmatprep.subr.bf16.mxu0 %v9439_v60 }
 0xe3f   :  { %8137 = vmatpush1.bf16.msra.mxu0 %v9447_v32 }
 0xe40   :  { %8139 = vmatprep.subr.bf16.mxu0 %v9452_v25 }
 0xe43   :  { %8141 = vmatpush1.bf16.msra.mxu0 %v9461_v16 }
 0xe44   :  { %8143 = vmatprep.subr.bf16.mxu0 %v10488_v52 }
 0xe46   :  { %5634 = vmatmul.mubr.f32.vlgmr.msra.gmra.mrb[20].mxu0 %v5373_v42  ;;  %v8640_v42 = vmov 1  }
 0xe47   :  { %8145 = vmatpush1.bf16.msra.mxu0 %v10490_v49  ;;  %5720 = vmatprep.mubr.f32.mxu0 %v10462_v37 }
 0xe48   :  { %8147 = vmatprep.subr.bf16.mxu0 %v10492_v22 }
 0xe4b   :  { %8149 = vmatpush1.bf16.msra.mxu0 %v10495_v34 }
 0xe4c   :  { %8151 = vmatprep.subr.bf16.mxu0 %v9268_v4 }
 0xe4f   :  { %8153 = vmatpush1.bf16.msra.mxu0 %v9270_v17 }
 0xe50   :  { %8155 = vmatprep.subr.bf16.mxu0 %v9297_v1 }
 0xe53   :  { %8157 = vmatpush1.bf16.msra.mxu0 %v9312_v54 }
 0xe54   :  { %8159 = vmatprep.subr.bf16.mxu0 %v9497_v18 }
 0xe56   :  { %5724 = vmatmul.mubr.f32.vlgmr.msra.gmra.mrb[20].mxu0 %v5374_v3  ;;  %v1184_v3 = vsel %vm1153_vm0, 6, %v8640_v42 }
 0xe57   :  { %8161 = vmatpush1.bf16.msra.mxu0 %v9507_v7  ;;  %5842 = vmatprep.mubr.f32.mxu0 %v10462_v37  ;;  %vm1185_vm4 = vcmp.gt.s32.totalorder %v9723_v24, %v1184_v3  ;;  %v6666_v3 = vld [vmem:[%s10400_s4 + $0x38] sm:$0xff] }
 0xe58   :  { %8163 = vmatprep.subr.bf16.mxu0 %v9514_v58 }
 0xe5b   :  { %8165 = vmatpush1.bf16.msra.mxu0 %v9525_v30 }
 0xe5c   :  { %8167 = vmatprep.subr.bf16.mxu0 %v9533_v35 }
 0xe5f   :  { %8169 = vmatpush1.bf16.msra.mxu0 %v9543_v13 }
 0xe60   :  { %8171 = vmatprep.subr.bf16.mxu0 %v9550_v38 }
 0xe63   :  { %8173 = vmatpush1.bf16.msra.mxu0 %v9561_v0 }
 0xe64   :  { %8175 = vmatprep.subr.bf16.mxu0 %v10488_v52 }
 0xe66   :  { %5844 = vmatmul.mubr.f32.vlgmr.msra.gmra.mrb[20].mxu0 %v5372_v53 }
 0xe67   :  { %8177 = vmatpush1.bf16.msra.mxu0 %v10490_v49  ;;  %5930 = vmatprep.mubr.f32.mxu0 %v10462_v37 }
 0xe68   :  { %8179 = vmatprep.subr.bf16.mxu0 %v10492_v22 }
 0xe6b   :  { %8181 = vmatpush1.bf16.msra.mxu0 %v10495_v34 }
 0xe6c   :  { %8183 = vmatprep.subr.bf16.mxu0 %v9268_v4 }
 0xe6f   :  { %8185 = vmatpush1.bf16.msra.mxu0 %v9270_v17 }
 0xe70   :  { %8187 = vmatprep.subr.bf16.mxu0 %v9297_v1 }
 0xe73   :  { %8189 = vmatpush1.bf16.msra.mxu0 %v9312_v54 }
 0xe76   :  { %5932 = vmatmul.mubr.f32.vlgmr.msra.gmra.mrb[20].mxu0 %v5372_v53 }
 0xe77   :  { %7324 = vmatprep.mubr.msk.f32.mxu0 %vm8642_vm5, %v10462_v37 }
 0xe80   :  { %v5948_v40 = vpop.permute.xlu0 %5947 }
 0xf49   :  { %v5933_v29 = vpop.f32.mrb[20].mxu0 }
 0xf4a   :  { %v5938_v63 = vadd.f32 %v5933_v29, %v10532_v8  ;;  %v5935_v14 = vpop.f32.mrb[21].mxu0 }
 0xf4b   :  { %v5939_v55 = vadd.f32 %v5935_v14, %v10535_v39 }
 0xf4c   :  { %8590 = vtanh.f32 %v5938_v63 }
 0xf4d   :  { %8592 = vtanh.f32 %v5939_v55  ;;  %v8641_v55 = vmov 0.0|0.0  }
 0xf4e   :  { %8286 = vmatprep.subr.bf16.mxu0 %v8641_v55 }
 0xf56   :  { %v8591_v10 = vpop.eup %8590 }
 0xf57   :  { %v5942_v11 = vmul.f32 0.5, %v8591_v10  ;;  %v8593_v19 = vpop.eup %8592  ;;  %v6661_v10 = vld [vmem:[%s10400_s4 + $0x10] sm:$0xff] }
 0xf58   :  { %v5944_v33 = vmul.f32 0.5, %v8593_v19 }
 0xf59   :  { %v5943_v45 = vadd.f32 0.5, %v5942_v11  ;;  %v6662_v11 = vld [vmem:[%s10400_s4 + $0x18] sm:$0xff] }
 0xf5a   :  { %v5945_v61 = vadd.f32 0.5, %v5944_v33  ;;  %v6663_v33 = vld [vmem:[%s10400_s4 + $0x20] sm:$0xff] }
 0xf5b   :  { %v5951_v50 = vmul.f32 %v8593_v19, %v5943_v45  ;;  %v5950_v62 = vmul.f32 %v5948_v40, %v5943_v45  ;;  %v6684_v45 = vand.u32 4294901760, %v6661_v10  ;;  %v6687_v19 = vand.u32 4294901760, %v6662_v11 }
 0xf5d   :  { %5953 = vrot.lane.b32.xlu1 %v5951_v50, %s8633_s2  ;;  %v10285_v50 = vpack.c.bf16 %v6687_v19, %v6684_v45 }
 0xfcf   :  { %v5954_v15 = vpop.permute.xlu1 %5953 }
 0xfd0   :  { %v5956_v27 = vadd.f32 %v5954_v15, %v5950_v62  ;;  %v10291_v15 = vsub.f32 %v6661_v10, %v6684_v45 }
 0xfd2   :  { %8594 = vtanh.f32 %v5956_v27  ;;  %5965 = vrot.lane.b32.xlu1 %v5956_v27, %s8633_s2  ;;  %v10293_v27 = vsub.f32 %v6662_v11, %v6687_v19 }
 0xfdc   :  { %v8595_v23 = vpop.eup %8594 }
 0xfdd   :  { %v5958_v53 = vmul.f32 %v8595_v23, %v5945_v61  ;;  %v6664_v61 = vld [vmem:[%s10400_s4 + $0x28] sm:$0xff]  ;;  %v6665_v23 = vld [vmem:[%s10400_s4 + $0x30] sm:$0xff] }
 0xfde   :  { %v6693_v42 = vand.u32 4294901760, %v6664_v61 }
 0xfdf   :  { %5960 = vrot.lane.b32.xlu0 %v5958_v53, %s8633_s2  ;;  %v6690_v53 = vand.u32 4294901760, %v6663_v33 }
0x1044   :  { %v5966_v51 = vpop.permute.xlu1 %5965 }
0x1045   :  { %v5968_v5 = vsel %vm1185_vm4, %v5966_v51, %v10127_v12  ;;  %v6678_v12 = vand.u32 4294901760, %v6659_v9  ;;  %v6696_v51 = vand.u32 4294901760, %v6665_v23 }
0x1046   :  { %6628 = vrot.lane.b32.xlu0 %v5968_v5, %s8633_s2  ;;  %v6699_v5 = vand.u32 4294901760, %v6666_v3 }
0x1047   :  { %v10287_v40 = vsub.f32 %v6659_v9, %v6678_v12 }
0x1051   :  { %v5961_v29 = vpop.permute.xlu0 %5960 }
0x1052   :  { %v10199_v28 = vsel %vm1185_vm4, %v5961_v29, %v10132_v56  ;;  %v10311_v29 = vpack.c.bf16 %v6693_v42, %v6690_v53 }
0x1053   :  { %v5970_v8 = vsel %vm111_vm1, %v10199_v28, 0 }
0x1054   :  { %v6053_v63 = vand.u32 4294901760, %v5970_v8 }
0x1056   :  { %v6054_v14 = vsub.f32 %v5970_v8, %v6053_v63  ;;  %v10315_v8 = vsub.f32 %v6664_v61, %v6693_v42 }
0x1058   :  { %v6055_v21 = vand.u32 4294901760, %v6054_v14 }
0x105a   :  { %v6056_v2 = vsub.f32 %v6054_v14, %v6055_v21 }
0x105c   :  { %v6057_v41 = vand.u32 4294901760, %v6056_v2  ;;  %v6763_v2 = vand.u32 4294901760, %v10287_v40 }
0x105e   :  { %6058 = vmatmul.mubr.f32.vlgmr.msra.gmra.mrb[24].mxu1 %v6057_v41 }
0x105f   :  { %8209 = vmatpush1.bf16.msra.mxu1 %v9349_v46  ;;  %6208 = vmatprep.mubr.f32.mxu1 %v10462_v37 }
0x1060   :  { %8211 = vmatprep.subr.bf16.mxu1 %v9351_v57  ;;  %v10536_v57 = vld [vmem:[#allocation9_spill] sm:$0xff] }
0x1063   :  { %8213 = vmatpush1.bf16.msra.mxu1 %v9376_v44  ;;  %v10537_v44 = vld [vmem:[#allocation7_spill] sm:$0xff] }
0x1064   :  { %8215 = vmatprep.subr.bf16.mxu1 %v9387_v59  ;;  %v10538_v59 = vsel %vm9632_vm10, %v10536_v57, %v10537_v44 }
0x1067   :  { %8217 = vmatpush1.bf16.msra.mxu1 %v9395_v36 }
0x1068   :  { %8219 = vmatprep.subr.bf16.mxu1 %v9399_v48 }
0x106b   :  { %8221 = vmatpush1.bf16.msra.mxu1 %v9406_v20  ;;  %v10539_v20 = vld [vmem:[#allocation12_spill] sm:$0xff] }
0x106c   :  { %8223 = vmatprep.subr.bf16.mxu1 %v9411_v31  ;;  %v10540_v31 = vld [vmem:[#allocation15_spill] sm:$0xff] }
0x106e   :  { %6210 = vmatmul.mubr.f32.vlgmr.msra.gmra.mrb[24].mxu1 %v6053_v63 }
0x106f   :  { %8225 = vmatpush1.bf16.msra.mxu1 %v9419_v47  ;;  %6312 = vmatprep.mubr.f32.mxu1 %v10462_v37 }
0x1070   :  { %8227 = vmatprep.subr.bf16.mxu1 %v9424_v26 }
0x1073   :  { %8229 = vmatpush1.bf16.msra.mxu1 %v9433_v6 }
0x1074   :  { %8231 = vmatprep.subr.bf16.mxu1 %v9439_v60 }
0x1077   :  { %8233 = vmatpush1.bf16.msra.mxu1 %v9447_v32 }
0x1078   :  { %8235 = vmatprep.subr.bf16.mxu1 %v9452_v25 }
0x107b   :  { %8237 = vmatpush1.bf16.msra.mxu1 %v9461_v16 }
0x107c   :  { %8239 = vmatprep.subr.bf16.mxu1 %v10488_v52 }
0x107e   :  { %6315 = vmatmul.mubr.f32.vlgmr.msra.gmra.mrb[24].mxu1 %v6054_v14  ;;  %v10319_v14 = vsub.f32 %v6666_v3, %v6699_v5 }
0x107f   :  { %8241 = vmatpush1.bf16.msra.mxu1 %v10490_v49  ;;  %6401 = vmatprep.mubr.f32.mxu1 %v10462_v37 }
0x1080   :  { %8243 = vmatprep.subr.bf16.mxu1 %v10492_v22 }
0x1083   :  { %8245 = vmatpush1.bf16.msra.mxu1 %v10495_v34 }
0x1084   :  { %8247 = vmatprep.subr.bf16.mxu1 %v9268_v4 }
0x1087   :  { %8249 = vmatpush1.bf16.msra.mxu1 %v9270_v17 }
0x1088   :  { %8251 = vmatprep.subr.bf16.mxu1 %v9297_v1 }
0x108b   :  { %8253 = vmatpush1.bf16.msra.mxu1 %v9312_v54 }
0x108c   :  { %8255 = vmatprep.subr.bf16.mxu1 %v9497_v18 }
0x108e   :  { %6405 = vmatmul.mubr.f32.vlgmr.msra.gmra.mrb[24].mxu1 %v6055_v21  ;;  %v10322_v21 = vpack.c.bf16 %v6699_v5, %v6696_v51 }
0x108f   :  { %8257 = vmatpush1.bf16.msra.mxu1 %v9507_v7  ;;  %6523 = vmatprep.mubr.f32.mxu1 %v10462_v37  ;;  %v10542_v7 = vld [vmem:[#allocation6_spill] sm:$0xff] }
0x1090   :  { %8259 = vmatprep.subr.bf16.mxu1 %v9514_v58  ;;  %vm1189_vm0 = vcmp.gt.s32.totalorder %v9723_v24, %v10542_v7  ;;  %v6660_v24 = vld [vmem:[%s10400_s4 + $0x8] sm:$0xff] }
0x1091   :  { %v6681_v56 = vand.u32 4294901760, %v6660_v24 }
0x1093   :  { %8261 = vmatpush1.bf16.msra.mxu1 %v9525_v30  ;;  %v10274_v39 = vpack.c.bf16 %v6681_v56, %v6678_v12  ;;  %v10289_v62 = vsub.f32 %v6660_v24, %v6681_v56 }
0x1094   :  { %8263 = vmatprep.subr.bf16.mxu1 %v9533_v35 }
0x1095   :  { %8288 = vmatpush3.bf16.msra.mxu0 %v10274_v39  ;;  %v6770_v41 = vand.u32 4294901760, %v10289_v62 }
0x1096   :  { %8289 = vmatprep.subr.bf16.mxu0 %v8641_v55 }
0x1097   :  { %8265 = vmatpush1.bf16.msra.mxu1 %v9543_v13  ;;  %v6771_v57 = vsub.f32 %v10289_v62, %v6770_v41 }
0x1098   :  { %8267 = vmatprep.subr.bf16.mxu1 %v9550_v38 }
0x1099   :  { %8291 = vmatpush3.bf16.msra.mxu0 %v10285_v50 }
0x109a   :  { %8292 = vmatprep.subr.bf16.mxu0 %v8641_v55 }
0x109b   :  { %8269 = vmatpush1.bf16.msra.mxu1 %v9561_v0 }
0x109c   :  { %8271 = vmatprep.subr.bf16.mxu1 %v10488_v52 }
0x109d   :  { %8294 = vmatpush3.bf16.msra.mxu0 %v10311_v29 }
0x109e   :  { %6525 = vmatmul.mubr.f32.vlgmr.msra.gmra.mrb[24].mxu1 %v6053_v63  ;;  %8295 = vmatprep.subr.bf16.mxu0 %v8641_v55 }
0x109f   :  { %8273 = vmatpush1.bf16.msra.mxu1 %v10490_v49  ;;  %6611 = vmatprep.mubr.f32.mxu1 %v10462_v37 }
0x10a0   :  { %8275 = vmatprep.subr.bf16.mxu1 %v10492_v22 }
0x10a1   :  { %8297 = vmatpush3.bf16.msra.mxu0 %v10322_v21 }
0x10a2   :  { %8298 = vmatprep.subr.bf16.mxu0 %v8641_v55 }
0x10a3   :  { %8277 = vmatpush1.bf16.msra.mxu1 %v10495_v34 }
0x10a4   :  { %8279 = vmatprep.subr.bf16.mxu1 %v9268_v4  ;;  %v10541_v4 = vsel %vm9638_vm11, %v10539_v20, %v10540_v31 }
0x10a7   :  { %8281 = vmatpush1.bf16.msra.mxu1 %v9270_v17 }
0x10a8   :  { %8283 = vmatprep.subr.bf16.mxu1 %v9297_v1 }
0x10ab   :  { %8285 = vmatpush1.bf16.msra.mxu1 %v9312_v54 }
0x10ae   :  { %6613 = vmatmul.mubr.f32.vlgmr.msra.gmra.mrb[24].mxu1 %v6053_v63  ;;  %v10317_v63 = vsub.f32 %v6665_v23, %v6696_v51 }
0x10b8   :  { %v6629_v60 = vpop.permute.xlu0 %6628 }
0x1181   :  { %v6614_v46 = vpop.f32.mrb[24].mxu1 }
0x1182   :  { %v6619_v36 = vadd.f32 %v6614_v46, %v10538_v59  ;;  %v6616_v48 = vpop.f32.mrb[25].mxu1  ;;  %v6764_v46 = vsub.f32 %v10287_v40, %v6763_v2  ;;  %v6772_v59 = vand.u32 4294901760, %v6771_v57 }
0x1183   :  { %v6620_v47 = vadd.f32 %v6616_v48, %v10541_v4  ;;  %v6784_v48 = vand.u32 4294901760, %v10293_v27 }
0x1184   :  { %8596 = vtanh.f32 %v6619_v36  ;;  %v6765_v44 = vand.u32 4294901760, %v6764_v46  ;;  %v6777_v36 = vand.u32 4294901760, %v10291_v15 }
0x1185   :  { %8598 = vtanh.f32 %v6620_v47  ;;  %v6785_v4 = vsub.f32 %v10293_v27, %v6784_v48 }
0x1186   :  { %v8299_v20 = vpack.c.bf16 %v6772_v59, %v6765_v44  ;;  %v6778_v31 = vsub.f32 %v10291_v15, %v6777_v36  ;;  %v8338_v9 = vpack.c.bf16 %v6784_v48, %v6777_v36 }
0x1188   :  { %v6779_v47 = vand.u32 4294901760, %v6778_v31 }
0x118e   :  { %v8597_v17 = vpop.eup %8596 }
0x118f   :  { %v6623_v1 = vmul.f32 0.5, %v8597_v17  ;;  %v8599_v26 = vpop.eup %8598  ;;  %v6786_v17 = vand.u32 4294901760, %v6785_v4 }
0x1190   :  { %v6625_v52 = vmul.f32 0.5, %v8599_v26 }
0x1191   :  { %v6624_v54 = vadd.f32 0.5, %v6623_v1 }
0x1192   :  { %v6626_v49 = vadd.f32 0.5, %v6625_v52  ;;  %v6812_v52 = vand.u32 4294901760, %v10319_v14 }
0x1193   :  { %v6632_v6 = vmul.f32 %v8599_v26, %v6624_v54  ;;  %v6631_v32 = vmul.f32 %v6629_v60, %v6624_v54  ;;  %v6798_v54 = vand.u32 4294901760, %v10315_v8  ;;  %v8302_v26 = vpack.c.bf16 %v6786_v17, %v6779_v47 }
0x1195   :  { %6634 = vrot.lane.b32.xlu1 %v6632_v6, %s8633_s2  ;;  %v6799_v60 = vsub.f32 %v10315_v8, %v6798_v54 }
0x1207   :  { %v6635_v25 = vpop.permute.xlu1 %6634 }
0x1208   :  { %v6637_v16 = vadd.f32 %v6635_v25, %v6631_v32  ;;  %v6800_v25 = vand.u32 4294901760, %v6799_v60 }
0x120a   :  { %8600 = vtanh.f32 %v6637_v16  ;;  %v6805_v16 = vand.u32 4294901760, %v10317_v63 }
0x120c   :  { %v8344_v12 = vpack.c.bf16 %v6812_v52, %v6805_v16 }
0x1214   :  { %v8601_v22 = vpop.eup %8600 }
0x1215   :  { %v6639_v34 = vmul.f32 %v8601_v22, %v6626_v49  ;;  %v6806_v22 = vsub.f32 %v10317_v63, %v6805_v16 }
0x1217   :  { %6641 = vrot.lane.b32.xlu0 %v6639_v34, %s8633_s2  ;;  %v6813_v34 = vsub.f32 %v10319_v14, %v6812_v52 }
0x1219   :  { %v6814_v7 = vand.u32 4294901760, %v6813_v34 }
0x1289   :  { %v6642_v18 = vpop.permute.xlu0 %6641 }
0x128a   :  { %v6644_v58 = vsel %vm1189_vm0, %v6642_v18, %v10199_v28  ;;  %v10313_v28 = vsub.f32 %v6663_v33, %v6690_v53  ;;  %v6807_v18 = vand.u32 4294901760, %v6806_v22 }
0x128b   :  { %v6645_v30 = vsel %vm111_vm1, %v6644_v58, 0.0 }
0x128c   :  { %6646 = vadd.xlane.f32.xlu1 %v6645_v30  ;;  %v6791_v1 = vand.u32 4294901760, %v10313_v28  ;;  %v8311_v30 = vpack.c.bf16 %v10289_v62, %v10287_v40 }
0x128e   :  { %v6792_v6 = vsub.f32 %v10313_v28, %v6791_v1  ;;  %v8341_v24 = vpack.c.bf16 %v6798_v54, %v6791_v1 }
0x1290   :  { %v6793_v32 = vand.u32 4294901760, %v6792_v6 }
0x1292   :  { %v8305_v49 = vpack.c.bf16 %v6800_v25, %v6793_v32 }
0x1319   :  { %v6647_v35 = vpop.xlane.xlu1 %6646 }
0x131a   :  { %v6649_v13 = vmul.f32 0.015625, %v6647_v35  ;;  %v8314_v35 = vpack.c.bf16 %v10293_v27, %v10291_v15 }
0x131c   :  { %v10263_v38 = vsub.f32 %v6644_v58, %v6649_v13  ;;  %v8308_v58 = vpack.c.bf16 %v6814_v7, %v6807_v18  ;;  %v8317_v13 = vpack.c.bf16 %v10315_v8, %v10313_v28 }
0x131e   :  { %v6651_v0 = vmul.f32 %v10263_v38, %v10263_v38 }
0x1320   :  { %v6652_v43 = vsel %vm111_vm1, %v6651_v0, 0.0  ;;  %v8320_v0 = vpack.c.bf16 %v10319_v14, %v10317_v63 }
0x1321   :  { %6653 = vadd.xlane.f32.xlu0 %v6652_v43  ;;  %v8335_v43 = vpack.c.bf16 %v6770_v41, %v6763_v2 }
0x13ae   :  { %v6654_v56 = vpop.xlane.xlu0 %6653 }
0x13af   :  { %v6655_v10 = vmul.f32 0.015625, %v6654_v56 }
0x13b1   :  { %v6656_v11 = vadd.f32 1e-05, %v6655_v10 }
0x13b3   :  { %8602 = vrsqrt.f32 %v6656_v11 }
0x13bd   :  { %v8603_v45 = vpop.eup %8602 }
0x13be   :  { %v6658_v19 = vmul.f32 %v8603_v45, %v10263_v38  ;;  %v7253_v38 = vld [vmem:[%s10401_s5] ss:$0 sm:$0xff] }
0x13c0   :  { %v6675_v40 = vsel %vm111_vm1, %v6658_v19, 0  ;;  %vm7214_vm1 = vcmask 23552  }
0x13c1   :  { %v6750_v62 = vand.u32 4294901760, %v6675_v40 }
0x13c3   :  { %v6751_v15 = vsub.f32 %v6675_v40, %v6750_v62 }
0x13c5   :  { %v6752_v27 = vand.u32 4294901760, %v6751_v15 }
0x13c7   :  { %v6753_v33 = vsub.f32 %v6751_v15, %v6752_v27 }
0x13c9   :  { %v6754_v61 = vand.u32 4294901760, %v6753_v33 }
0x13cb   :  { %7325 = vmatmul.mubr.f32.vlgmr.msra.gmra.mrb[22].mxu0 %v6754_v61 }
0x13cc   :  { %8300 = vmatpush3.bf16.msra.mxu0 %v8299_v20  ;;  %7343 = vmatprep.mubr.msk.f32.mxu0 %vm8642_vm5, %v10462_v37 }
0x13cd   :  { %8301 = vmatprep.subr.bf16.mxu0 %v8641_v55 }
0x13d0   :  { %8303 = vmatpush3.bf16.msra.mxu0 %v8302_v26 }
0x13d1   :  { %8304 = vmatprep.subr.bf16.mxu0 %v8641_v55 }
0x13d4   :  { %8306 = vmatpush3.bf16.msra.mxu0 %v8305_v49 }
0x13d5   :  { %8307 = vmatprep.subr.bf16.mxu0 %v8641_v55 }
0x13d8   :  { %8309 = vmatpush3.bf16.msra.mxu0 %v8308_v58 }
0x13d9   :  { %8310 = vmatprep.subr.bf16.mxu0 %v8641_v55 }
0x13db   :  { %7344 = vmatmul.mubr.f32.vlgmr.msra.gmra.mrb[22].mxu0 %v6750_v62 }
0x13dc   :  { %8312 = vmatpush3.bf16.msra.mxu0 %v8311_v30  ;;  %7362 = vmatprep.mubr.msk.f32.mxu0 %vm8642_vm5, %v10462_v37 }
0x13dd   :  { %8313 = vmatprep.subr.bf16.mxu0 %v8641_v55 }
0x13e0   :  { %8315 = vmatpush3.bf16.msra.mxu0 %v8314_v35 }
0x13e1   :  { %8316 = vmatprep.subr.bf16.mxu0 %v8641_v55 }
0x13e4   :  { %8318 = vmatpush3.bf16.msra.mxu0 %v8317_v13 }
0x13e5   :  { %8319 = vmatprep.subr.bf16.mxu0 %v8641_v55 }
0x13e8   :  { %8321 = vmatpush3.bf16.msra.mxu0 %v8320_v0 }
0x13e9   :  { %8322 = vmatprep.subr.bf16.mxu0 %v8641_v55 }
0x13eb   :  { %7363 = vmatmul.mubr.f32.vlgmr.msra.gmra.mrb[22].mxu0 %v6751_v15 }
0x13ec   :  { %8324 = vmatpush3.bf16.msra.mxu0 %v10274_v39  ;;  %7381 = vmatprep.mubr.msk.f32.mxu0 %vm8642_vm5, %v10462_v37 }
0x13ed   :  { %8325 = vmatprep.subr.bf16.mxu0 %v8641_v55 }
0x13f0   :  { %8327 = vmatpush3.bf16.msra.mxu0 %v10285_v50 }
0x13f1   :  { %8328 = vmatprep.subr.bf16.mxu0 %v8641_v55 }
0x13f4   :  { %8330 = vmatpush3.bf16.msra.mxu0 %v10311_v29 }
0x13f5   :  { %8331 = vmatprep.subr.bf16.mxu0 %v8641_v55 }
0x13f8   :  { %8333 = vmatpush3.bf16.msra.mxu0 %v10322_v21 }
0x13f9   :  { %8334 = vmatprep.subr.bf16.mxu0 %v8641_v55 }
0x13fb   :  { %7382 = vmatmul.mubr.f32.vlgmr.msra.gmra.mrb[22].mxu0 %v6752_v27 }
0x13fc   :  { %8336 = vmatpush3.bf16.msra.mxu0 %v8335_v43  ;;  %7400 = vmatprep.mubr.msk.f32.mxu0 %vm8642_vm5, %v10462_v37 }
0x13fd   :  { %8337 = vmatprep.subr.bf16.mxu0 %v8641_v55 }
0x1400   :  { %8339 = vmatpush3.bf16.msra.mxu0 %v8338_v9 }
0x1401   :  { %8340 = vmatprep.subr.bf16.mxu0 %v8641_v55 }
0x1404   :  { %8342 = vmatpush3.bf16.msra.mxu0 %v8341_v24 }
0x1405   :  { %8343 = vmatprep.subr.bf16.mxu0 %v8641_v55 }
0x1408   :  { %8345 = vmatpush3.bf16.msra.mxu0 %v8344_v12 }
0x1409   :  { %8346 = vmatprep.subr.bf16.mxu0 %v8641_v55 }
0x140b   :  { %7401 = vmatmul.mubr.f32.vlgmr.msra.gmra.mrb[22].mxu0 %v6750_v62 }
0x140c   :  { %8348 = vmatpush3.bf16.msra.mxu0 %v10274_v39  ;;  %7419 = vmatprep.mubr.msk.f32.mxu0 %vm8642_vm5, %v10462_v37 }
0x140d   :  { %8349 = vmatprep.subr.bf16.mxu0 %v8641_v55 }
0x1410   :  { %8351 = vmatpush3.bf16.msra.mxu0 %v10285_v50 }
0x1411   :  { %8352 = vmatprep.subr.bf16.mxu0 %v8641_v55 }
0x1414   :  { %8354 = vmatpush3.bf16.msra.mxu0 %v10311_v29 }
0x1415   :  { %8355 = vmatprep.subr.bf16.mxu0 %v8641_v55 }
0x1418   :  { %8357 = vmatpush3.bf16.msra.mxu0 %v10322_v21 }
0x141b   :  { %7420 = vmatmul.mubr.f32.vlgmr.msra.gmra.mrb[22].mxu0 %v6750_v62 }
0x14ee   :  { %v7210_v39 = vpop.f32.mrb[22].mxu0 }
0x14ef   :  { %v8382_v37 = vadd.f32 %v7253_v38, %v7210_v39  ;;  %v7421_v23 = vpop.f32.mrb[23].mxu0 }
0x14f1   :  { %7215 = vst.msk [vmem:[%s10402_s6] sm:$0xff] %vm7214_vm1, %v8382_v37 }
0x14f2   :  { %7220 = vsyncpa [#allocation3], 1 }

</bundles_post_ra>
